<compile_context>
chip_gen: v6e
topology: v6e:2x2x1
jax: 0.10.0
libtpu: 0.0.40
codegen_flags: <defaults>
</compile_context>

<pallas_src>
import functools
import math

import jax
import jax.numpy as jnp
from jax import lax
from jax.experimental import pallas as pl
from jax.experimental.pallas import tpu as pltpu

BLOCK_TOKENS = 256      # token rows per grid step
SCAN_CHUNK = 8          # timesteps unrolled per scan loop iteration (== halo depth)


# ----------------------------- in-kernel math helpers -----------------------------

def _sigmoid(x):
    # sign-stable logistic; reciprocal goes to the (otherwise idle) EUP slot.
    e = jnp.exp(-jnp.abs(x))
    s = pl.reciprocal(1.0 + e, approx=True)
    return jnp.where(x >= 0.0, s, 1.0 - s)


def _silu(x):
    return x * _sigmoid(x)


def _softplus(x):
    # stable softplus (matches F.softplus up to its threshold shortcut)
    return jnp.maximum(x, 0.0) + jnp.log(1.0 + jnp.exp(-jnp.abs(x)))


def _gelu(x):
    # exact (erf) GELU, matching torch.nn.GELU()
    return 0.5 * x * (1.0 + lax.erf(x * (1.0 / math.sqrt(2.0))))


# ----------------------------- Pallas kernels --------------------------------------

def _embed_kernel(x_ref, cx_ref, cy_ref, w1_ref, b1_ref, pwx_ref, pwy_ref,
                  peb_ref, o_ref):
    # fc1 + GELU + linear positional embedding (2-wide matmul done as VPU outer-prod)
    y = jnp.dot(x_ref[...].astype(jnp.bfloat16), w1_ref[...],
                preferred_element_type=jnp.float32) + b1_ref[...]
    y = _gelu(y)
    pe = cx_ref[...] * pwx_ref[...] + cy_ref[...] * pwy_ref[...] + peb_ref[...]
    o_ref[...] = y + pe


def _mamba_block_kernel(h_ref, rmsw_ref, wx_ref, wz_ref, convw_ref, convb_ref,
                        wdt_ref, dtb_ref, wbc_ref, A_ref, Dv_ref, wout_ref,
                        o_ref,
                        hstate, tail, conv_scr, dlt_scr, dtx_scr, bc_scr, y_scr,
                        *, ED, Nst, K, CH, eps):
    TN = h_ref.shape[0]
    n_chunks = TN // CH

    @pl.when(pl.program_id(0) == 0)
    def _init():
        hstate[...] = jnp.zeros_like(hstate)      # SSM state carried across blocks
        tail[...] = jnp.zeros_like(tail)          # causal-conv left padding / halo

    # ---- RMSNorm ----
    h = h_ref[...]
    ms = jnp.mean(h * h, axis=-1, keepdims=True)
    xn = h * lax.rsqrt(ms + eps) * rmsw_ref[...]
    xn16 = xn.astype(jnp.bfloat16)

    # ---- input projection (no bias), x / z branches ----
    x_in = jnp.dot(xn16, wx_ref[...], preferred_element_type=jnp.float32)   # (TN, ED)
    z = jnp.dot(xn16, wz_ref[...], preferred_element_type=jnp.float32)      # (TN, ED)

    # ---- causal depthwise conv1d (zero pad lives in VMEM, halo carried in `tail`) --
    conv_scr[0:8, :] = tail[...]
    conv_scr[8:8 + TN, :] = x_in
    tail[...] = conv_scr[pl.ds(TN, 8), :]          # last 8 rows of x_in for next block
    acc = convb_ref[...] + conv_scr[pl.ds(8 - (K - 1), TN), :] * convw_ref[0:1, :]
    for k in range(1, K):                          # K is tiny & static
        acc = acc + conv_scr[pl.ds(8 - (K - 1) + k, TN), :] * convw_ref[k:k + 1, :]
    xc = _silu(acc)                                # (TN, ED)
    xc16 = xc.astype(jnp.bfloat16)

    # ---- projections for the scan (dt_proj folded into the delta columns) ----
    dlt = _softplus(jnp.dot(xc16, wdt_ref[...], preferred_element_type=jnp.float32)
                    + dtb_ref[...])                                         # (TN, ED)
    dlt_scr[...] = dlt
    dtx_scr[...] = dlt * xc
    bc_scr[...] = jnp.dot(xc16, wbc_ref[...],
                          preferred_element_type=jnp.float32)               # (TN, 2*Nst)

    # ---- selective scan: CH timesteps unrolled per loop iteration ----
    A = A_ref[...]                                                          # (Nst, ED)
    eye2n = (lax.broadcasted_iota(jnp.int32, (2 * Nst, 2 * Nst), 0) ==
             lax.broadcasted_iota(jnp.int32, (2 * Nst, 2 * Nst), 1))
    row_ids = lax.broadcasted_iota(jnp.int32, (CH, 1), 0)

    def chunk_body(c, carry):
        base = pl.multiple_of(c * CH, CH)
        hst = hstate[...]
        y_acc = jnp.zeros((CH, ED), jnp.float32)
        for t in range(CH):                                # static unroll of 8 steps
            dlt_t = dlt_scr[pl.ds(base + t, 1), :]         # (1, ED)
            dtx_t = dtx_scr[pl.ds(base + t, 1), :]         # (1, ED)
            bc_t = bc_scr[pl.ds(base + t, 1), :]           # (1, 2*Nst)
            # row -> column for B and C in a single masked reduce (off h's crit path)
            bc_col = jnp.sum(jnp.where(eye2n, bc_t, 0.0), axis=1, keepdims=True)
            b_col = bc_col[0:Nst, :]                       # (Nst, 1)
            c_col = bc_col[Nst:2 * Nst, :]                 # (Nst, 1)
            dA = jnp.exp(dlt_t * A)                        # (Nst, ED)
            hst = dA * hst + b_col * dtx_t                 # (Nst, ED)
            y_t = jnp.sum(c_col * hst, axis=0, keepdims=True)        # (1, ED)
            y_acc = y_acc + jnp.where(row_ids == t, y_t, 0.0)
        hstate[...] = hst
        y_scr[pl.ds(base, CH), :] = y_acc                  # one dense 8-row store/chunk
        return carry

    lax.fori_loop(0, n_chunks, chunk_body, 0)

    # ---- skip term, gate, output projection, fused residual ----
    y = y_scr[...] + Dv_ref[...] * xc
    y = y * _silu(z)
    out = jnp.dot(y.astype(jnp.bfloat16), wout_ref[...],
                  preferred_element_type=jnp.float32)
    o_ref[...] = h + out


def _head_kernel(h_ref, lnw_ref, lnb_ref, a1w_ref, a1b_ref, a2w_ref, a2b_ref,
                 clsw_ref, clsb_ref, o_ref, m_scr, l_scr, acc_scr,
                 *, n_valid, eps):
    # LayerNorm -> attention scores (att2 as VPU lane-reduce) -> online softmax pool
    # -> classifier.  Padded rows (>= n_valid) are masked out of the softmax.
    TN = h_ref.shape[0]
    step = pl.program_id(0)

    @pl.when(step == 0)
    def _init():
        m_scr[...] = jnp.full_like(m_scr, -jnp.inf)
        l_scr[...] = jnp.zeros_like(l_scr)
        acc_scr[...] = jnp.zeros_like(acc_scr)

    h = h_ref[...]
    mu = jnp.mean(h, axis=-1, keepdims=True)
    hc = h - mu
    var = jnp.mean(hc * hc, axis=-1, keepdims=True)
    xn = hc * lax.rsqrt(var + eps) * lnw_ref[...] + lnb_ref[...]        # (TN, D)

    a1 = jnp.tanh(jnp.dot(xn.astype(jnp.bfloat16), a1w_ref[...],
                          preferred_element_type=jnp.float32) + a1b_ref[...])
    s = jnp.sum(a1 * a2w_ref[...], axis=-1, keepdims=True) + a2b_ref[...]  # (TN, 1)

    rows = step * TN + lax.broadcasted_iota(jnp.int32, (TN, 1), 0)
    valid = rows < n_valid
    s = jnp.where(valid, s, -jnp.inf)

    m_prev = m_scr[...]
    m_new = jnp.maximum(m_prev, jnp.max(s, axis=0, keepdims=True))
    corr = jnp.exp(m_prev - m_new)
    p = jnp.where(valid, jnp.exp(s - m_new), 0.0)
    l_scr[...] = corr * l_scr[...] + jnp.sum(p, axis=0, keepdims=True)
    acc_scr[...] = corr * acc_scr[...] + jnp.sum(p * xn, axis=0, keepdims=True)
    m_scr[...] = m_new

    @pl.when(step == pl.num_programs(0) - 1)
    def _finalize():
        pooled = acc_scr[...] * pl.reciprocal(l_scr[...], approx=True)   # (1, D)
        o_ref[...] = (jnp.dot(pooled.astype(jnp.bfloat16), clsw_ref[...],
                              preferred_element_type=jnp.float32) + clsb_ref[...])


# ----------------------------- wrappers ---------------------------------------------

def _round_up(a, b):
    return ((a + b - 1) // b) * b


def _choose_block(n):
    return min(BLOCK_TOKENS, _round_up(n, SCAN_CHUNK))


def _embed(params, x, coords, tn):
    npad, in_dim = x.shape
    d = params["fc1_w"].shape[1]
    return pl.pallas_call(
        _embed_kernel,
        out_shape=jax.ShapeDtypeStruct((npad, d), jnp.float32),
        grid=(npad // tn,),
        in_specs=[pl.BlockSpec((tn, in_dim), lambda i: (i, 0)),
                  pl.BlockSpec((tn, 1), lambda i: (i, 0)),
                  pl.BlockSpec((tn, 1), lambda i: (i, 0)),
                  pl.BlockSpec((in_dim, d), lambda i: (0, 0)),
                  pl.BlockSpec((1, d), lambda i: (0, 0)),
                  pl.BlockSpec((1, d), lambda i: (0, 0)),
                  pl.BlockSpec((1, d), lambda i: (0, 0)),
                  pl.BlockSpec((1, d), lambda i: (0, 0))],
        out_specs=pl.BlockSpec((tn, d), lambda i: (i, 0)),
        compiler_params=pltpu.CompilerParams(dimension_semantics=("parallel",)),
    )(x, coords[:, 0:1], coords[:, 1:2],
      params["fc1_w"].astype(jnp.bfloat16), params["fc1_b"],
      params["pe_w"][0:1, :], params["pe_w"][1:2, :], params["pe_b"])


def _mamba_layer(lp, h, tn):
    npad, d = h.shape
    ED = lp["in_w"].shape[1] // 2
    Nst = lp["A_negT"].shape[0]
    K = lp["conv_w"].shape[0]
    dt_rank = lp["dt_w"].shape[0]
    assert K <= 8 and tn % SCAN_CHUNK == 0
    # dt_proj is linear on the dt_rank slice of x_proj -> fold into one (ED, ED) weight
    w_delta = lp["xproj_w"][:, :dt_rank] @ lp["dt_w"]
    w_bc = lp["xproj_w"][:, dt_rank:]
    bf16 = jnp.bfloat16
    kern = functools.partial(_mamba_block_kernel, ED=ED, Nst=Nst, K=K,
                             CH=SCAN_CHUNK, eps=1e-5)
    return pl.pallas_call(
        kern,
        out_shape=jax.ShapeDtypeStruct((npad, d), jnp.float32),
        grid=(npad // tn,),
        in_specs=[pl.BlockSpec((tn, d), lambda i: (i, 0)),          # h (residual in)
                  pl.BlockSpec((1, d), lambda i: (0, 0)),           # rms gamma
                  pl.BlockSpec((d, ED), lambda i: (0, 0)),          # in_proj x (bf16)
                  pl.BlockSpec((d, ED), lambda i: (0, 0)),          # in_proj z (bf16)
                  pl.BlockSpec((K, ED), lambda i: (0, 0)),          # conv taps
                  pl.BlockSpec((1, ED), lambda i: (0, 0)),          # conv bias
                  pl.BlockSpec((ED, ED), lambda i: (0, 0)),         # fused delta W (bf16)
                  pl.BlockSpec((1, ED), lambda i: (0, 0)),          # dt bias
                  pl.BlockSpec((ED, 2 * Nst), lambda i: (0, 0)),    # B|C W (bf16)
                  pl.BlockSpec((Nst, ED), lambda i: (0, 0)),        # A (negative)
                  pl.BlockSpec((1, ED), lambda i: (0, 0)),          # D
                  pl.BlockSpec((ED, d), lambda i: (0, 0))],         # out_proj (bf16)
        out_specs=pl.BlockSpec((tn, d), lambda i: (i, 0)),
        scratch_shapes=[pltpu.VMEM((Nst, ED), jnp.float32),         # SSM state carry
                        pltpu.VMEM((8, ED), jnp.float32),           # conv halo carry
                        pltpu.VMEM((tn + 8, ED), jnp.float32),      # padded conv input
                        pltpu.VMEM((tn, ED), jnp.float32),          # delta
                        pltpu.VMEM((tn, ED), jnp.float32),          # delta * x
                        pltpu.VMEM((tn, 2 * Nst), jnp.float32),     # B|C rows
                        pltpu.VMEM((tn, ED), jnp.float32)],         # scan output y
        compiler_params=pltpu.CompilerParams(
            dimension_semantics=("arbitrary",),
            vmem_limit_bytes=32 * 1024 * 1024),
    )(h, lp["rms_w"], lp["in_w"][:, :ED].astype(bf16), lp["in_w"][:, ED:].astype(bf16),
      lp["conv_w"], lp["conv_b"], w_delta.astype(bf16), lp["dt_b"],
      w_bc.astype(bf16), lp["A_negT"], lp["D_vec"], lp["out_w"].astype(bf16))


def _head(params, h, n_valid, tn):
    npad, d = h.shape
    att = params["att1_w"].shape[1]
    c = params["cls_w"].shape[1]
    kern = functools.partial(_head_kernel, n_valid=n_valid, eps=1e-5)
    return pl.pallas_call(
        kern,
        out_shape=jax.ShapeDtypeStruct((1, c), jnp.float32),
        grid=(npad // tn,),
        in_specs=[pl.BlockSpec((tn, d), lambda i: (i, 0)),
                  pl.BlockSpec((1, d), lambda i: (0, 0)),
                  pl.BlockSpec((1, d), lambda i: (0, 0)),
                  pl.BlockSpec((d, att), lambda i: (0, 0)),
                  pl.BlockSpec((1, att), lambda i: (0, 0)),
                  pl.BlockSpec((1, att), lambda i: (0, 0)),
                  pl.BlockSpec((1, 1), lambda i: (0, 0)),
                  pl.BlockSpec((d, c), lambda i: (0, 0)),
                  pl.BlockSpec((1, c), lambda i: (0, 0))],
        out_specs=pl.BlockSpec((1, c), lambda i: (0, 0)),
        scratch_shapes=[pltpu.VMEM((1, 1), jnp.float32),      # running max
                        pltpu.VMEM((1, 1), jnp.float32),      # running sum(exp)
                        pltpu.VMEM((1, d), jnp.float32)],     # running weighted sum
        compiler_params=pltpu.CompilerParams(dimension_semantics=("arbitrary",)),
    )(h, params["ln_w"], params["ln_b"],
      params["att1_w"].astype(jnp.bfloat16), params["att1_b"],
      params["att2_w"].reshape(1, -1), params["att2_b"],
      params["cls_w"].astype(jnp.bfloat16), params["cls_b"])


# ----------------------------- params & model ---------------------------------------

def _xavier(key, fan_in, fan_out):
    std = math.sqrt(2.0 / (fan_in + fan_out))
    return std * jax.random.normal(key, (fan_in, fan_out), jnp.float32)


def init_params(key, in_dim, d_model, n_layers, d_state, n_classes,
                expand=2, d_conv=4, att_dim=128):
    ED = expand * d_model
    dt_rank = math.ceil(d_model / 16)
    keys = iter(jax.random.split(key, 8 + 8 * n_layers))
    p = {"fc1_w": _xavier(next(keys), in_dim, d_model),
         "fc1_b": jnp.zeros((1, d_model), jnp.float32),
         "pe_w": _xavier(next(keys), 2, d_model),
         "pe_b": jnp.zeros((1, d_model), jnp.float32)}
    layers = []
    cb = 1.0 / math.sqrt(d_conv)
    for _ in range(n_layers):
        lp = {
            "rms_w": jnp.ones((1, d_model), jnp.float32),
            "in_w": _xavier(next(keys), d_model, 2 * ED),
            "conv_w": jax.random.uniform(next(keys), (d_conv, ED), jnp.float32, -cb, cb),
            "conv_b": jax.random.uniform(next(keys), (1, ED), jnp.float32, -cb, cb),
            "xproj_w": _xavier(next(keys), ED, dt_rank + 2 * d_state),
            "dt_w": _xavier(next(keys), dt_rank, ED),
            "dt_b": jnp.zeros((1, ED), jnp.float32),   # initialize_weights zeroes it
            # A_log = log(arange(1..N)) tiled over ED; A = -exp(A_log); stored (N, ED)
            "A_negT": (-jnp.tile(jnp.arange(1, d_state + 1, dtype=jnp.float32)[None, :],
                                 (ED, 1))).T,
            "D_vec": jnp.ones((1, ED), jnp.float32),
            "out_w": _xavier(next(keys), ED, d_model),
        }
        layers.append(lp)
    p["layers"] = layers
    p["ln_w"] = jnp.ones((1, d_model), jnp.float32)
    p["ln_b"] = jnp.zeros((1, d_model), jnp.float32)
    p["att1_w"] = _xavier(next(keys), d_model, att_dim)
    p["att1_b"] = jnp.zeros((1, att_dim), jnp.float32)
    p["att2_w"] = _xavier(next(keys), att_dim, 1)
    p["att2_b"] = jnp.zeros((1, 1), jnp.float32)
    p["cls_w"] = _xavier(next(keys), d_model, n_classes)
    p["cls_b"] = jnp.zeros((1, n_classes), jnp.float32)
    return p


def forward(params, x, coords):
    """x: (N, in_dim), coords: (N, 2).  Batch of 1 squeezed (MIL setup)."""
    n = x.shape[0]
    tn = _choose_block(n)
    npad = _round_up(n, tn)
    pad = npad - n
    xp = jnp.pad(x.astype(jnp.float32), ((0, pad), (0, 0)))
    cp = jnp.pad(coords.astype(jnp.float32), ((0, pad), (0, 0)))

    h = _embed(params, xp, cp, tn)              # fc1 + GELU + pos-emb (+ identity drop)
    for lp in params["layers"]:                 # residual Mamba blocks, fully fused
        h = _mamba_layer(lp, h, tn)
    logits = _head(params, h, n, tn)            # LN + attention pool + classifier

    y_prob = jax.nn.softmax(logits, axis=1)
    y_hat = jnp.argmax(logits, axis=1)[:, None]     # == torch.topk(logits, 1)[1]
    # survival=False path: (logits, Y_prob, Y_hat, None, None)
    return logits, y_prob, y_hat, None, None


if __name__ == "__main__":
    IN_DIM, D_MODEL, N_LAYERS, D_STATE, N_CLASSES = 64, 32, 2, 8, 4
    N_TOKENS = 64

    params = init_params(jax.random.PRNGKey(1), IN_DIM, D_MODEL, N_LAYERS,
                         D_STATE, N_CLASSES)

    kx, kc = jax.random.split(jax.random.PRNGKey(0))
    x = jax.random.normal(kx, (N_TOKENS, IN_DIM), jnp.float32)
    coords = jax.random.uniform(kc, (N_TOKENS, 2), jnp.float32, 0.0, 64.0)

    logits, y_prob, y_hat, _, _ = jax.jit(forward)(params, x, coords)
    jax.block_until_ready((logits, y_prob, y_hat))
    assert logits.shape == (1, N_CLASSES)
    assert y_prob.shape == (1, N_CLASSES)
    assert y_hat.shape == (1, 1)
    print("KERNEL_OK")
</pallas_src>

<mosaic_0001>
module attributes {stable_mosaic.version = 11 : i64} {
  func.func @_embed_kernel(%arg0: i32, %arg1: memref<64x64xf32, #tpu.memory_space<vmem>>, %arg2: memref<64x1xf32, #tpu.memory_space<vmem>>, %arg3: memref<64x1xf32, #tpu.memory_space<vmem>>, %arg4: memref<64x32xbf16, #tpu.memory_space<vmem>>, %arg5: memref<1x32xf32, #tpu.memory_space<vmem>>, %arg6: memref<1x32xf32, #tpu.memory_space<vmem>>, %arg7: memref<1x32xf32, #tpu.memory_space<vmem>>, %arg8: memref<1x32xf32, #tpu.memory_space<vmem>>, %arg9: memref<64x32xf32, #tpu.memory_space<vmem>>) attributes {dimension_semantics = [#tpu.dimension_semantics<parallel>], iteration_bounds = array<i64: 1>, scalar_prefetch = 0 : i64, scratch_operands = 0 : i64, tpu.core_type = #tpu.core_type<tc>, window_params = [{transform_indices = @transform_0, window_bounds = array<i64: 64, 64>}, {transform_indices = @transform_1, window_bounds = array<i64: 64, 1>}, {transform_indices = @transform_2, window_bounds = array<i64: 64, 1>}, {pipeline_mode = #tpu.pipeline_mode<synchronous>, transform_indices = @transform_3, window_bounds = array<i64: 64, 32>}, {pipeline_mode = #tpu.pipeline_mode<synchronous>, transform_indices = @transform_4, window_bounds = array<i64: 1, 32>}, {pipeline_mode = #tpu.pipeline_mode<synchronous>, transform_indices = @transform_5, window_bounds = array<i64: 1, 32>}, {pipeline_mode = #tpu.pipeline_mode<synchronous>, transform_indices = @transform_6, window_bounds = array<i64: 1, 32>}, {pipeline_mode = #tpu.pipeline_mode<synchronous>, transform_indices = @transform_7, window_bounds = array<i64: 1, 32>}, {transform_indices = @transform_8, window_bounds = array<i64: 64, 32>}]} {
    %c0 = arith.constant 0 : index
    %c0_0 = arith.constant 0 : index
    %0 = vector.load %arg1[%c0, %c0_0] : memref<64x64xf32, #tpu.memory_space<vmem>>, vector<64x64xf32>
    %1 = arith.truncf %0 : vector<64x64xf32> to vector<64x64xbf16>
    %c0_1 = arith.constant 0 : index
    %c0_2 = arith.constant 0 : index
    %2 = vector.load %arg4[%c0_1, %c0_2] : memref<64x32xbf16, #tpu.memory_space<vmem>>, vector<64x32xbf16>
    %cst = arith.constant dense<0.000000e+00> : vector<64x32xf32>
    %3 = tpu.matmul %1, %2, %cst {dimension_numbers = #tpu.dot_dimension_numbers<[1], [0], [0], [1], [0, 0, 1, 1], [], []>} : vector<64x64xbf16>, vector<64x32xbf16>, vector<64x32xf32> -> vector<64x32xf32>
    %c0_3 = arith.constant 0 : index
    %c0_4 = arith.constant 0 : index
    %4 = vector.load %arg5[%c0_3, %c0_4] : memref<1x32xf32, #tpu.memory_space<vmem>>, vector<1x32xf32>
    %5 = vector.broadcast %4 : vector<1x32xf32> to vector<64x32xf32>
    %6 = arith.addf %3, %5 : vector<64x32xf32>
    %cst_5 = arith.constant 5.000000e-01 : f32
    %7 = vector.broadcast %cst_5 : f32 to vector<64x32xf32>
    %8 = arith.mulf %7, %6 : vector<64x32xf32>
    %cst_6 = arith.constant 0.707106769 : f32
    %9 = vector.broadcast %cst_6 : f32 to vector<64x32xf32>
    %10 = arith.mulf %6, %9 : vector<64x32xf32>
    %11 = math.erf %10 : vector<64x32xf32>
    %cst_7 = arith.constant 1.000000e+00 : f32
    %12 = vector.broadcast %cst_7 : f32 to vector<64x32xf32>
    %13 = arith.addf %12, %11 : vector<64x32xf32>
    %14 = arith.mulf %8, %13 : vector<64x32xf32>
    %c0_8 = arith.constant 0 : index
    %c0_9 = arith.constant 0 : index
    %15 = vector.load %arg2[%c0_8, %c0_9] : memref<64x1xf32, #tpu.memory_space<vmem>>, vector<64x1xf32>
    %c0_10 = arith.constant 0 : index
    %c0_11 = arith.constant 0 : index
    %16 = vector.load %arg6[%c0_10, %c0_11] : memref<1x32xf32, #tpu.memory_space<vmem>>, vector<1x32xf32>
    %17 = vector.broadcast %15 : vector<64x1xf32> to vector<64x32xf32>
    %18 = vector.broadcast %16 : vector<1x32xf32> to vector<64x32xf32>
    %19 = arith.mulf %17, %18 : vector<64x32xf32>
    %c0_12 = arith.constant 0 : index
    %c0_13 = arith.constant 0 : index
    %20 = vector.load %arg3[%c0_12, %c0_13] : memref<64x1xf32, #tpu.memory_space<vmem>>, vector<64x1xf32>
    %c0_14 = arith.constant 0 : index
    %c0_15 = arith.constant 0 : index
    %21 = vector.load %arg7[%c0_14, %c0_15] : memref<1x32xf32, #tpu.memory_space<vmem>>, vector<1x32xf32>
    %22 = vector.broadcast %20 : vector<64x1xf32> to vector<64x32xf32>
    %23 = vector.broadcast %21 : vector<1x32xf32> to vector<64x32xf32>
    %24 = arith.mulf %22, %23 : vector<64x32xf32>
    %25 = arith.addf %19, %24 : vector<64x32xf32>
    %c0_16 = arith.constant 0 : index
    %c0_17 = arith.constant 0 : index
    %26 = vector.load %arg8[%c0_16, %c0_17] : memref<1x32xf32, #tpu.memory_space<vmem>>, vector<1x32xf32>
    %27 = vector.broadcast %26 : vector<1x32xf32> to vector<64x32xf32>
    %28 = arith.addf %25, %27 : vector<64x32xf32>
    %29 = arith.addf %14, %28 : vector<64x32xf32>
    %c0_18 = arith.constant 0 : index
    %c0_19 = arith.constant 0 : index
    %30 = vector.load %arg9[%c0_18, %c0_19] : memref<64x32xf32, #tpu.memory_space<vmem>>, vector<64x32xf32>
    tpu.vector_store %arg9[%c0_18, %c0_19], %29 {strides = array<i32>} : memref<64x32xf32, #tpu.memory_space<vmem>>, vector<64x32xf32>,
    return
  }
  func.func @transform_0(%arg0: i32) -> (i32, i32) {
    %c0_i32 = arith.constant 0 : i32
    %c0_i32_0 = arith.constant 0 : i32
    return %arg0, %c0_i32 : i32, i32
  }
  func.func @transform_1(%arg0: i32) -> (i32, i32) {
    %c0_i32 = arith.constant 0 : i32
    %c0_i32_0 = arith.constant 0 : i32
    return %arg0, %c0_i32 : i32, i32
  }
  func.func @transform_2(%arg0: i32) -> (i32, i32) {
    %c0_i32 = arith.constant 0 : i32
    %c0_i32_0 = arith.constant 0 : i32
    return %arg0, %c0_i32 : i32, i32
  }
  func.func @transform_3(%arg0: i32) -> (i32, i32) {
    %c0_i32 = arith.constant 0 : i32
    %c0_i32_0 = arith.constant 0 : i32
    %c0_i32_1 = arith.constant 0 : i32
    return %c0_i32, %c0_i32_0 : i32, i32
  }
  func.func @transform_4(%arg0: i32) -> (i32, i32) {
    %c0_i32 = arith.constant 0 : i32
    %c0_i32_0 = arith.constant 0 : i32
    %c0_i32_1 = arith.constant 0 : i32
    return %c0_i32, %c0_i32_0 : i32, i32
  }
  func.func @transform_5(%arg0: i32) -> (i32, i32) {
    %c0_i32 = arith.constant 0 : i32
    %c0_i32_0 = arith.constant 0 : i32
    %c0_i32_1 = arith.constant 0 : i32
    return %c0_i32, %c0_i32_0 : i32, i32
  }
  func.func @transform_6(%arg0: i32) -> (i32, i32) {
    %c0_i32 = arith.constant 0 : i32
    %c0_i32_0 = arith.constant 0 : i32
    %c0_i32_1 = arith.constant 0 : i32
    return %c0_i32, %c0_i32_0 : i32, i32
  }
  func.func @transform_7(%arg0: i32) -> (i32, i32) {
    %c0_i32 = arith.constant 0 : i32
    %c0_i32_0 = arith.constant 0 : i32
    %c0_i32_1 = arith.constant 0 : i32
    return %c0_i32, %c0_i32_0 : i32, i32
  }
  func.func @transform_8(%arg0: i32) -> (i32, i32) {
    %c0_i32 = arith.constant 0 : i32
    %c0_i32_0 = arith.constant 0 : i32
    return %arg0, %c0_i32 : i32, i32
  }
}

module attributes {stable_mosaic.version = 11 : i64} {
  func.func @_head_kernel(%arg0: i32, %arg1: memref<64x32xf32, #tpu.memory_space<vmem>>, %arg2: memref<1x32xf32, #tpu.memory_space<vmem>>, %arg3: memref<1x32xf32, #tpu.memory_space<vmem>>, %arg4: memref<32x128xbf16, #tpu.memory_space<vmem>>, %arg5: memref<1x128xf32, #tpu.memory_space<vmem>>, %arg6: memref<1x128xf32, #tpu.memory_space<vmem>>, %arg7: memref<1x1xf32, #tpu.memory_space<vmem>>, %arg8: memref<32x4xbf16, #tpu.memory_space<vmem>>, %arg9: memref<1x4xf32, #tpu.memory_space<vmem>>, %arg10: memref<1x4xf32, #tpu.memory_space<vmem>>, %arg11: memref<1x1xf32, #tpu.memory_space<vmem>>, %arg12: memref<1x1xf32, #tpu.memory_space<vmem>>, %arg13: memref<1x32xf32, #tpu.memory_space<vmem>>) attributes {dimension_semantics = [#tpu.dimension_semantics<arbitrary>], iteration_bounds = array<i64: 1>, scalar_prefetch = 0 : i64, scratch_operands = 3 : i64, tpu.core_type = #tpu.core_type<tc>, window_params = [{transform_indices = @transform_0, window_bounds = array<i64: 64, 32>}, {pipeline_mode = #tpu.pipeline_mode<synchronous>, transform_indices = @transform_1, window_bounds = array<i64: 1, 32>}, {pipeline_mode = #tpu.pipeline_mode<synchronous>, transform_indices = @transform_2, window_bounds = array<i64: 1, 32>}, {pipeline_mode = #tpu.pipeline_mode<synchronous>, transform_indices = @transform_3, window_bounds = array<i64: 32, 128>}, {pipeline_mode = #tpu.pipeline_mode<synchronous>, transform_indices = @transform_4, window_bounds = array<i64: 1, 128>}, {pipeline_mode = #tpu.pipeline_mode<synchronous>, transform_indices = @transform_5, window_bounds = array<i64: 1, 128>}, {pipeline_mode = #tpu.pipeline_mode<synchronous>, transform_indices = @transform_6, window_bounds = array<i64: 1, 1>}, {pipeline_mode = #tpu.pipeline_mode<synchronous>, transform_indices = @transform_7, window_bounds = array<i64: 32, 4>}, {pipeline_mode = #tpu.pipeline_mode<synchronous>, transform_indices = @transform_8, window_bounds = array<i64: 1, 4>}, {pipeline_mode = #tpu.pipeline_mode<synchronous>, transform_indices = @transform_9, window_bounds = array<i64: 1, 4>}]} {
    %c0_i32 = arith.constant 0 : i32
    %0 = arith.cmpi eq, %arg0, %c0_i32 : i32
    %1 = arith.extui %0 : i1 to i32
    %c0_i32_0 = arith.constant 0 : i32
    %2 = arith.cmpi ne, %1, %c0_i32_0 : i32
    scf.if %2 {
      %cst_40 = arith.constant 0xFF800000 : f32
      %79 = vector.broadcast %cst_40 : f32 to vector<1x1xf32>
      %c0_41 = arith.constant 0 : index
      %c0_42 = arith.constant 0 : index
      %80 = vector.load %arg11[%c0_41, %c0_42] : memref<1x1xf32, #tpu.memory_space<vmem>>, vector<1x1xf32>
      tpu.vector_store %arg11[%c0_41, %c0_42], %79 {strides = array<i32>} : memref<1x1xf32, #tpu.memory_space<vmem>>, vector<1x1xf32>,
      %cst_43 = arith.constant 0.000000e+00 : f32
      %81 = vector.broadcast %cst_43 : f32 to vector<1x1xf32>
      %c0_44 = arith.constant 0 : index
      %c0_45 = arith.constant 0 : index
      %82 = vector.load %arg12[%c0_44, %c0_45] : memref<1x1xf32, #tpu.memory_space<vmem>>, vector<1x1xf32>
      tpu.vector_store %arg12[%c0_44, %c0_45], %81 {strides = array<i32>} : memref<1x1xf32, #tpu.memory_space<vmem>>, vector<1x1xf32>,
      %cst_46 = arith.constant 0.000000e+00 : f32
      %83 = vector.broadcast %cst_46 : f32 to vector<1x32xf32>
      %c0_47 = arith.constant 0 : index
      %c0_48 = arith.constant 0 : index
      %84 = vector.load %arg13[%c0_47, %c0_48] : memref<1x32xf32, #tpu.memory_space<vmem>>, vector<1x32xf32>
      tpu.vector_store %arg13[%c0_47, %c0_48], %83 {strides = array<i32>} : memref<1x32xf32, #tpu.memory_space<vmem>>, vector<1x32xf32>,
    } else {
    }
    %c0 = arith.constant 0 : index
    %c0_1 = arith.constant 0 : index
    %3 = vector.load %arg1[%c0, %c0_1] : memref<64x32xf32, #tpu.memory_space<vmem>>, vector<64x32xf32>
    %cst = arith.constant dense<0.000000e+00> : vector<64xf32>
    %4 = vector.multi_reduction <add>, %3, %cst [1] : vector<64x32xf32> to vector<64xf32>
    %5 = vector.shape_cast %4 : vector<64xf32> to vector<64x1xf32>
    %cst_2 = arith.constant 3.200000e+01 : f32
    %6 = vector.broadcast %cst_2 : f32 to vector<64x1xf32>
    %7 = arith.divf %5, %6 : vector<64x1xf32>
    %8 = vector.broadcast %7 : vector<64x1xf32> to vector<64x32xf32>
    %9 = arith.subf %3, %8 : vector<64x32xf32>
    %10 = arith.mulf %9, %9 : vector<64x32xf32>
    %cst_3 = arith.constant dense<0.000000e+00> : vector<64xf32>
    %11 = vector.multi_reduction <add>, %10, %cst_3 [1] : vector<64x32xf32> to vector<64xf32>
    %12 = vector.shape_cast %11 : vector<64xf32> to vector<64x1xf32>
    %cst_4 = arith.constant 3.200000e+01 : f32
    %13 = vector.broadcast %cst_4 : f32 to vector<64x1xf32>
    %14 = arith.divf %12, %13 : vector<64x1xf32>
    %cst_5 = arith.constant 9.99999974E-6 : f32
    %15 = vector.broadcast %cst_5 : f32 to vector<64x1xf32>
    %16 = arith.addf %14, %15 : vector<64x1xf32>
    %17 = math.rsqrt %16 : vector<64x1xf32>
    %18 = vector.broadcast %17 : vector<64x1xf32> to vector<64x32xf32>
    %19 = arith.mulf %9, %18 : vector<64x32xf32>
    %c0_6 = arith.constant 0 : index
    %c0_7 = arith.constant 0 : index
    %20 = vector.load %arg2[%c0_6, %c0_7] : memref<1x32xf32, #tpu.memory_space<vmem>>, vector<1x32xf32>
    %21 = vector.broadcast %20 : vector<1x32xf32> to vector<64x32xf32>
    %22 = arith.mulf %19, %21 : vector<64x32xf32>
    %c0_8 = arith.constant 0 : index
    %c0_9 = arith.constant 0 : index
    %23 = vector.load %arg3[%c0_8, %c0_9] : memref<1x32xf32, #tpu.memory_space<vmem>>, vector<1x32xf32>
    %24 = vector.broadcast %23 : vector<1x32xf32> to vector<64x32xf32>
    %25 = arith.addf %22, %24 : vector<64x32xf32>
    %26 = arith.truncf %25 : vector<64x32xf32> to vector<64x32xbf16>
    %c0_10 = arith.constant 0 : index
    %c0_11 = arith.constant 0 : index
    %27 = vector.load %arg4[%c0_10, %c0_11] : memref<32x128xbf16, #tpu.memory_space<vmem>>, vector<32x128xbf16>
    %cst_12 = arith.constant dense<0.000000e+00> : vector<64x128xf32>
    %28 = tpu.matmul %26, %27, %cst_12 {dimension_numbers = #tpu.dot_dimension_numbers<[1], [0], [0], [1], [0, 0, 1, 1], [], []>} : vector<64x32xbf16>, vector<32x128xbf16>, vector<64x128xf32> -> vector<64x128xf32>
    %c0_13 = arith.constant 0 : index
    %c0_14 = arith.constant 0 : index
    %29 = vector.load %arg5[%c0_13, %c0_14] : memref<1x128xf32, #tpu.memory_space<vmem>>, vector<1x128xf32>
    %30 = vector.broadcast %29 : vector<1x128xf32> to vector<64x128xf32>
    %31 = arith.addf %28, %30 : vector<64x128xf32>
    %32 = math.tanh %31 : vector<64x128xf32>
    %c0_15 = arith.constant 0 : index
    %c0_16 = arith.constant 0 : index
    %33 = vector.load %arg6[%c0_15, %c0_16] : memref<1x128xf32, #tpu.memory_space<vmem>>, vector<1x128xf32>
    %34 = vector.broadcast %33 : vector<1x128xf32> to vector<64x128xf32>
    %35 = arith.mulf %32, %34 : vector<64x128xf32>
    %cst_17 = arith.constant dense<0.000000e+00> : vector<64xf32>
    %36 = vector.multi_reduction <add>, %35, %cst_17 [1] : vector<64x128xf32> to vector<64xf32>
    %37 = vector.shape_cast %36 : vector<64xf32> to vector<64x1xf32>
    %c0_18 = arith.constant 0 : index
    %c0_19 = arith.constant 0 : index
    %38 = vector.load %arg7[%c0_18, %c0_19] : memref<1x1xf32, #tpu.memory_space<vmem>>, vector<1x1xf32>
    %39 = vector.broadcast %38 : vector<1x1xf32> to vector<64x1xf32>
    %40 = arith.addf %37, %39 : vector<64x1xf32>
    %c64_i32 = arith.constant 64 : i32
    %41 = arith.muli %arg0, %c64_i32 : i32
    %42 = tpu.iota {dimensions = array<i32: 0>} : vector<64x1xi32>
    %43 = vector.broadcast %41 : i32 to vector<64x1xi32>
    %44 = arith.addi %43, %42 : vector<64x1xi32>
    %c64_i32_20 = arith.constant 64 : i32
    %45 = vector.broadcast %c64_i32_20 : i32 to vector<64x1xi32>
    %46 = arith.cmpi slt, %44, %45 : vector<64x1xi32>
    %cst_21 = arith.constant 0xFF800000 : f32
    %47 = vector.broadcast %cst_21 : f32 to vector<64x1xf32>
    %48 = arith.select %46, %40, %47 : vector<64x1xi1>, vector<64x1xf32>
    %c0_22 = arith.constant 0 : index
    %c0_23 = arith.constant 0 : index
    %49 = vector.load %arg11[%c0_22, %c0_23] : memref<1x1xf32, #tpu.memory_space<vmem>>, vector<1x1xf32>
    %cst_24 = arith.constant dense<0xFF800000> : vector<1xf32>
    %50 = vector.multi_reduction <maximumf>, %48, %cst_24 [0] : vector<64x1xf32> to vector<1xf32>
    %51 = vector.shape_cast %50 : vector<1xf32> to vector<1x1xf32>
    %52 = arith.maximumf %49, %51 : vector<1x1xf32>
    %53 = arith.subf %49, %52 : vector<1x1xf32>
    %54 = math.exp %53 : vector<1x1xf32>
    %55 = vector.broadcast %52 : vector<1x1xf32> to vector<64x1xf32>
    %56 = arith.subf %48, %55 : vector<64x1xf32>
    %57 = math.exp %56 : vector<64x1xf32>
    %cst_25 = arith.constant 0.000000e+00 : f32
    %58 = vector.broadcast %cst_25 : f32 to vector<64x1xf32>
    %59 = arith.select %46, %57, %58 : vector<64x1xi1>, vector<64x1xf32>
    %c0_26 = arith.constant 0 : index
    %c0_27 = arith.constant 0 : index
    %60 = vector.load %arg12[%c0_26, %c0_27] : memref<1x1xf32, #tpu.memory_space<vmem>>, vector<1x1xf32>
    %61 = arith.mulf %54, %60 : vector<1x1xf32>
    %cst_28 = arith.constant dense<0.000000e+00> : vector<1xf32>
    %62 = vector.multi_reduction <add>, %59, %cst_28 [0] : vector<64x1xf32> to vector<1xf32>
    %63 = vector.shape_cast %62 : vector<1xf32> to vector<1x1xf32>
    %64 = arith.addf %61, %63 : vector<1x1xf32>
    %c0_29 = arith.constant 0 : index
    %c0_30 = arith.constant 0 : index
    %65 = vector.load %arg12[%c0_29, %c0_30] : memref<1x1xf32, #tpu.memory_space<vmem>>, vector<1x1xf32>
    tpu.vector_store %arg12[%c0_29, %c0_30], %64 {strides = array<i32>} : memref<1x1xf32, #tpu.memory_space<vmem>>, vector<1x1xf32>,
    %c0_31 = arith.constant 0 : index
    %c0_32 = arith.constant 0 : index
    %66 = vector.load %arg13[%c0_31, %c0_32] : memref<1x32xf32, #tpu.memory_space<vmem>>, vector<1x32xf32>
    %67 = vector.broadcast %54 : vector<1x1xf32> to vector<1x32xf32>
    %68 = arith.mulf %67, %66 : vector<1x32xf32>
    %69 = vector.broadcast %59 : vector<64x1xf32> to vector<64x32xf32>
    %70 = arith.mulf %69, %25 : vector<64x32xf32>
    %cst_33 = arith.constant dense<0.000000e+00> : vector<32xf32>
    %71 = vector.multi_reduction <add>, %70, %cst_33 [0] : vector<64x32xf32> to vector<32xf32>
    %72 = vector.shape_cast %71 : vector<32xf32> to vector<1x32xf32>
    %73 = arith.addf %68, %72 : vector<1x32xf32>
    %c0_34 = arith.constant 0 : index
    %c0_35 = arith.constant 0 : index
    %74 = vector.load %arg13[%c0_34, %c0_35] : memref<1x32xf32, #tpu.memory_space<vmem>>, vector<1x32xf32>
    tpu.vector_store %arg13[%c0_34, %c0_35], %73 {strides = array<i32>} : memref<1x32xf32, #tpu.memory_space<vmem>>, vector<1x32xf32>,
    %c0_36 = arith.constant 0 : index
    %c0_37 = arith.constant 0 : index
    %75 = vector.load %arg11[%c0_36, %c0_37] : memref<1x1xf32, #tpu.memory_space<vmem>>, vector<1x1xf32>
    tpu.vector_store %arg11[%c0_36, %c0_37], %52 {strides = array<i32>} : memref<1x1xf32, #tpu.memory_space<vmem>>, vector<1x1xf32>,
    %c0_i32_38 = arith.constant 0 : i32
    %76 = arith.cmpi eq, %arg0, %c0_i32_38 : i32
    %77 = arith.extui %76 : i1 to i32
    %c0_i32_39 = arith.constant 0 : i32
    %78 = arith.cmpi ne, %77, %c0_i32_39 : i32
    scf.if %78 {
      %c0_40 = arith.constant 0 : index
      %c0_41 = arith.constant 0 : index
      %79 = vector.load %arg13[%c0_40, %c0_41] : memref<1x32xf32, #tpu.memory_space<vmem>>, vector<1x32xf32>
      %c0_42 = arith.constant 0 : index
      %c0_43 = arith.constant 0 : index
      %80 = vector.load %arg12[%c0_42, %c0_43] : memref<1x1xf32, #tpu.memory_space<vmem>>, vector<1x1xf32>
      %81 = tpu.reciprocal %80 {approx = true} : vector<1x1xf32> -> vector<1x1xf32>
      %82 = vector.broadcast %81 : vector<1x1xf32> to vector<1x32xf32>
      %83 = arith.mulf %79, %82 : vector<1x32xf32>
      %84 = arith.truncf %83 : vector<1x32xf32> to vector<1x32xbf16>
      %c0_44 = arith.constant 0 : index
      %c0_45 = arith.constant 0 : index
      %85 = vector.load %arg8[%c0_44, %c0_45] : memref<32x4xbf16, #tpu.memory_space<vmem>>, vector<32x4xbf16>
      %cst_46 = arith.constant dense<0.000000e+00> : vector<1x4xf32>
      %86 = tpu.matmul %84, %85, %cst_46 {dimension_numbers = #tpu.dot_dimension_numbers<[1], [0], [0], [1], [0, 0, 1, 1], [], []>} : vector<1x32xbf16>, vector<32x4xbf16>, vector<1x4xf32> -> vector<1x4xf32>
      %c0_47 = arith.constant 0 : index
      %c0_48 = arith.constant 0 : index
      %87 = vector.load %arg9[%c0_47, %c0_48] : memref<1x4xf32, #tpu.memory_space<vmem>>, vector<1x4xf32>
      %88 = arith.addf %86, %87 : vector<1x4xf32>
      %c0_49 = arith.constant 0 : index
      %c0_50 = arith.constant 0 : index
      %89 = vector.load %arg10[%c0_49, %c0_50] : memref<1x4xf32, #tpu.memory_space<vmem>>, vector<1x4xf32>
      tpu.vector_store %arg10[%c0_49, %c0_50], %88 {strides = array<i32>} : memref<1x4xf32, #tpu.memory_space<vmem>>, vector<1x4xf32>,
    } else {
    }
    return
  }
  func.func @transform_0(%arg0: i32) -> (i32, i32) {
    %c0_i32 = arith.constant 0 : i32
    %c0_i32_0 = arith.constant 0 : i32
    return %arg0, %c0_i32 : i32, i32
  }
  func.func @transform_1(%arg0: i32) -> (i32, i32) {
    %c0_i32 = arith.constant 0 : i32
    %c0_i32_0 = arith.constant 0 : i32
    %c0_i32_1 = arith.constant 0 : i32
    return %c0_i32, %c0_i32_0 : i32, i32
  }
  func.func @transform_2(%arg0: i32) -> (i32, i32) {
    %c0_i32 = arith.constant 0 : i32
    %c0_i32_0 = arith.constant 0 : i32
    %c0_i32_1 = arith.constant 0 : i32
    return %c0_i32, %c0_i32_0 : i32, i32
  }
  func.func @transform_3(%arg0: i32) -> (i32, i32) {
    %c0_i32 = arith.constant 0 : i32
    %c0_i32_0 = arith.constant 0 : i32
    %c0_i32_1 = arith.constant 0 : i32
    return %c0_i32, %c0_i32_0 : i32, i32
  }
  func.func @transform_4(%arg0: i32) -> (i32, i32) {
    %c0_i32 = arith.constant 0 : i32
    %c0_i32_0 = arith.constant 0 : i32
    %c0_i32_1 = arith.constant 0 : i32
    return %c0_i32, %c0_i32_0 : i32, i32
  }
  func.func @transform_5(%arg0: i32) -> (i32, i32) {
    %c0_i32 = arith.constant 0 : i32
    %c0_i32_0 = arith.constant 0 : i32
    %c0_i32_1 = arith.constant 0 : i32
    return %c0_i32, %c0_i32_0 : i32, i32
  }
  func.func @transform_6(%arg0: i32) -> (i32, i32) {
    %c0_i32 = arith.constant 0 : i32
    %c0_i32_0 = arith.constant 0 : i32
    %c0_i32_1 = arith.constant 0 : i32
    return %c0_i32, %c0_i32_0 : i32, i32
  }
  func.func @transform_7(%arg0: i32) -> (i32, i32) {
    %c0_i32 = arith.constant 0 : i32
    %c0_i32_0 = arith.constant 0 : i32
    %c0_i32_1 = arith.constant 0 : i32
    return %c0_i32, %c0_i32_0 : i32, i32
  }
  func.func @transform_8(%arg0: i32) -> (i32, i32) {
    %c0_i32 = arith.constant 0 : i32
    %c0_i32_0 = arith.constant 0 : i32
    %c0_i32_1 = arith.constant 0 : i32
    return %c0_i32, %c0_i32_0 : i32, i32
  }
  func.func @transform_9(%arg0: i32) -> (i32, i32) {
    %c0_i32 = arith.constant 0 : i32
    %c0_i32_0 = arith.constant 0 : i32
    %c0_i32_1 = arith.constant 0 : i32
    return %c0_i32, %c0_i32_0 : i32, i32
  }
}

module attributes {stable_mosaic.version = 11 : i64} {
  func.func @_mamba_block_kernel(%arg0: i32, %arg1: memref<64x32xf32, #tpu.memory_space<vmem>>, %arg2: memref<1x32xf32, #tpu.memory_space<vmem>>, %arg3: memref<32x64xbf16, #tpu.memory_space<vmem>>, %arg4: memref<32x64xbf16, #tpu.memory_space<vmem>>, %arg5: memref<4x64xf32, #tpu.memory_space<vmem>>, %arg6: memref<1x64xf32, #tpu.memory_space<vmem>>, %arg7: memref<64x64xbf16, #tpu.memory_space<vmem>>, %arg8: memref<1x64xf32, #tpu.memory_space<vmem>>, %arg9: memref<64x16xbf16, #tpu.memory_space<vmem>>, %arg10: memref<8x64xf32, #tpu.memory_space<vmem>>, %arg11: memref<1x64xf32, #tpu.memory_space<vmem>>, %arg12: memref<64x32xbf16, #tpu.memory_space<vmem>>, %arg13: memref<64x32xf32, #tpu.memory_space<vmem>>, %arg14: memref<8x64xf32, #tpu.memory_space<vmem>>, %arg15: memref<8x64xf32, #tpu.memory_space<vmem>>, %arg16: memref<72x64xf32, #tpu.memory_space<vmem>>, %arg17: memref<64x64xf32, #tpu.memory_space<vmem>>, %arg18: memref<64x64xf32, #tpu.memory_space<vmem>>, %arg19: memref<64x16xf32, #tpu.memory_space<vmem>>, %arg20: memref<64x64xf32, #tpu.memory_space<vmem>>) attributes {dimension_semantics = [#tpu.dimension_semantics<arbitrary>], iteration_bounds = array<i64: 1>, scalar_prefetch = 0 : i64, scratch_operands = 7 : i64, tpu.core_type = #tpu.core_type<tc>, window_params = [{transform_indices = @transform_0, window_bounds = array<i64: 64, 32>}, {pipeline_mode = #tpu.pipeline_mode<synchronous>, transform_indices = @transform_1, window_bounds = array<i64: 1, 32>}, {pipeline_mode = #tpu.pipeline_mode<synchronous>, transform_indices = @transform_2, window_bounds = array<i64: 32, 64>}, {pipeline_mode = #tpu.pipeline_mode<synchronous>, transform_indices = @transform_3, window_bounds = array<i64: 32, 64>}, {pipeline_mode = #tpu.pipeline_mode<synchronous>, transform_indices = @transform_4, window_bounds = array<i64: 4, 64>}, {pipeline_mode = #tpu.pipeline_mode<synchronous>, transform_indices = @transform_5, window_bounds = array<i64: 1, 64>}, {pipeline_mode = #tpu.pipeline_mode<synchronous>, transform_indices = @transform_6, window_bounds = array<i64: 64, 64>}, {pipeline_mode = #tpu.pipeline_mode<synchronous>, transform_indices = @transform_7, window_bounds = array<i64: 1, 64>}, {pipeline_mode = #tpu.pipeline_mode<synchronous>, transform_indices = @transform_8, window_bounds = array<i64: 64, 16>}, {pipeline_mode = #tpu.pipeline_mode<synchronous>, transform_indices = @transform_9, window_bounds = array<i64: 8, 64>}, {pipeline_mode = #tpu.pipeline_mode<synchronous>, transform_indices = @transform_10, window_bounds = array<i64: 1, 64>}, {pipeline_mode = #tpu.pipeline_mode<synchronous>, transform_indices = @transform_11, window_bounds = array<i64: 64, 32>}, {transform_indices = @transform_12, window_bounds = array<i64: 64, 32>}]} {
    %c0_i32 = arith.constant 0 : i32
    %0 = arith.cmpi eq, %arg0, %c0_i32 : i32
    %1 = arith.extui %0 : i1 to i32
    %c0_i32_0 = arith.constant 0 : i32
    %2 = arith.cmpi ne, %1, %c0_i32_0 : i32
    scf.if %2 {
      %cst_70 = arith.constant 0.000000e+00 : f32
      %114 = vector.broadcast %cst_70 : f32 to vector<8x64xf32>
      %c0_71 = arith.constant 0 : index
      %c0_72 = arith.constant 0 : index
      %115 = vector.load %arg14[%c0_71, %c0_72] : memref<8x64xf32, #tpu.memory_space<vmem>>, vector<8x64xf32>
      tpu.vector_store %arg14[%c0_71, %c0_72], %114 {strides = array<i32>} : memref<8x64xf32, #tpu.memory_space<vmem>>, vector<8x64xf32>,
      %cst_73 = arith.constant 0.000000e+00 : f32
      %116 = vector.broadcast %cst_73 : f32 to vector<8x64xf32>
      %c0_74 = arith.constant 0 : index
      %c0_75 = arith.constant 0 : index
      %117 = vector.load %arg15[%c0_74, %c0_75] : memref<8x64xf32, #tpu.memory_space<vmem>>, vector<8x64xf32>
      tpu.vector_store %arg15[%c0_74, %c0_75], %116 {strides = array<i32>} : memref<8x64xf32, #tpu.memory_space<vmem>>, vector<8x64xf32>,
    } else {
    }
    %c0 = arith.constant 0 : index
    %c0_1 = arith.constant 0 : index
    %3 = vector.load %arg1[%c0, %c0_1] : memref<64x32xf32, #tpu.memory_space<vmem>>, vector<64x32xf32>
    %4 = arith.mulf %3, %3 : vector<64x32xf32>
    %cst = arith.constant dense<0.000000e+00> : vector<64xf32>
    %5 = vector.multi_reduction <add>, %4, %cst [1] : vector<64x32xf32> to vector<64xf32>
    %6 = vector.shape_cast %5 : vector<64xf32> to vector<64x1xf32>
    %cst_2 = arith.constant 3.200000e+01 : f32
    %7 = vector.broadcast %cst_2 : f32 to vector<64x1xf32>
    %8 = arith.divf %6, %7 : vector<64x1xf32>
    %cst_3 = arith.constant 9.99999974E-6 : f32
    %9 = vector.broadcast %cst_3 : f32 to vector<64x1xf32>
    %10 = arith.addf %8, %9 : vector<64x1xf32>
    %11 = math.rsqrt %10 : vector<64x1xf32>
    %12 = vector.broadcast %11 : vector<64x1xf32> to vector<64x32xf32>
    %13 = arith.mulf %3, %12 : vector<64x32xf32>
    %c0_4 = arith.constant 0 : index
    %c0_5 = arith.constant 0 : index
    %14 = vector.load %arg2[%c0_4, %c0_5] : memref<1x32xf32, #tpu.memory_space<vmem>>, vector<1x32xf32>
    %15 = vector.broadcast %14 : vector<1x32xf32> to vector<64x32xf32>
    %16 = arith.mulf %13, %15 : vector<64x32xf32>
    %17 = arith.truncf %16 : vector<64x32xf32> to vector<64x32xbf16>
    %c0_6 = arith.constant 0 : index
    %c0_7 = arith.constant 0 : index
    %18 = vector.load %arg3[%c0_6, %c0_7] : memref<32x64xbf16, #tpu.memory_space<vmem>>, vector<32x64xbf16>
    %cst_8 = arith.constant dense<0.000000e+00> : vector<64x64xf32>
    %19 = tpu.matmul %17, %18, %cst_8 {dimension_numbers = #tpu.dot_dimension_numbers<[1], [0], [0], [1], [0, 0, 1, 1], [], []>} : vector<64x32xbf16>, vector<32x64xbf16>, vector<64x64xf32> -> vector<64x64xf32>
    %c0_9 = arith.constant 0 : index
    %c0_10 = arith.constant 0 : index
    %20 = vector.load %arg4[%c0_9, %c0_10] : memref<32x64xbf16, #tpu.memory_space<vmem>>, vector<32x64xbf16>
    %cst_11 = arith.constant dense<0.000000e+00> : vector<64x64xf32>
    %21 = tpu.matmul %17, %20, %cst_11 {dimension_numbers = #tpu.dot_dimension_numbers<[1], [0], [0], [1], [0, 0, 1, 1], [], []>} : vector<64x32xbf16>, vector<32x64xbf16>, vector<64x64xf32> -> vector<64x64xf32>
    %c0_12 = arith.constant 0 : index
    %c0_13 = arith.constant 0 : index
    %22 = vector.load %arg15[%c0_12, %c0_13] : memref<8x64xf32, #tpu.memory_space<vmem>>, vector<8x64xf32>
    %c0_14 = arith.constant 0 : index
    %c0_15 = arith.constant 0 : index
    %23 = vector.load %arg16[%c0_14, %c0_15] : memref<72x64xf32, #tpu.memory_space<vmem>>, vector<8x64xf32>
    tpu.vector_store %arg16[%c0_14, %c0_15], %22 {strides = array<i32>} : memref<72x64xf32, #tpu.memory_space<vmem>>, vector<8x64xf32>,
    %c8 = arith.constant 8 : index
    %c0_16 = arith.constant 0 : index
    %24 = vector.load %arg16[%c8, %c0_16] : memref<72x64xf32, #tpu.memory_space<vmem>>, vector<64x64xf32>
    tpu.vector_store %arg16[%c8, %c0_16], %19 {strides = array<i32>} : memref<72x64xf32, #tpu.memory_space<vmem>>, vector<64x64xf32>,
    %c64 = arith.constant 64 : index
    %c0_17 = arith.constant 0 : index
    %25 = vector.load %arg16[%c64, %c0_17] : memref<72x64xf32, #tpu.memory_space<vmem>>, vector<8x64xf32>
    %c0_18 = arith.constant 0 : index
    %c0_19 = arith.constant 0 : index
    %26 = vector.load %arg15[%c0_18, %c0_19] : memref<8x64xf32, #tpu.memory_space<vmem>>, vector<8x64xf32>
    tpu.vector_store %arg15[%c0_18, %c0_19], %25 {strides = array<i32>} : memref<8x64xf32, #tpu.memory_space<vmem>>, vector<8x64xf32>,
    %c0_20 = arith.constant 0 : index
    %c0_21 = arith.constant 0 : index
    %27 = vector.load %arg6[%c0_20, %c0_21] : memref<1x64xf32, #tpu.memory_space<vmem>>, vector<1x64xf32>
    %c5 = arith.constant 5 : index
    %c0_22 = arith.constant 0 : index
    %28 = vector.load %arg16[%c5, %c0_22] : memref<72x64xf32, #tpu.memory_space<vmem>>, vector<64x64xf32>
    %c0_23 = arith.constant 0 : index
    %c0_24 = arith.constant 0 : index
    %29 = vector.load %arg5[%c0_23, %c0_24] : memref<4x64xf32, #tpu.memory_space<vmem>>, vector<1x64xf32>
    %30 = vector.broadcast %29 : vector<1x64xf32> to vector<64x64xf32>
    %31 = arith.mulf %28, %30 : vector<64x64xf32>
    %32 = vector.broadcast %27 : vector<1x64xf32> to vector<64x64xf32>
    %33 = arith.addf %32, %31 : vector<64x64xf32>
    %c6 = arith.constant 6 : index
    %c0_25 = arith.constant 0 : index
    %34 = vector.load %arg16[%c6, %c0_25] : memref<72x64xf32, #tpu.memory_space<vmem>>, vector<64x64xf32>
    %c1 = arith.constant 1 : index
    %c0_26 = arith.constant 0 : index
    %35 = vector.load %arg5[%c1, %c0_26] : memref<4x64xf32, #tpu.memory_space<vmem>>, vector<1x64xf32>
    %36 = vector.broadcast %35 : vector<1x64xf32> to vector<64x64xf32>
    %37 = arith.mulf %34, %36 : vector<64x64xf32>
    %38 = arith.addf %33, %37 : vector<64x64xf32>
    %c7 = arith.constant 7 : index
    %c0_27 = arith.constant 0 : index
    %39 = vector.load %arg16[%c7, %c0_27] : memref<72x64xf32, #tpu.memory_space<vmem>>, vector<64x64xf32>
    %c2 = arith.constant 2 : index
    %c0_28 = arith.constant 0 : index
    %40 = vector.load %arg5[%c2, %c0_28] : memref<4x64xf32, #tpu.memory_space<vmem>>, vector<1x64xf32>
    %41 = vector.broadcast %40 : vector<1x64xf32> to vector<64x64xf32>
    %42 = arith.mulf %39, %41 : vector<64x64xf32>
    %43 = arith.addf %38, %42 : vector<64x64xf32>
    %c8_29 = arith.constant 8 : index
    %c0_30 = arith.constant 0 : index
    %44 = vector.load %arg16[%c8_29, %c0_30] : memref<72x64xf32, #tpu.memory_space<vmem>>, vector<64x64xf32>
    %c3 = arith.constant 3 : index
    %c0_31 = arith.constant 0 : index
    %45 = vector.load %arg5[%c3, %c0_31] : memref<4x64xf32, #tpu.memory_space<vmem>>, vector<1x64xf32>
    %46 = vector.broadcast %45 : vector<1x64xf32> to vector<64x64xf32>
    %47 = arith.mulf %44, %46 : vector<64x64xf32>
    %48 = arith.addf %43, %47 : vector<64x64xf32>
    %49 = math.absf %48 : vector<64x64xf32>
    %cst_32 = arith.constant 0.000000e+00 : f32
    %50 = vector.broadcast %cst_32 : f32 to vector<64x64xf32>
    %51 = arith.subf %50, %49 : vector<64x64xf32>
    %52 = math.exp %51 : vector<64x64xf32>
    %cst_33 = arith.constant 1.000000e+00 : f32
    %53 = vector.broadcast %cst_33 : f32 to vector<64x64xf32>
    %54 = arith.addf %53, %52 : vector<64x64xf32>
    %55 = tpu.reciprocal %54 {approx = true} : vector<64x64xf32> -> vector<64x64xf32>
    %cst_34 = arith.constant 0.000000e+00 : f32
    %56 = vector.broadcast %cst_34 : f32 to vector<64x64xf32>
    %57 = arith.cmpf oge, %48, %56 : vector<64x64xf32>
    %cst_35 = arith.constant 1.000000e+00 : f32
    %58 = vector.broadcast %cst_35 : f32 to vector<64x64xf32>
    %59 = arith.subf %58, %55 : vector<64x64xf32>
    %60 = arith.select %57, %55, %59 : vector<64x64xi1>, vector<64x64xf32>
    %61 = arith.mulf %48, %60 : vector<64x64xf32>
    %62 = arith.truncf %61 : vector<64x64xf32> to vector<64x64xbf16>
    %c0_36 = arith.constant 0 : index
    %c0_37 = arith.constant 0 : index
    %63 = vector.load %arg7[%c0_36, %c0_37] : memref<64x64xbf16, #tpu.memory_space<vmem>>, vector<64x64xbf16>
    %cst_38 = arith.constant dense<0.000000e+00> : vector<64x64xf32>
    %64 = tpu.matmul %62, %63, %cst_38 {dimension_numbers = #tpu.dot_dimension_numbers<[1], [0], [0], [1], [0, 0, 1, 1], [], []>} : vector<64x64xbf16>, vector<64x64xbf16>, vector<64x64xf32> -> vector<64x64xf32>
    %c0_39 = arith.constant 0 : index
    %c0_40 = arith.constant 0 : index
    %65 = vector.load %arg8[%c0_39, %c0_40] : memref<1x64xf32, #tpu.memory_space<vmem>>, vector<1x64xf32>
    %66 = vector.broadcast %65 : vector<1x64xf32> to vector<64x64xf32>
    %67 = arith.addf %64, %66 : vector<64x64xf32>
    %cst_41 = arith.constant 0.000000e+00 : f32
    %68 = vector.broadcast %cst_41 : f32 to vector<64x64xf32>
    %69 = arith.maximumf %67, %68 : vector<64x64xf32>
    %70 = math.absf %67 : vector<64x64xf32>
    %cst_42 = arith.constant 0.000000e+00 : f32
    %71 = vector.broadcast %cst_42 : f32 to vector<64x64xf32>
    %72 = arith.subf %71, %70 : vector<64x64xf32>
    %73 = math.exp %72 : vector<64x64xf32>
    %cst_43 = arith.constant 1.000000e+00 : f32
    %74 = vector.broadcast %cst_43 : f32 to vector<64x64xf32>
    %75 = arith.addf %74, %73 : vector<64x64xf32>
    %76 = math.log %75 : vector<64x64xf32>
    %77 = arith.addf %69, %76 : vector<64x64xf32>
    %c0_44 = arith.constant 0 : index
    %c0_45 = arith.constant 0 : index
    %78 = vector.load %arg17[%c0_44, %c0_45] : memref<64x64xf32, #tpu.memory_space<vmem>>, vector<64x64xf32>
    tpu.vector_store %arg17[%c0_44, %c0_45], %77 {strides = array<i32>} : memref<64x64xf32, #tpu.memory_space<vmem>>, vector<64x64xf32>,
    %79 = arith.mulf %77, %61 : vector<64x64xf32>
    %c0_46 = arith.constant 0 : index
    %c0_47 = arith.constant 0 : index
    %80 = vector.load %arg18[%c0_46, %c0_47] : memref<64x64xf32, #tpu.memory_space<vmem>>, vector<64x64xf32>
    tpu.vector_store %arg18[%c0_46, %c0_47], %79 {strides = array<i32>} : memref<64x64xf32, #tpu.memory_space<vmem>>, vector<64x64xf32>,
    %c0_48 = arith.constant 0 : index
    %c0_49 = arith.constant 0 : index
    %81 = vector.load %arg9[%c0_48, %c0_49] : memref<64x16xbf16, #tpu.memory_space<vmem>>, vector<64x16xbf16>
    %cst_50 = arith.constant dense<0.000000e+00> : vector<64x16xf32>
    %82 = tpu.matmul %62, %81, %cst_50 {dimension_numbers = #tpu.dot_dimension_numbers<[1], [0], [0], [1], [0, 0, 1, 1], [], []>} : vector<64x64xbf16>, vector<64x16xbf16>, vector<64x16xf32> -> vector<64x16xf32>
    %c0_51 = arith.constant 0 : index
    %c0_52 = arith.constant 0 : index
    %83 = vector.load %arg19[%c0_51, %c0_52] : memref<64x16xf32, #tpu.memory_space<vmem>>, vector<64x16xf32>
    tpu.vector_store %arg19[%c0_51, %c0_52], %82 {strides = array<i32>} : memref<64x16xf32, #tpu.memory_space<vmem>>, vector<64x16xf32>,
    %c0_53 = arith.constant 0 : index
    %c0_54 = arith.constant 0 : index
    %84 = vector.load %arg10[%c0_53, %c0_54] : memref<8x64xf32, #tpu.memory_space<vmem>>, vector<8x64xf32>
    %85 = tpu.iota {dimensions = array<i32: 0>} : vector<16x16xi32>
    %86 = tpu.iota {dimensions = array<i32: 1>} : vector<16x16xi32>
    %87 = arith.cmpi eq, %85, %86 : vector<16x16xi32>
    %88 = tpu.iota {dimensions = array<i32: 0>} : vector<8x1xi32>
    %c0_i32_55 = arith.constant 0 : i32
    %c8_i32 = arith.constant 8 : i32
    %89 = arith.addi %c0_i32_55, %c8_i32 : i32
    %c1_i32 = arith.constant 1 : i32
    scf.for %arg21 = %c0_i32_55 to %89 step %c1_i32  : i32 {
      %c8_i32_70 = arith.constant 8 : i32
      %114 = arith.muli %arg21, %c8_i32_70 : i32
      %115 = tpu.assume_multiple %114, 8 : i32
      %c0_71 = arith.constant 0 : index
      %c0_72 = arith.constant 0 : index
      %116 = vector.load %arg14[%c0_71, %c0_72] : memref<8x64xf32, #tpu.memory_space<vmem>>, vector<8x64xf32>
      %cst_73 = arith.constant 0.000000e+00 : f32
      %117 = vector.broadcast %cst_73 : f32 to vector<8x64xf32>
      %c0_i32_74 = arith.constant 0 : i32
      %118 = arith.addi %115, %c0_i32_74 : i32
      %119 = arith.index_cast %118 : i32 to index
      %c0_75 = arith.constant 0 : index
      %120 = vector.load %arg17[%119, %c0_75] : memref<64x64xf32, #tpu.memory_space<vmem>>, vector<1x64xf32>
      %c0_i32_76 = arith.constant 0 : i32
      %121 = arith.addi %115, %c0_i32_76 : i32
      %122 = arith.index_cast %121 : i32 to index
      %c0_77 = arith.constant 0 : index
      %123 = vector.load %arg18[%122, %c0_77] : memref<64x64xf32, #tpu.memory_space<vmem>>, vector<1x64xf32>
      %c0_i32_78 = arith.constant 0 : i32
      %124 = arith.addi %115, %c0_i32_78 : i32
      %125 = arith.index_cast %124 : i32 to index
      %c0_79 = arith.constant 0 : index
      %126 = vector.load %arg19[%125, %c0_79] : memref<64x16xf32, #tpu.memory_space<vmem>>, vector<1x16xf32>
      %cst_80 = arith.constant 0.000000e+00 : f32
      %127 = vector.shape_cast %126 : vector<1x16xf32> to vector<1x16xf32>
      %128 = vector.broadcast %127 : vector<1x16xf32> to vector<16x16xf32>
      %129 = vector.broadcast %cst_80 : f32 to vector<16x16xf32>
      %130 = arith.select %87, %128, %129 : vector<16x16xi1>, vector<16x16xf32>
      %cst_81 = arith.constant dense<0.000000e+00> : vector<16xf32>
      %131 = vector.multi_reduction <add>, %130, %cst_81 [1] : vector<16x16xf32> to vector<16xf32>
      %132 = vector.shape_cast %131 : vector<16xf32> to vector<16x1xf32>
      %133 = vector.extract_strided_slice %132 {offsets = [0, 0], sizes = [8, 1], strides = [1, 1]} : vector<16x1xf32> to vector<8x1xf32>
      %134 = vector.extract_strided_slice %132 {offsets = [8, 0], sizes = [8, 1], strides = [1, 1]} : vector<16x1xf32> to vector<8x1xf32>
      %135 = vector.broadcast %120 : vector<1x64xf32> to vector<8x64xf32>
      %136 = arith.mulf %135, %84 : vector<8x64xf32>
      %137 = math.exp %136 : vector<8x64xf32>
      %138 = arith.mulf %137, %116 : vector<8x64xf32>
      %139 = vector.broadcast %133 : vector<8x1xf32> to vector<8x64xf32>
      %140 = vector.broadcast %123 : vector<1x64xf32> to vector<8x64xf32>
      %141 = arith.mulf %139, %140 : vector<8x64xf32>
      %142 = arith.addf %138, %141 : vector<8x64xf32>
      %143 = vector.broadcast %134 : vector<8x1xf32> to vector<8x64xf32>
      %144 = arith.mulf %143, %142 : vector<8x64xf32>
      %cst_82 = arith.constant dense<0.000000e+00> : vector<64xf32>
      %145 = vector.multi_reduction <add>, %144, %cst_82 [0] : vector<8x64xf32> to vector<64xf32>
      %146 = vector.shape_cast %145 : vector<64xf32> to vector<1x64xf32>
      %c0_i32_83 = arith.constant 0 : i32
      %147 = vector.broadcast %c0_i32_83 : i32 to vector<8x1xi32>
      %148 = arith.cmpi eq, %88, %147 : vector<8x1xi32>
      %cst_84 = arith.constant 0.000000e+00 : f32
      %149 = vector.shape_cast %148 : vector<8x1xi1> to vector<8x1xi1>
      %150 = vector.broadcast %149 : vector<8x1xi1> to vector<8x64xi1>
      %151 = vector.shape_cast %146 : vector<1x64xf32> to vector<1x64xf32>
      %152 = vector.broadcast %151 : vector<1x64xf32> to vector<8x64xf32>
      %153 = vector.broadcast %cst_84 : f32 to vector<8x64xf32>
      %154 = arith.select %150, %152, %153 : vector<8x64xi1>, vector<8x64xf32>
      %155 = arith.addf %117, %154 : vector<8x64xf32>
      %c1_i32_85 = arith.constant 1 : i32
      %156 = arith.addi %115, %c1_i32_85 : i32
      %157 = arith.index_cast %156 : i32 to index
      %c0_86 = arith.constant 0 : index
      %158 = vector.load %arg17[%157, %c0_86] : memref<64x64xf32, #tpu.memory_space<vmem>>, vector<1x64xf32>
      %c1_i32_87 = arith.constant 1 : i32
      %159 = arith.addi %115, %c1_i32_87 : i32
      %160 = arith.index_cast %159 : i32 to index
      %c0_88 = arith.constant 0 : index
      %161 = vector.load %arg18[%160, %c0_88] : memref<64x64xf32, #tpu.memory_space<vmem>>, vector<1x64xf32>
      %c1_i32_89 = arith.constant 1 : i32
      %162 = arith.addi %115, %c1_i32_89 : i32
      %163 = arith.index_cast %162 : i32 to index
      %c0_90 = arith.constant 0 : index
      %164 = vector.load %arg19[%163, %c0_90] : memref<64x16xf32, #tpu.memory_space<vmem>>, vector<1x16xf32>
      %cst_91 = arith.constant 0.000000e+00 : f32
      %165 = vector.shape_cast %164 : vector<1x16xf32> to vector<1x16xf32>
      %166 = vector.broadcast %165 : vector<1x16xf32> to vector<16x16xf32>
      %167 = vector.broadcast %cst_91 : f32 to vector<16x16xf32>
      %168 = arith.select %87, %166, %167 : vector<16x16xi1>, vector<16x16xf32>
      %cst_92 = arith.constant dense<0.000000e+00> : vector<16xf32>
      %169 = vector.multi_reduction <add>, %168, %cst_92 [1] : vector<16x16xf32> to vector<16xf32>
      %170 = vector.shape_cast %169 : vector<16xf32> to vector<16x1xf32>
      %171 = vector.extract_strided_slice %170 {offsets = [0, 0], sizes = [8, 1], strides = [1, 1]} : vector<16x1xf32> to vector<8x1xf32>
      %172 = vector.extract_strided_slice %170 {offsets = [8, 0], sizes = [8, 1], strides = [1, 1]} : vector<16x1xf32> to vector<8x1xf32>
      %173 = vector.broadcast %158 : vector<1x64xf32> to vector<8x64xf32>
      %174 = arith.mulf %173, %84 : vector<8x64xf32>
      %175 = math.exp %174 : vector<8x64xf32>
      %176 = arith.mulf %175, %142 : vector<8x64xf32>
      %177 = vector.broadcast %171 : vector<8x1xf32> to vector<8x64xf32>
      %178 = vector.broadcast %161 : vector<1x64xf32> to vector<8x64xf32>
      %179 = arith.mulf %177, %178 : vector<8x64xf32>
      %180 = arith.addf %176, %179 : vector<8x64xf32>
      %181 = vector.broadcast %172 : vector<8x1xf32> to vector<8x64xf32>
      %182 = arith.mulf %181, %180 : vector<8x64xf32>
      %cst_93 = arith.constant dense<0.000000e+00> : vector<64xf32>
      %183 = vector.multi_reduction <add>, %182, %cst_93 [0] : vector<8x64xf32> to vector<64xf32>
      %184 = vector.shape_cast %183 : vector<64xf32> to vector<1x64xf32>
      %c1_i32_94 = arith.constant 1 : i32
      %185 = vector.broadcast %c1_i32_94 : i32 to vector<8x1xi32>
      %186 = arith.cmpi eq, %88, %185 : vector<8x1xi32>
      %cst_95 = arith.constant 0.000000e+00 : f32
      %187 = vector.shape_cast %186 : vector<8x1xi1> to vector<8x1xi1>
      %188 = vector.broadcast %187 : vector<8x1xi1> to vector<8x64xi1>
      %189 = vector.shape_cast %184 : vector<1x64xf32> to vector<1x64xf32>
      %190 = vector.broadcast %189 : vector<1x64xf32> to vector<8x64xf32>
      %191 = vector.broadcast %cst_95 : f32 to vector<8x64xf32>
      %192 = arith.select %188, %190, %191 : vector<8x64xi1>, vector<8x64xf32>
      %193 = arith.addf %155, %192 : vector<8x64xf32>
      %c2_i32 = arith.constant 2 : i32
      %194 = arith.addi %115, %c2_i32 : i32
      %195 = arith.index_cast %194 : i32 to index
      %c0_96 = arith.constant 0 : index
      %196 = vector.load %arg17[%195, %c0_96] : memref<64x64xf32, #tpu.memory_space<vmem>>, vector<1x64xf32>
      %c2_i32_97 = arith.constant 2 : i32
      %197 = arith.addi %115, %c2_i32_97 : i32
      %198 = arith.index_cast %197 : i32 to index
      %c0_98 = arith.constant 0 : index
      %199 = vector.load %arg18[%198, %c0_98] : memref<64x64xf32, #tpu.memory_space<vmem>>, vector<1x64xf32>
      %c2_i32_99 = arith.constant 2 : i32
      %200 = arith.addi %115, %c2_i32_99 : i32
      %201 = arith.index_cast %200 : i32 to index
      %c0_100 = arith.constant 0 : index
      %202 = vector.load %arg19[%201, %c0_100] : memref<64x16xf32, #tpu.memory_space<vmem>>, vector<1x16xf32>
      %cst_101 = arith.constant 0.000000e+00 : f32
      %203 = vector.shape_cast %202 : vector<1x16xf32> to vector<1x16xf32>
      %204 = vector.broadcast %203 : vector<1x16xf32> to vector<16x16xf32>
      %205 = vector.broadcast %cst_101 : f32 to vector<16x16xf32>
      %206 = arith.select %87, %204, %205 : vector<16x16xi1>, vector<16x16xf32>
      %cst_102 = arith.constant dense<0.000000e+00> : vector<16xf32>
      %207 = vector.multi_reduction <add>, %206, %cst_102 [1] : vector<16x16xf32> to vector<16xf32>
      %208 = vector.shape_cast %207 : vector<16xf32> to vector<16x1xf32>
      %209 = vector.extract_strided_slice %208 {offsets = [0, 0], sizes = [8, 1], strides = [1, 1]} : vector<16x1xf32> to vector<8x1xf32>
      %210 = vector.extract_strided_slice %208 {offsets = [8, 0], sizes = [8, 1], strides = [1, 1]} : vector<16x1xf32> to vector<8x1xf32>
      %211 = vector.broadcast %196 : vector<1x64xf32> to vector<8x64xf32>
      %212 = arith.mulf %211, %84 : vector<8x64xf32>
      %213 = math.exp %212 : vector<8x64xf32>
      %214 = arith.mulf %213, %180 : vector<8x64xf32>
      %215 = vector.broadcast %209 : vector<8x1xf32> to vector<8x64xf32>
      %216 = vector.broadcast %199 : vector<1x64xf32> to vector<8x64xf32>
      %217 = arith.mulf %215, %216 : vector<8x64xf32>
      %218 = arith.addf %214, %217 : vector<8x64xf32>
      %219 = vector.broadcast %210 : vector<8x1xf32> to vector<8x64xf32>
      %220 = arith.mulf %219, %218 : vector<8x64xf32>
      %cst_103 = arith.constant dense<0.000000e+00> : vector<64xf32>
      %221 = vector.multi_reduction <add>, %220, %cst_103 [0] : vector<8x64xf32> to vector<64xf32>
      %222 = vector.shape_cast %221 : vector<64xf32> to vector<1x64xf32>
      %c2_i32_104 = arith.constant 2 : i32
      %223 = vector.broadcast %c2_i32_104 : i32 to vector<8x1xi32>
      %224 = arith.cmpi eq, %88, %223 : vector<8x1xi32>
      %cst_105 = arith.constant 0.000000e+00 : f32
      %225 = vector.shape_cast %224 : vector<8x1xi1> to vector<8x1xi1>
      %226 = vector.broadcast %225 : vector<8x1xi1> to vector<8x64xi1>
      %227 = vector.shape_cast %222 : vector<1x64xf32> to vector<1x64xf32>
      %228 = vector.broadcast %227 : vector<1x64xf32> to vector<8x64xf32>
      %229 = vector.broadcast %cst_105 : f32 to vector<8x64xf32>
      %230 = arith.select %226, %228, %229 : vector<8x64xi1>, vector<8x64xf32>
      %231 = arith.addf %193, %230 : vector<8x64xf32>
      %c3_i32 = arith.constant 3 : i32
      %232 = arith.addi %115, %c3_i32 : i32
      %233 = arith.index_cast %232 : i32 to index
      %c0_106 = arith.constant 0 : index
      %234 = vector.load %arg17[%233, %c0_106] : memref<64x64xf32, #tpu.memory_space<vmem>>, vector<1x64xf32>
      %c3_i32_107 = arith.constant 3 : i32
      %235 = arith.addi %115, %c3_i32_107 : i32
      %236 = arith.index_cast %235 : i32 to index
      %c0_108 = arith.constant 0 : index
      %237 = vector.load %arg18[%236, %c0_108] : memref<64x64xf32, #tpu.memory_space<vmem>>, vector<1x64xf32>
      %c3_i32_109 = arith.constant 3 : i32
      %238 = arith.addi %115, %c3_i32_109 : i32
      %239 = arith.index_cast %238 : i32 to index
      %c0_110 = arith.constant 0 : index
      %240 = vector.load %arg19[%239, %c0_110] : memref<64x16xf32, #tpu.memory_space<vmem>>, vector<1x16xf32>
      %cst_111 = arith.constant 0.000000e+00 : f32
      %241 = vector.shape_cast %240 : vector<1x16xf32> to vector<1x16xf32>
      %242 = vector.broadcast %241 : vector<1x16xf32> to vector<16x16xf32>
      %243 = vector.broadcast %cst_111 : f32 to vector<16x16xf32>
      %244 = arith.select %87, %242, %243 : vector<16x16xi1>, vector<16x16xf32>
      %cst_112 = arith.constant dense<0.000000e+00> : vector<16xf32>
      %245 = vector.multi_reduction <add>, %244, %cst_112 [1] : vector<16x16xf32> to vector<16xf32>
      %246 = vector.shape_cast %245 : vector<16xf32> to vector<16x1xf32>
      %247 = vector.extract_strided_slice %246 {offsets = [0, 0], sizes = [8, 1], strides = [1, 1]} : vector<16x1xf32> to vector<8x1xf32>
      %248 = vector.extract_strided_slice %246 {offsets = [8, 0], sizes = [8, 1], strides = [1, 1]} : vector<16x1xf32> to vector<8x1xf32>
      %249 = vector.broadcast %234 : vector<1x64xf32> to vector<8x64xf32>
      %250 = arith.mulf %249, %84 : vector<8x64xf32>
      %251 = math.exp %250 : vector<8x64xf32>
      %252 = arith.mulf %251, %218 : vector<8x64xf32>
      %253 = vector.broadcast %247 : vector<8x1xf32> to vector<8x64xf32>
      %254 = vector.broadcast %237 : vector<1x64xf32> to vector<8x64xf32>
      %255 = arith.mulf %253, %254 : vector<8x64xf32>
      %256 = arith.addf %252, %255 : vector<8x64xf32>
      %257 = vector.broadcast %248 : vector<8x1xf32> to vector<8x64xf32>
      %258 = arith.mulf %257, %256 : vector<8x64xf32>
      %cst_113 = arith.constant dense<0.000000e+00> : vector<64xf32>
      %259 = vector.multi_reduction <add>, %258, %cst_113 [0] : vector<8x64xf32> to vector<64xf32>
      %260 = vector.shape_cast %259 : vector<64xf32> to vector<1x64xf32>
      %c3_i32_114 = arith.constant 3 : i32
      %261 = vector.broadcast %c3_i32_114 : i32 to vector<8x1xi32>
      %262 = arith.cmpi eq, %88, %261 : vector<8x1xi32>
      %cst_115 = arith.constant 0.000000e+00 : f32
      %263 = vector.shape_cast %262 : vector<8x1xi1> to vector<8x1xi1>
      %264 = vector.broadcast %263 : vector<8x1xi1> to vector<8x64xi1>
      %265 = vector.shape_cast %260 : vector<1x64xf32> to vector<1x64xf32>
      %266 = vector.broadcast %265 : vector<1x64xf32> to vector<8x64xf32>
      %267 = vector.broadcast %cst_115 : f32 to vector<8x64xf32>
      %268 = arith.select %264, %266, %267 : vector<8x64xi1>, vector<8x64xf32>
      %269 = arith.addf %231, %268 : vector<8x64xf32>
      %c4_i32 = arith.constant 4 : i32
      %270 = arith.addi %115, %c4_i32 : i32
      %271 = arith.index_cast %270 : i32 to index
      %c0_116 = arith.constant 0 : index
      %272 = vector.load %arg17[%271, %c0_116] : memref<64x64xf32, #tpu.memory_space<vmem>>, vector<1x64xf32>
      %c4_i32_117 = arith.constant 4 : i32
      %273 = arith.addi %115, %c4_i32_117 : i32
      %274 = arith.index_cast %273 : i32 to index
      %c0_118 = arith.constant 0 : index
      %275 = vector.load %arg18[%274, %c0_118] : memref<64x64xf32, #tpu.memory_space<vmem>>, vector<1x64xf32>
      %c4_i32_119 = arith.constant 4 : i32
      %276 = arith.addi %115, %c4_i32_119 : i32
      %277 = arith.index_cast %276 : i32 to index
      %c0_120 = arith.constant 0 : index
      %278 = vector.load %arg19[%277, %c0_120] : memref<64x16xf32, #tpu.memory_space<vmem>>, vector<1x16xf32>
      %cst_121 = arith.constant 0.000000e+00 : f32
      %279 = vector.shape_cast %278 : vector<1x16xf32> to vector<1x16xf32>
      %280 = vector.broadcast %279 : vector<1x16xf32> to vector<16x16xf32>
      %281 = vector.broadcast %cst_121 : f32 to vector<16x16xf32>
      %282 = arith.select %87, %280, %281 : vector<16x16xi1>, vector<16x16xf32>
      %cst_122 = arith.constant dense<0.000000e+00> : vector<16xf32>
      %283 = vector.multi_reduction <add>, %282, %cst_122 [1] : vector<16x16xf32> to vector<16xf32>
      %284 = vector.shape_cast %283 : vector<16xf32> to vector<16x1xf32>
      %285 = vector.extract_strided_slice %284 {offsets = [0, 0], sizes = [8, 1], strides = [1, 1]} : vector<16x1xf32> to vector<8x1xf32>
      %286 = vector.extract_strided_slice %284 {offsets = [8, 0], sizes = [8, 1], strides = [1, 1]} : vector<16x1xf32> to vector<8x1xf32>
      %287 = vector.broadcast %272 : vector<1x64xf32> to vector<8x64xf32>
      %288 = arith.mulf %287, %84 : vector<8x64xf32>
      %289 = math.exp %288 : vector<8x64xf32>
      %290 = arith.mulf %289, %256 : vector<8x64xf32>
      %291 = vector.broadcast %285 : vector<8x1xf32> to vector<8x64xf32>
      %292 = vector.broadcast %275 : vector<1x64xf32> to vector<8x64xf32>
      %293 = arith.mulf %291, %292 : vector<8x64xf32>
      %294 = arith.addf %290, %293 : vector<8x64xf32>
      %295 = vector.broadcast %286 : vector<8x1xf32> to vector<8x64xf32>
      %296 = arith.mulf %295, %294 : vector<8x64xf32>
      %cst_123 = arith.constant dense<0.000000e+00> : vector<64xf32>
      %297 = vector.multi_reduction <add>, %296, %cst_123 [0] : vector<8x64xf32> to vector<64xf32>
      %298 = vector.shape_cast %297 : vector<64xf32> to vector<1x64xf32>
      %c4_i32_124 = arith.constant 4 : i32
      %299 = vector.broadcast %c4_i32_124 : i32 to vector<8x1xi32>
      %300 = arith.cmpi eq, %88, %299 : vector<8x1xi32>
      %cst_125 = arith.constant 0.000000e+00 : f32
      %301 = vector.shape_cast %300 : vector<8x1xi1> to vector<8x1xi1>
      %302 = vector.broadcast %301 : vector<8x1xi1> to vector<8x64xi1>
      %303 = vector.shape_cast %298 : vector<1x64xf32> to vector<1x64xf32>
      %304 = vector.broadcast %303 : vector<1x64xf32> to vector<8x64xf32>
      %305 = vector.broadcast %cst_125 : f32 to vector<8x64xf32>
      %306 = arith.select %302, %304, %305 : vector<8x64xi1>, vector<8x64xf32>
      %307 = arith.addf %269, %306 : vector<8x64xf32>
      %c5_i32 = arith.constant 5 : i32
      %308 = arith.addi %115, %c5_i32 : i32
      %309 = arith.index_cast %308 : i32 to index
      %c0_126 = arith.constant 0 : index
      %310 = vector.load %arg17[%309, %c0_126] : memref<64x64xf32, #tpu.memory_space<vmem>>, vector<1x64xf32>
      %c5_i32_127 = arith.constant 5 : i32
      %311 = arith.addi %115, %c5_i32_127 : i32
      %312 = arith.index_cast %311 : i32 to index
      %c0_128 = arith.constant 0 : index
      %313 = vector.load %arg18[%312, %c0_128] : memref<64x64xf32, #tpu.memory_space<vmem>>, vector<1x64xf32>
      %c5_i32_129 = arith.constant 5 : i32
      %314 = arith.addi %115, %c5_i32_129 : i32
      %315 = arith.index_cast %314 : i32 to index
      %c0_130 = arith.constant 0 : index
      %316 = vector.load %arg19[%315, %c0_130] : memref<64x16xf32, #tpu.memory_space<vmem>>, vector<1x16xf32>
      %cst_131 = arith.constant 0.000000e+00 : f32
      %317 = vector.shape_cast %316 : vector<1x16xf32> to vector<1x16xf32>
      %318 = vector.broadcast %317 : vector<1x16xf32> to vector<16x16xf32>
      %319 = vector.broadcast %cst_131 : f32 to vector<16x16xf32>
      %320 = arith.select %87, %318, %319 : vector<16x16xi1>, vector<16x16xf32>
      %cst_132 = arith.constant dense<0.000000e+00> : vector<16xf32>
      %321 = vector.multi_reduction <add>, %320, %cst_132 [1] : vector<16x16xf32> to vector<16xf32>
      %322 = vector.shape_cast %321 : vector<16xf32> to vector<16x1xf32>
      %323 = vector.extract_strided_slice %322 {offsets = [0, 0], sizes = [8, 1], strides = [1, 1]} : vector<16x1xf32> to vector<8x1xf32>
      %324 = vector.extract_strided_slice %322 {offsets = [8, 0], sizes = [8, 1], strides = [1, 1]} : vector<16x1xf32> to vector<8x1xf32>
      %325 = vector.broadcast %310 : vector<1x64xf32> to vector<8x64xf32>
      %326 = arith.mulf %325, %84 : vector<8x64xf32>
      %327 = math.exp %326 : vector<8x64xf32>
      %328 = arith.mulf %327, %294 : vector<8x64xf32>
      %329 = vector.broadcast %323 : vector<8x1xf32> to vector<8x64xf32>
      %330 = vector.broadcast %313 : vector<1x64xf32> to vector<8x64xf32>
      %331 = arith.mulf %329, %330 : vector<8x64xf32>
      %332 = arith.addf %328, %331 : vector<8x64xf32>
      %333 = vector.broadcast %324 : vector<8x1xf32> to vector<8x64xf32>
      %334 = arith.mulf %333, %332 : vector<8x64xf32>
      %cst_133 = arith.constant dense<0.000000e+00> : vector<64xf32>
      %335 = vector.multi_reduction <add>, %334, %cst_133 [0] : vector<8x64xf32> to vector<64xf32>
      %336 = vector.shape_cast %335 : vector<64xf32> to vector<1x64xf32>
      %c5_i32_134 = arith.constant 5 : i32
      %337 = vector.broadcast %c5_i32_134 : i32 to vector<8x1xi32>
      %338 = arith.cmpi eq, %88, %337 : vector<8x1xi32>
      %cst_135 = arith.constant 0.000000e+00 : f32
      %339 = vector.shape_cast %338 : vector<8x1xi1> to vector<8x1xi1>
      %340 = vector.broadcast %339 : vector<8x1xi1> to vector<8x64xi1>
      %341 = vector.shape_cast %336 : vector<1x64xf32> to vector<1x64xf32>
      %342 = vector.broadcast %341 : vector<1x64xf32> to vector<8x64xf32>
      %343 = vector.broadcast %cst_135 : f32 to vector<8x64xf32>
      %344 = arith.select %340, %342, %343 : vector<8x64xi1>, vector<8x64xf32>
      %345 = arith.addf %307, %344 : vector<8x64xf32>
      %c6_i32 = arith.constant 6 : i32
      %346 = arith.addi %115, %c6_i32 : i32
      %347 = arith.index_cast %346 : i32 to index
      %c0_136 = arith.constant 0 : index
      %348 = vector.load %arg17[%347, %c0_136] : memref<64x64xf32, #tpu.memory_space<vmem>>, vector<1x64xf32>
      %c6_i32_137 = arith.constant 6 : i32
      %349 = arith.addi %115, %c6_i32_137 : i32
      %350 = arith.index_cast %349 : i32 to index
      %c0_138 = arith.constant 0 : index
      %351 = vector.load %arg18[%350, %c0_138] : memref<64x64xf32, #tpu.memory_space<vmem>>, vector<1x64xf32>
      %c6_i32_139 = arith.constant 6 : i32
      %352 = arith.addi %115, %c6_i32_139 : i32
      %353 = arith.index_cast %352 : i32 to index
      %c0_140 = arith.constant 0 : index
      %354 = vector.load %arg19[%353, %c0_140] : memref<64x16xf32, #tpu.memory_space<vmem>>, vector<1x16xf32>
      %cst_141 = arith.constant 0.000000e+00 : f32
      %355 = vector.shape_cast %354 : vector<1x16xf32> to vector<1x16xf32>
      %356 = vector.broadcast %355 : vector<1x16xf32> to vector<16x16xf32>
      %357 = vector.broadcast %cst_141 : f32 to vector<16x16xf32>
      %358 = arith.select %87, %356, %357 : vector<16x16xi1>, vector<16x16xf32>
      %cst_142 = arith.constant dense<0.000000e+00> : vector<16xf32>
      %359 = vector.multi_reduction <add>, %358, %cst_142 [1] : vector<16x16xf32> to vector<16xf32>
      %360 = vector.shape_cast %359 : vector<16xf32> to vector<16x1xf32>
      %361 = vector.extract_strided_slice %360 {offsets = [0, 0], sizes = [8, 1], strides = [1, 1]} : vector<16x1xf32> to vector<8x1xf32>
      %362 = vector.extract_strided_slice %360 {offsets = [8, 0], sizes = [8, 1], strides = [1, 1]} : vector<16x1xf32> to vector<8x1xf32>
      %363 = vector.broadcast %348 : vector<1x64xf32> to vector<8x64xf32>
      %364 = arith.mulf %363, %84 : vector<8x64xf32>
      %365 = math.exp %364 : vector<8x64xf32>
      %366 = arith.mulf %365, %332 : vector<8x64xf32>
      %367 = vector.broadcast %361 : vector<8x1xf32> to vector<8x64xf32>
      %368 = vector.broadcast %351 : vector<1x64xf32> to vector<8x64xf32>
      %369 = arith.mulf %367, %368 : vector<8x64xf32>
      %370 = arith.addf %366, %369 : vector<8x64xf32>
      %371 = vector.broadcast %362 : vector<8x1xf32> to vector<8x64xf32>
      %372 = arith.mulf %371, %370 : vector<8x64xf32>
      %cst_143 = arith.constant dense<0.000000e+00> : vector<64xf32>
      %373 = vector.multi_reduction <add>, %372, %cst_143 [0] : vector<8x64xf32> to vector<64xf32>
      %374 = vector.shape_cast %373 : vector<64xf32> to vector<1x64xf32>
      %c6_i32_144 = arith.constant 6 : i32
      %375 = vector.broadcast %c6_i32_144 : i32 to vector<8x1xi32>
      %376 = arith.cmpi eq, %88, %375 : vector<8x1xi32>
      %cst_145 = arith.constant 0.000000e+00 : f32
      %377 = vector.shape_cast %376 : vector<8x1xi1> to vector<8x1xi1>
      %378 = vector.broadcast %377 : vector<8x1xi1> to vector<8x64xi1>
      %379 = vector.shape_cast %374 : vector<1x64xf32> to vector<1x64xf32>
      %380 = vector.broadcast %379 : vector<1x64xf32> to vector<8x64xf32>
      %381 = vector.broadcast %cst_145 : f32 to vector<8x64xf32>
      %382 = arith.select %378, %380, %381 : vector<8x64xi1>, vector<8x64xf32>
      %383 = arith.addf %345, %382 : vector<8x64xf32>
      %c7_i32 = arith.constant 7 : i32
      %384 = arith.addi %115, %c7_i32 : i32
      %385 = arith.index_cast %384 : i32 to index
      %c0_146 = arith.constant 0 : index
      %386 = vector.load %arg17[%385, %c0_146] : memref<64x64xf32, #tpu.memory_space<vmem>>, vector<1x64xf32>
      %c7_i32_147 = arith.constant 7 : i32
      %387 = arith.addi %115, %c7_i32_147 : i32
      %388 = arith.index_cast %387 : i32 to index
      %c0_148 = arith.constant 0 : index
      %389 = vector.load %arg18[%388, %c0_148] : memref<64x64xf32, #tpu.memory_space<vmem>>, vector<1x64xf32>
      %c7_i32_149 = arith.constant 7 : i32
      %390 = arith.addi %115, %c7_i32_149 : i32
      %391 = arith.index_cast %390 : i32 to index
      %c0_150 = arith.constant 0 : index
      %392 = vector.load %arg19[%391, %c0_150] : memref<64x16xf32, #tpu.memory_space<vmem>>, vector<1x16xf32>
      %cst_151 = arith.constant 0.000000e+00 : f32
      %393 = vector.shape_cast %392 : vector<1x16xf32> to vector<1x16xf32>
      %394 = vector.broadcast %393 : vector<1x16xf32> to vector<16x16xf32>
      %395 = vector.broadcast %cst_151 : f32 to vector<16x16xf32>
      %396 = arith.select %87, %394, %395 : vector<16x16xi1>, vector<16x16xf32>
      %cst_152 = arith.constant dense<0.000000e+00> : vector<16xf32>
      %397 = vector.multi_reduction <add>, %396, %cst_152 [1] : vector<16x16xf32> to vector<16xf32>
      %398 = vector.shape_cast %397 : vector<16xf32> to vector<16x1xf32>
      %399 = vector.extract_strided_slice %398 {offsets = [0, 0], sizes = [8, 1], strides = [1, 1]} : vector<16x1xf32> to vector<8x1xf32>
      %400 = vector.extract_strided_slice %398 {offsets = [8, 0], sizes = [8, 1], strides = [1, 1]} : vector<16x1xf32> to vector<8x1xf32>
      %401 = vector.broadcast %386 : vector<1x64xf32> to vector<8x64xf32>
      %402 = arith.mulf %401, %84 : vector<8x64xf32>
      %403 = math.exp %402 : vector<8x64xf32>
      %404 = arith.mulf %403, %370 : vector<8x64xf32>
      %405 = vector.broadcast %399 : vector<8x1xf32> to vector<8x64xf32>
      %406 = vector.broadcast %389 : vector<1x64xf32> to vector<8x64xf32>
      %407 = arith.mulf %405, %406 : vector<8x64xf32>
      %408 = arith.addf %404, %407 : vector<8x64xf32>
      %409 = vector.broadcast %400 : vector<8x1xf32> to vector<8x64xf32>
      %410 = arith.mulf %409, %408 : vector<8x64xf32>
      %cst_153 = arith.constant dense<0.000000e+00> : vector<64xf32>
      %411 = vector.multi_reduction <add>, %410, %cst_153 [0] : vector<8x64xf32> to vector<64xf32>
      %412 = vector.shape_cast %411 : vector<64xf32> to vector<1x64xf32>
      %c7_i32_154 = arith.constant 7 : i32
      %413 = vector.broadcast %c7_i32_154 : i32 to vector<8x1xi32>
      %414 = arith.cmpi eq, %88, %413 : vector<8x1xi32>
      %cst_155 = arith.constant 0.000000e+00 : f32
      %415 = vector.shape_cast %414 : vector<8x1xi1> to vector<8x1xi1>
      %416 = vector.broadcast %415 : vector<8x1xi1> to vector<8x64xi1>
      %417 = vector.shape_cast %412 : vector<1x64xf32> to vector<1x64xf32>
      %418 = vector.broadcast %417 : vector<1x64xf32> to vector<8x64xf32>
      %419 = vector.broadcast %cst_155 : f32 to vector<8x64xf32>
      %420 = arith.select %416, %418, %419 : vector<8x64xi1>, vector<8x64xf32>
      %421 = arith.addf %383, %420 : vector<8x64xf32>
      %c0_156 = arith.constant 0 : index
      %c0_157 = arith.constant 0 : index
      %422 = vector.load %arg14[%c0_156, %c0_157] : memref<8x64xf32, #tpu.memory_space<vmem>>, vector<8x64xf32>
      tpu.vector_store %arg14[%c0_156, %c0_157], %408 {strides = array<i32>} : memref<8x64xf32, #tpu.memory_space<vmem>>, vector<8x64xf32>,
      %423 = arith.index_cast %115 : i32 to index
      %c0_158 = arith.constant 0 : index
      %424 = vector.load %arg20[%423, %c0_158] : memref<64x64xf32, #tpu.memory_space<vmem>>, vector<8x64xf32>
      tpu.vector_store %arg20[%423, %c0_158], %421 {strides = array<i32>} : memref<64x64xf32, #tpu.memory_space<vmem>>, vector<8x64xf32>,
    }
    %c8_i32_56 = arith.constant 8 : i32
    %c0_57 = arith.constant 0 : index
    %c0_58 = arith.constant 0 : index
    %90 = vector.load %arg20[%c0_57, %c0_58] : memref<64x64xf32, #tpu.memory_space<vmem>>, vector<64x64xf32>
    %c0_59 = arith.constant 0 : index
    %c0_60 = arith.constant 0 : index
    %91 = vector.load %arg11[%c0_59, %c0_60] : memref<1x64xf32, #tpu.memory_space<vmem>>, vector<1x64xf32>
    %92 = vector.broadcast %91 : vector<1x64xf32> to vector<64x64xf32>
    %93 = arith.mulf %92, %61 : vector<64x64xf32>
    %94 = arith.addf %90, %93 : vector<64x64xf32>
    %95 = math.absf %21 : vector<64x64xf32>
    %cst_61 = arith.constant 0.000000e+00 : f32
    %96 = vector.broadcast %cst_61 : f32 to vector<64x64xf32>
    %97 = arith.subf %96, %95 : vector<64x64xf32>
    %98 = math.exp %97 : vector<64x64xf32>
    %cst_62 = arith.constant 1.000000e+00 : f32
    %99 = vector.broadcast %cst_62 : f32 to vector<64x64xf32>
    %100 = arith.addf %99, %98 : vector<64x64xf32>
    %101 = tpu.reciprocal %100 {approx = true} : vector<64x64xf32> -> vector<64x64xf32>
    %cst_63 = arith.constant 0.000000e+00 : f32
    %102 = vector.broadcast %cst_63 : f32 to vector<64x64xf32>
    %103 = arith.cmpf oge, %21, %102 : vector<64x64xf32>
    %cst_64 = arith.constant 1.000000e+00 : f32
    %104 = vector.broadcast %cst_64 : f32 to vector<64x64xf32>
    %105 = arith.subf %104, %101 : vector<64x64xf32>
    %106 = arith.select %103, %101, %105 : vector<64x64xi1>, vector<64x64xf32>
    %107 = arith.mulf %21, %106 : vector<64x64xf32>
    %108 = arith.mulf %94, %107 : vector<64x64xf32>
    %109 = arith.truncf %108 : vector<64x64xf32> to vector<64x64xbf16>
    %c0_65 = arith.constant 0 : index
    %c0_66 = arith.constant 0 : index
    %110 = vector.load %arg12[%c0_65, %c0_66] : memref<64x32xbf16, #tpu.memory_space<vmem>>, vector<64x32xbf16>
    %cst_67 = arith.constant dense<0.000000e+00> : vector<64x32xf32>
    %111 = tpu.matmul %109, %110, %cst_67 {dimension_numbers = #tpu.dot_dimension_numbers<[1], [0], [0], [1], [0, 0, 1, 1], [], []>} : vector<64x64xbf16>, vector<64x32xbf16>, vector<64x32xf32> -> vector<64x32xf32>
    %112 = arith.addf %3, %111 : vector<64x32xf32>
    %c0_68 = arith.constant 0 : index
    %c0_69 = arith.constant 0 : index
    %113 = vector.load %arg13[%c0_68, %c0_69] : memref<64x32xf32, #tpu.memory_space<vmem>>, vector<64x32xf32>
    tpu.vector_store %arg13[%c0_68, %c0_69], %112 {strides = array<i32>} : memref<64x32xf32, #tpu.memory_space<vmem>>, vector<64x32xf32>,
    return
  }
  func.func @transform_0(%arg0: i32) -> (i32, i32) {
    %c0_i32 = arith.constant 0 : i32
    %c0_i32_0 = arith.constant 0 : i32
    return %arg0, %c0_i32 : i32, i32
  }
  func.func @transform_1(%arg0: i32) -> (i32, i32) {
    %c0_i32 = arith.constant 0 : i32
    %c0_i32_0 = arith.constant 0 : i32
    %c0_i32_1 = arith.constant 0 : i32
    return %c0_i32, %c0_i32_0 : i32, i32
  }
  func.func @transform_2(%arg0: i32) -> (i32, i32) {
    %c0_i32 = arith.constant 0 : i32
    %c0_i32_0 = arith.constant 0 : i32
    %c0_i32_1 = arith.constant 0 : i32
    return %c0_i32, %c0_i32_0 : i32, i32
  }
  func.func @transform_3(%arg0: i32) -> (i32, i32) {
    %c0_i32 = arith.constant 0 : i32
    %c0_i32_0 = arith.constant 0 : i32
    %c0_i32_1 = arith.constant 0 : i32
    return %c0_i32, %c0_i32_0 : i32, i32
  }
  func.func @transform_4(%arg0: i32) -> (i32, i32) {
    %c0_i32 = arith.constant 0 : i32
    %c0_i32_0 = arith.constant 0 : i32
    %c0_i32_1 = arith.constant 0 : i32
    return %c0_i32, %c0_i32_0 : i32, i32
  }
  func.func @transform_5(%arg0: i32) -> (i32, i32) {
    %c0_i32 = arith.constant 0 : i32
    %c0_i32_0 = arith.constant 0 : i32
    %c0_i32_1 = arith.constant 0 : i32
    return %c0_i32, %c0_i32_0 : i32, i32
  }
  func.func @transform_6(%arg0: i32) -> (i32, i32) {
    %c0_i32 = arith.constant 0 : i32
    %c0_i32_0 = arith.constant 0 : i32
    %c0_i32_1 = arith.constant 0 : i32
    return %c0_i32, %c0_i32_0 : i32, i32
  }
  func.func @transform_7(%arg0: i32) -> (i32, i32) {
    %c0_i32 = arith.constant 0 : i32
    %c0_i32_0 = arith.constant 0 : i32
    %c0_i32_1 = arith.constant 0 : i32
    return %c0_i32, %c0_i32_0 : i32, i32
  }
  func.func @transform_8(%arg0: i32) -> (i32, i32) {
    %c0_i32 = arith.constant 0 : i32
    %c0_i32_0 = arith.constant 0 : i32
    %c0_i32_1 = arith.constant 0 : i32
    return %c0_i32, %c0_i32_0 : i32, i32
  }
  func.func @transform_9(%arg0: i32) -> (i32, i32) {
    %c0_i32 = arith.constant 0 : i32
    %c0_i32_0 = arith.constant 0 : i32
    %c0_i32_1 = arith.constant 0 : i32
    return %c0_i32, %c0_i32_0 : i32, i32
  }
  func.func @transform_10(%arg0: i32) -> (i32, i32) {
    %c0_i32 = arith.constant 0 : i32
    %c0_i32_0 = arith.constant 0 : i32
    %c0_i32_1 = arith.constant 0 : i32
    return %c0_i32, %c0_i32_0 : i32, i32
  }
  func.func @transform_11(%arg0: i32) -> (i32, i32) {
    %c0_i32 = arith.constant 0 : i32
    %c0_i32_0 = arith.constant 0 : i32
    %c0_i32_1 = arith.constant 0 : i32
    return %c0_i32, %c0_i32_0 : i32, i32
  }
  func.func @transform_12(%arg0: i32) -> (i32, i32) {
    %c0_i32 = arith.constant 0 : i32
    %c0_i32_0 = arith.constant 0 : i32
    return %arg0, %c0_i32 : i32, i32
  }
}

</mosaic_0001>

<bundles_post_ra>
// kernel: forward.4
= control target key start
LH: loop header
LB: loop body
LE: loop exit
PB: predicated region body
PF: predicated region fallthrough
CT: control target
= control target key end

     0   :  { %v436_v1 = vmov 0   ;;  %vm81_vm0 = vcmask 523264   ;;  %vm356_vm1 = vcmask 261120   ;;  %s649_s3 = inlined_call_operand.vmem [shape: bf16[64,32], index: 3, kind: input, shape index: {}]   ;;  %s650_s0 = inlined_call_operand.vmem [shape: f32[64,64], index: 0, kind: input, shape index: {}]   ;;  %s651_s1 = inlined_call_operand.vmem [shape: f32[64,1], index: 1, kind: input, shape index: {}]   ;;  %s652_s2 = inlined_call_operand.vmem [shape: f32[64,1], index: 2, kind: input, shape index: {}]   ;;  %s653_s4 = inlined_call_operand.vmem [shape: f32[1,32], index: 4, kind: input, shape index: {}]   ;;  %s654_s5 = inlined_call_operand.vmem [shape: f32[1,32], index: 5, kind: input, shape index: {}]   ;;  %s655_s6 = inlined_call_operand.vmem [shape: f32[1,32], index: 6, kind: input, shape index: {}]   ;;  %s656_s7 = inlined_call_operand.vmem [shape: f32[1,32], index: 7, kind: input, shape index: {}]   ;;  %s657_s8 = inlined_call_operand.vmem [shape: f32[64,32], index: 8, kind: output, shape index: {}]  }
   0x1   :  { %v416_v0 = vld [vmem:[%s649_s3 + $0x18] sm:$0xff]   ;;  %415 = vset.pattern.permute.xlu1 %v436_v1  ;;  %414 = vset.pattern.permute.xlu0 %v436_v1  ;;  %v417_v2 = vld [vmem:[%s649_s3 + $0x10] sm:$0xff]   ;;  %v418_v3 = vld [vmem:[%s649_s3 + $0x8] sm:$0xff]  }
   0x2   :  { %389 = vmatprep.subr.bf16.mxu0 %v416_v0  ;;  %405 = vmatprep.subr.bf16.mxu1 %v416_v0  ;;  %v30_v4 = vld [vmem:[%s650_s0] sm:$0xff]  ;;  %v31_v5 = vld [vmem:[%s650_s0 + $0x8] sm:$0xff]  ;;  %v201_v10 = vld [vmem:[%s651_s1 + $0x10] sm:$0xff] }
   0x3   :  { %390 = vmatpush3.bf16.msra.mxu0 %v416_v0  ;;  %409 = vmatpush3.bf16.msra.mxu1 %v416_v0  ;;  %v34_v6 = vld [vmem:[%s650_s0 + $0x20] sm:$0xff]  ;;  %v38_v7 = vpack.c.bf16 %v31_v5, %v30_v4  ;;  %v35_v8 = vld [vmem:[%s650_s0 + $0x28] sm:$0xff]  ;;  %v32_v13 = vld [vmem:[%s650_s0 + $0x10] sm:$0xff] }
   0x4   :  { %391 = vmatprep.subr.bf16.mxu0 %v417_v2  ;;  %406 = vmatprep.subr.bf16.mxu1 %v417_v2  ;;  %v40_v9 = vpack.c.bf16 %v35_v8, %v34_v6  ;;  %v199_v11 = vld [vmem:[%s651_s1] sm:$0xff]  ;;  %v33_v14 = vld [vmem:[%s650_s0 + $0x18] sm:$0xff]  ;;  %v36_v15 = vld [vmem:[%s650_s0 + $0x30] sm:$0xff] }
   0x5   :  { %v419_v12 = vld [vmem:[%s649_s3] sm:$0xff]   ;;  %397 = vmatprep.mubr.msk.bf16.mxu0 %vm81_vm0, %v38_v7  ;;  %220 = vperm.xlu1 %415, %v201_v10   ;;  %v37_v16 = vld [vmem:[%s650_s0 + $0x38] sm:$0xff]  ;;  %v200_v18 = vld [vmem:[%s651_s1 + $0x8] sm:$0xff]  ;;  %v39_v19 = vpack.c.bf16 %v33_v14, %v32_v13 }
   0x6   :  { %401 = vmatprep.mubr.msk.bf16.mxu1 %vm81_vm0, %v40_v9  ;;  %210 = vperm.xlu0 %414, %v199_v11   ;;  %v202_v17 = vld [vmem:[%s651_s1 + $0x18] sm:$0xff]  ;;  %v41_v20 = vpack.c.bf16 %v37_v16, %v36_v15  ;;  %v204_v21 = vld [vmem:[%s651_s1 + $0x28] sm:$0xff]  ;;  %v203_v22 = vld [vmem:[%s651_s1 + $0x20] sm:$0xff] }
   0x7   :  { %392 = vmatpush3.bf16.msra.mxu0 %v417_v2  ;;  %410 = vmatpush3.bf16.msra.mxu1 %v417_v2  ;;  %v206_v23 = vld [vmem:[%s651_s1 + $0x38] sm:$0xff]  ;;  %v205_v24 = vld [vmem:[%s651_s1 + $0x30] sm:$0xff]  ;;  %v263_v25 = vld [vmem:[%s652_s2 + $0x8] sm:$0xff] }
   0x8   :  { %393 = vmatprep.subr.bf16.mxu0 %v418_v3  ;;  %407 = vmatprep.subr.bf16.mxu1 %v418_v3  ;;  %v262_v26 = vld [vmem:[%s652_s2] sm:$0xff]  ;;  %v265_v27 = vld [vmem:[%s652_s2 + $0x18] sm:$0xff]  ;;  %v264_v28 = vld [vmem:[%s652_s2 + $0x10] sm:$0xff] }
   0x9   :  { %225 = vperm.xlu1 %415, %v202_v17   ;;  %v267_v29 = vld [vmem:[%s652_s2 + $0x28] sm:$0xff]  ;;  %v266_v30 = vld [vmem:[%s652_s2 + $0x20] sm:$0xff]  ;;  %v269_v31 = vld [vmem:[%s652_s2 + $0x38] sm:$0xff] }
   0xa   :  { %215 = vperm.xlu0 %414, %v200_v18   ;;  %v268_v32 = vld [vmem:[%s652_s2 + $0x30] sm:$0xff]  ;;  %v369_v43 = vld [vmem:[%s653_s4] ss:$0 sm:$0xff] }
   0xb   :  { %394 = vmatpush3.bf16.msra.mxu0 %v418_v3  ;;  %411 = vmatpush3.bf16.msra.mxu1 %v418_v3  ;;  %v378_v2 = vld [vmem:[%s654_s5] ss:$0 sm:$0xff] }
   0xc   :  { %395 = vmatprep.subr.bf16.mxu0 %v419_v12  ;;  %408 = vmatprep.subr.bf16.mxu1 %v419_v12  ;;  %v379_v7 = vld [vmem:[%s655_s6] ss:$0 sm:$0xff] }
   0xd   :  { %235 = vperm.xlu1 %415, %v204_v21  }
   0xe   :  { %230 = vperm.xlu0 %414, %v203_v22  }
   0xf   :  { %396 = vmatpush3.bf16.msra.mxu0 %v419_v12  ;;  %412 = vmatpush3.bf16.msra.mxu1 %v419_v12 }
  0x11   :  { %245 = vperm.xlu1 %415, %v206_v23  }
  0x12   :  { %398 = vmatmul.mubr.msk.bf16.vlgmr.msra.gmra.mxu0 %vm81_vm0, %v39_v19  ;;  %402 = vmatmul.mubr.msk.bf16.vlgmr.msra.gmra.mxu1 %vm81_vm0, %v41_v20 }
  0x13   :  { %240 = vperm.xlu0 %414, %v205_v24  }
  0x15   :  { %278 = vperm.xlu1 %415, %v263_v25  }
  0x17   :  { %273 = vperm.xlu0 %414, %v262_v26  }
  0x19   :  { %288 = vperm.xlu1 %415, %v265_v27  }
  0x1b   :  { %283 = vperm.xlu0 %414, %v264_v28   ;;  %v380_v28 = vld [vmem:[%s656_s7] ss:$0 sm:$0xff] }
  0x1d   :  { %298 = vperm.xlu1 %415, %v267_v29  }
  0x1f   :  { %293 = vperm.xlu0 %414, %v266_v30  }
  0x21   :  { %308 = vperm.xlu1 %415, %v269_v31  }
  0x23   :  { %303 = vperm.xlu0 %414, %v268_v32  }
  0x80   :  { %v221_v34 = vpop.permute.xlu1 %220 }
  0x81   :  { %v211_v33 = vpop.permute.xlu0 %210  ;;  %v256_v15 = vmul.f32 %v378_v2, %v221_v34 }
  0x82   :  { %v254_v9 = vmul.f32 %v378_v2, %v211_v33 }
  0x84   :  { %v226_v36 = vpop.permute.xlu1 %225 }
  0x85   :  { %v216_v35 = vpop.permute.xlu0 %215  ;;  %v257_v12 = vmul.f32 %v378_v2, %v226_v36 }
  0x86   :  { %v255_v20 = vmul.f32 %v378_v2, %v216_v35 }
  0x88   :  { %v236_v38 = vpop.permute.xlu1 %235 }
  0x89   :  { %v231_v37 = vpop.permute.xlu0 %230  ;;  %v259_v24 = vmul.f32 %v378_v2, %v236_v38 }
  0x8a   :  { %v258_v21 = vmul.f32 %v378_v2, %v231_v37 }
  0x8c   :  { %v570_v40 = vpop.permute.xlu1 %245 }
  0x8d   :  { %v261_v27 = vmul.f32 %v378_v2, %v570_v40 }
  0x8e   :  { %v241_v39 = vpop.permute.xlu0 %240 }
  0x8f   :  { %v260_v17 = vmul.f32 %v378_v2, %v241_v39 }
  0x90   :  { %v279_v42 = vpop.permute.xlu1 %278 }
  0x91   :  { %v318_v22 = vmul.f32 %v379_v7, %v279_v42 }
  0x92   :  { %v274_v41 = vpop.permute.xlu0 %273 }
  0x93   :  { %v317_v13 = vmul.f32 %v379_v7, %v274_v41  ;;  %v326_v35 = vadd.f32 %v318_v22, %v255_v20 }
  0x94   :  { %v289_v47 = vpop.permute.xlu1 %288 }
  0x95   :  { %v320_v14 = vmul.f32 %v379_v7, %v289_v47  ;;  %v325_v25 = vadd.f32 %v317_v13, %v254_v9 }
  0x96   :  { %v284_v44 = vpop.permute.xlu0 %283 }
  0x97   :  { %v319_v16 = vmul.f32 %v379_v7, %v284_v44  ;;  %v328_v26 = vadd.f32 %v320_v14, %v257_v12  ;;  %v340_v39 = vadd.f32 %v380_v28, %v325_v25 }
  0x98   :  { %v299_v3 = vpop.permute.xlu1 %298 }
  0x99   :  { %v327_v29 = vadd.f32 %v319_v16, %v256_v15  ;;  %v322_v30 = vmul.f32 %v379_v7, %v299_v3  ;;  %v343_v41 = vadd.f32 %v380_v28, %v328_v26  ;;  %v341_v16 = vadd.f32 %v380_v28, %v326_v35 }
  0x9a   :  { %v294_v58 = vpop.permute.xlu0 %293 }
  0x9b   :  { %v321_v23 = vmul.f32 %v379_v7, %v294_v58  ;;  %v342_v44 = vadd.f32 %v380_v28, %v327_v29 }
  0x9c   :  { %v309_v18 = vpop.permute.xlu1 %308 }
  0x9d   :  { %v324_v31 = vmul.f32 %v379_v7, %v309_v18  ;;  %v329_v36 = vadd.f32 %v321_v23, %v258_v21 }
  0x9e   :  { %v304_v10 = vpop.permute.xlu0 %303 }
  0x9f   :  { %v323_v19 = vmul.f32 %v379_v7, %v304_v10  ;;  %v344_v58 = vadd.f32 %v380_v28, %v329_v36 }
  0xa1   :  { %v331_v33 = vadd.f32 %v323_v19, %v260_v17 }
  0xd2   :  { %v399_v45 = vpop.f32.mrf.mxu0  ;;  %v403_v46 = vpop.f32.mrf.mxu1 }
  0xd3   :  { %v575_v48 = vadd.f32 %v399_v45, %v369_v43  ;;  %v577_v49 = vadd.f32 %v403_v46, %v369_v43  ;;  %v330_v45 = vadd.f32 %v322_v30, %v259_v24  ;;  %v332_v46 = vadd.f32 %v324_v31, %v261_v27 }
  0xd4   :  { %v128_v50 = vpop.f32.mrf.mxu0  ;;  %v144_v51 = vpop.f32.mrf.mxu1 }
  0xd5   :  { %v169_v52 = vmul.f32 0.70710677, %v575_v48  ;;  %v173_v53 = vmul.f32 0.70710677, %v577_v49  ;;  %v581_v54 = vadd.f32 %v369_v43, %v128_v50  ;;  %v583_v55 = vadd.f32 %v369_v43, %v144_v51 }
  0xd6   :  { %v400_v56 = vpop.f32.mrf.mxu0  ;;  %v404_v57 = vpop.f32.mrf.mxu1  ;;  %v161_v37 = vmul.f32 0.5, %v575_v48  ;;  %v165_v40 = vmul.f32 0.5, %v577_v49  ;;  %v346_v51 = vadd.f32 %v380_v28, %v331_v33  ;;  %v345_v18 = vadd.f32 %v380_v28, %v330_v45 }
  0xd7   :  { %420 = verf.f32 %v169_v52  ;;  %v585_v59 = vadd.f32 %v400_v56, %v369_v43  ;;  %v587_v60 = vadd.f32 %v404_v57, %v369_v43  ;;  %v167_v61 = vmul.f32 0.70710677, %v581_v54 }
  0xd8   :  { %422 = verf.f32 %v173_v53  ;;  %v131_v62 = vpop.f32.mrf.mxu0  ;;  %v147_v63 = vpop.f32.mrf.mxu1  ;;  %v171_v0 = vmul.f32 0.70710677, %v583_v55  ;;  %v159_v53 = vmul.f32 0.5, %v581_v54 }
  0xd9   :  { %v170_v1 = vmul.f32 0.70710677, %v585_v59  ;;  %424 = verf.f32 %v167_v61  ;;  %v174_v4 = vmul.f32 0.70710677, %v587_v60  ;;  %v596_v5 = vadd.f32 %v369_v43, %v131_v62 }
  0xda   :  { %v598_v6 = vadd.f32 %v369_v43, %v147_v63  ;;  %426 = verf.f32 %v171_v0  ;;  %v163_v61 = vmul.f32 0.5, %v583_v55  ;;  %v166_v7 = vmul.f32 0.5, %v587_v60 }
  0xdb   :  { %428 = verf.f32 %v170_v1  ;;  %v168_v8 = vmul.f32 0.70710677, %v596_v5  ;;  %v162_v1 = vmul.f32 0.5, %v585_v59  ;;  %v160_v10 = vmul.f32 0.5, %v596_v5 }
  0xdc   :  { %430 = verf.f32 %v174_v4  ;;  %v172_v11 = vmul.f32 0.70710677, %v598_v6  ;;  %v347_v4 = vadd.f32 %v380_v28, %v332_v46  ;;  %v164_v14 = vmul.f32 0.5, %v598_v6 }
  0xdd   :  { %432 = verf.f32 %v168_v8 }
  0xde   :  { %434 = verf.f32 %v172_v11 }
  0xe4   :  { %v421_v32 = vpop.eup %420 }
  0xe5   :  { %v423_v34 = vpop.eup %422  ;;  %v185_v38 = vadd.f32 1.0, %v421_v32 }
  0xe6   :  { %v189_v42 = vadd.f32 1.0, %v423_v34  ;;  %v425_v43 = vpop.eup %424 }
  0xe7   :  { %v193_v47 = vmul.f32 %v185_v38, %v161_v37  ;;  %v427_v50 = vpop.eup %426  ;;  %v183_v56 = vadd.f32 1.0, %v425_v43 }
  0xe8   :  { %v197_v52 = vmul.f32 %v189_v42, %v165_v40  ;;  %v429_v57 = vpop.eup %428  ;;  %v187_v62 = vadd.f32 1.0, %v427_v50 }
  0xe9   :  { %v350_v48 = vadd.f32 %v342_v44, %v193_v47  ;;  %v431_v63 = vpop.eup %430  ;;  %v191_v0 = vmul.f32 %v183_v56, %v159_v53  ;;  %v186_v2 = vadd.f32 1.0, %v429_v57 }
  0xea   :  { %v354_v49 = vadd.f32 %v346_v51, %v197_v52  ;;  %v433_v3 = vpop.eup %432  ;;  %v195_v54 = vmul.f32 %v187_v62, %v163_v61  ;;  %v190_v8 = vadd.f32 1.0, %v431_v63 }
  0xeb   :  { %359 = vst.msk [vmem:[%s657_s8 + $0x10] sm:$0xff] %vm356_vm1, %v350_v48  ;;  %v435_v9 = vpop.eup %434  ;;  %v348_v55 = vadd.f32 %v340_v39, %v191_v0  ;;  %v194_v59 = vmul.f32 %v186_v2, %v162_v1  ;;  %v184_v11 = vadd.f32 1.0, %v433_v3 }
  0xec   :  { %363 = vst.msk [vmem:[%s657_s8 + $0x30] sm:$0xff] %vm356_vm1, %v354_v49  ;;  %v352_v12 = vadd.f32 %v344_v58, %v195_v54  ;;  %v198_v13 = vmul.f32 %v190_v8, %v166_v7  ;;  %v188_v15 = vadd.f32 1.0, %v435_v9 }
  0xed   :  { %357 = vst.msk [vmem:[%s657_s8] sm:$0xff] %vm356_vm1, %v348_v55  ;;  %v351_v60 = vadd.f32 %v343_v41, %v194_v59  ;;  %v192_v17 = vmul.f32 %v184_v11, %v160_v10 }
  0xee   :  { %361 = vst.msk [vmem:[%s657_s8 + $0x20] sm:$0xff] %vm356_vm1, %v352_v12  ;;  %v355_v5 = vadd.f32 %v347_v4, %v198_v13  ;;  %v196_v19 = vmul.f32 %v188_v15, %v164_v14 }
  0xef   :  { %360 = vst.msk [vmem:[%s657_s8 + $0x18] sm:$0xff] %vm356_vm1, %v351_v60  ;;  %v349_v6 = vadd.f32 %v341_v16, %v192_v17 }
  0xf0   :  { %364 = vst.msk [vmem:[%s657_s8 + $0x38] sm:$0xff] %vm356_vm1, %v355_v5  ;;  %v353_v20 = vadd.f32 %v345_v18, %v196_v19 }
  0xf1   :  { %358 = vst.msk [vmem:[%s657_s8 + $0x8] sm:$0xff] %vm356_vm1, %v349_v6 }
  0xf2   :  { %362 = vst.msk [vmem:[%s657_s8 + $0x28] sm:$0xff] %vm356_vm1, %v353_v20 }

// kernel: forward.7
= control target key start
LH: loop header
LB: loop body
LE: loop exit
PB: predicated region body
PF: predicated region fallthrough
CT: control target
= control target key end

     0   :  { %vm52_vm0 = vcmask 261120   ;;  %vm39_vm1 = vcmask 0   ;;  %vm382_vm2 = vcmask 7168   ;;  %vm42_vm3 = vcmask 253952   ;;  %s988_s0 = inlined_call_operand.vmem [shape: f32[64,32], index: 0, kind: input, shape index: {}]   ;;  %s989_s3 = inlined_call_operand.vmem [shape: bf16[32,128], index: 3, kind: input, shape index: {}]   ;;  %s990_s1 = inlined_call_operand.vmem [shape: f32[1,32], index: 1, kind: input, shape index: {}]   ;;  %s991_s2 = inlined_call_operand.vmem [shape: f32[1,32], index: 2, kind: input, shape index: {}]   ;;  %s992_s6 = inlined_call_operand.<no memory space> [shape: f32[1,1], index: 6, kind: input, shape index: {}]   ;;  %s993_s4 = inlined_call_operand.vmem [shape: f32[1,128], index: 4, kind: input, shape index: {}]   ;;  %s994_s5 = inlined_call_operand.vmem [shape: f32[1,128], index: 5, kind: input, shape index: {}]   ;;  %s995_s7 = inlined_call_operand.vmem [shape: bf16[32,4], index: 7, kind: input, shape index: {}]   ;;  %s996_s8 = inlined_call_operand.vmem [shape: f32[1,4], index: 8, kind: input, shape index: {}]   ;;  %s997_s9 = inlined_call_operand.vmem [shape: f32[1,4], index: 9, kind: output, shape index: {}]  }
   0x1   :  { %v44_v0 = vld [vmem:[%s988_s0] sm:$0xff]  ;;  %v46_v1 = vld [vmem:[%s988_s0 + $0x10] sm:$0xff]  ;;  %v45_v2 = vld [vmem:[%s988_s0 + $0x8] sm:$0xff]  ;;  %vm747_vm4 = vmmov 0   ;;  %vm633_vm5 = vcmask 24576  }
   0x2   :  { %v53_v3 = vsel %vm52_vm0, %v44_v0, 0.0  ;;  %v59_v4 = vsel %vm52_vm0, %v46_v1, 0.0  ;;  %v47_v5 = vld [vmem:[%s988_s0 + $0x18] sm:$0xff]  ;;  %v56_v6 = vsel %vm52_vm0, %v45_v2, 0.0  ;;  %v48_v8 = vld [vmem:[%s988_s0 + $0x20] sm:$0xff]  ;;  %v49_v9 = vld [vmem:[%s988_s0 + $0x28] sm:$0xff] }
   0x3   :  { %54 = vadd.xlane.f32.xlu0 %v53_v3  ;;  %60 = vadd.xlane.f32.xlu1 %v59_v4  ;;  %v62_v7 = vsel %vm52_vm0, %v47_v5, 0.0  ;;  %v65_v10 = vsel %vm52_vm0, %v48_v8, 0.0  ;;  %v68_v11 = vsel %vm52_vm0, %v49_v9, 0.0  ;;  %v50_v12 = vld [vmem:[%s988_s0 + $0x30] sm:$0xff]  ;;  %v51_v13 = vld [vmem:[%s988_s0 + $0x38] sm:$0xff]  ;;  %v688_v56 = vld [vmem:[%s989_s3 + $0x8] sm:$0xff]  }
   0x4   :  { %v71_v14 = vsel %vm52_vm0, %v50_v12, 0.0  ;;  %v74_v15 = vsel %vm52_vm0, %v51_v13, 0.0  ;;  %v689_v57 = vld [vmem:[%s989_s3] sm:$0xff]   ;;  %662 = vmatprep.subr.bf16.mxu0 %v688_v56 }
   0x5   :  { %663 = vmatpush3.bf16.msra.mxu0 %v688_v56 }
   0x6   :  { %664 = vmatprep.subr.bf16.mxu0 %v689_v57 }
   0x7   :  { %57 = vadd.xlane.f32.xlu0 %v56_v6  ;;  %63 = vadd.xlane.f32.xlu1 %v62_v7 }
   0x9   :  { %665 = vmatpush3.bf16.msra.mxu0 %v689_v57  ;;  %v641_v57 = vld [vmem:[%s993_s4] ss:$0 sm:$0xff] }
   0xb   :  { %66 = vadd.xlane.f32.xlu0 %v65_v10  ;;  %69 = vadd.xlane.f32.xlu1 %v68_v11 }
   0xf   :  { %72 = vadd.xlane.f32.xlu0 %v71_v14  ;;  %75 = vadd.xlane.f32.xlu1 %v74_v15 }
  0x8c   :  { %v55_v16 = vpop.xlane.xlu0 %54  ;;  %v61_v17 = vpop.xlane.xlu1 %60 }
  0x8d   :  { %v78_v18 = vmul.f32 0.03125, %v55_v16  ;;  %v80_v19 = vmul.f32 0.03125, %v61_v17 }
  0x8f   :  { %v830_v20 = vsub.f32 %v44_v0, %v78_v18  ;;  %v832_v21 = vsub.f32 %v46_v1, %v80_v19 }
  0x90   :  { %v58_v22 = vpop.xlane.xlu0 %57  ;;  %v64_v23 = vpop.xlane.xlu1 %63 }
  0x91   :  { %v79_v24 = vmul.f32 0.03125, %v58_v22  ;;  %v81_v25 = vmul.f32 0.03125, %v64_v23  ;;  %v94_v26 = vmul.f32 %v830_v20, %v830_v20  ;;  %v96_v27 = vmul.f32 %v832_v21, %v832_v21  ;;  %v639_v22 = vld [vmem:[%s990_s1] ss:$0 sm:$0xff] }
  0x93   :  { %v838_v28 = vsub.f32 %v45_v2, %v79_v24  ;;  %v840_v29 = vsub.f32 %v47_v5, %v81_v25  ;;  %v102_v30 = vsel %vm52_vm0, %v94_v26, 0.0  ;;  %v108_v33 = vsel %vm52_vm0, %v96_v27, 0.0  ;;  %v640_v27 = vld [vmem:[%s991_s2] ss:$0 sm:$0xff] }
  0x94   :  { %103 = vadd.xlane.f32.xlu0 %v102_v30  ;;  %v67_v31 = vpop.xlane.xlu0 %66  ;;  %v70_v32 = vpop.xlane.xlu1 %69 }
  0x95   :  { %v82_v34 = vmul.f32 0.03125, %v67_v31  ;;  %v83_v35 = vmul.f32 0.03125, %v70_v32  ;;  %v95_v36 = vmul.f32 %v838_v28, %v838_v28  ;;  %v97_v37 = vmul.f32 %v840_v29, %v840_v29 }
  0x97   :  { %v848_v38 = vsub.f32 %v48_v8, %v82_v34  ;;  %v850_v39 = vsub.f32 %v49_v9, %v83_v35  ;;  %v105_v40 = vsel %vm52_vm0, %v95_v36, 0.0  ;;  %v111_v43 = vsel %vm52_vm0, %v97_v37, 0.0 }
  0x98   :  { %109 = vadd.xlane.f32.xlu0 %v108_v33  ;;  %106 = vadd.xlane.f32.xlu1 %v105_v40  ;;  %v73_v41 = vpop.xlane.xlu0 %72  ;;  %v76_v42 = vpop.xlane.xlu1 %75 }
  0x99   :  { %v84_v44 = vmul.f32 0.03125, %v73_v41  ;;  %v85_v45 = vmul.f32 0.03125, %v76_v42  ;;  %v98_v46 = vmul.f32 %v848_v38, %v848_v38  ;;  %v99_v47 = vmul.f32 %v850_v39, %v850_v39 }
  0x9b   :  { %v858_v48 = vsub.f32 %v50_v12, %v84_v44  ;;  %v860_v49 = vsub.f32 %v51_v13, %v85_v45  ;;  %v114_v50 = vsel %vm52_vm0, %v98_v46, 0.0  ;;  %v117_v51 = vsel %vm52_vm0, %v99_v47, 0.0 }
  0x9c   :  { %112 = vadd.xlane.f32.xlu1 %v111_v43  ;;  %115 = vadd.xlane.f32.xlu0 %v114_v50 }
  0x9d   :  { %v100_v52 = vmul.f32 %v858_v48, %v858_v48  ;;  %v101_v53 = vmul.f32 %v860_v49, %v860_v49 }
  0x9f   :  { %v120_v54 = vsel %vm52_vm0, %v100_v52, 0.0  ;;  %v123_v55 = vsel %vm52_vm0, %v101_v53, 0.0 }
  0xa0   :  { %118 = vadd.xlane.f32.xlu1 %v117_v51  ;;  %121 = vadd.xlane.f32.xlu0 %v120_v54 }
  0xa4   :  { %124 = vadd.xlane.f32.xlu1 %v123_v55 }
 0x11d   :  { %v104_v58 = vpop.xlane.xlu0 %103 }
 0x11e   :  { %v126_v59 = vmul.f32 0.03125, %v104_v58 }
 0x120   :  { %v134_v60 = vadd.f32 1e-05, %v126_v59 }
 0x121   :  { %v107_v61 = vpop.xlane.xlu1 %106  ;;  %v110_v62 = vpop.xlane.xlu0 %109 }
 0x122   :  { %692 = vrsqrt.f32 %v134_v60  ;;  %v127_v63 = vmul.f32 0.03125, %v107_v61  ;;  %v128_v0 = vmul.f32 0.03125, %v110_v62 }
 0x124   :  { %v135_v1 = vadd.f32 1e-05, %v127_v63  ;;  %v136_v2 = vadd.f32 1e-05, %v128_v0 }
 0x125   :  { %v113_v3 = vpop.xlane.xlu1 %112  ;;  %v116_v4 = vpop.xlane.xlu0 %115 }
 0x126   :  { %694 = vrsqrt.f32 %v135_v1  ;;  %v129_v5 = vmul.f32 0.03125, %v113_v3  ;;  %v130_v6 = vmul.f32 0.03125, %v116_v4 }
 0x127   :  { %696 = vrsqrt.f32 %v136_v2 }
 0x128   :  { %v137_v7 = vadd.f32 1e-05, %v129_v5  ;;  %v138_v8 = vadd.f32 1e-05, %v130_v6 }
 0x129   :  { %v119_v9 = vpop.xlane.xlu1 %118  ;;  %v122_v10 = vpop.xlane.xlu0 %121 }
 0x12a   :  { %698 = vrsqrt.f32 %v137_v7  ;;  %v131_v11 = vmul.f32 0.03125, %v119_v9  ;;  %v132_v12 = vmul.f32 0.03125, %v122_v10 }
 0x12b   :  { %700 = vrsqrt.f32 %v138_v8  ;;  %v648_v8 = vld [vmem:[%s994_s5] ss:$0 sm:$0xff] }
 0x12c   :  { %v139_v13 = vadd.f32 1e-05, %v131_v11  ;;  %v140_v14 = vadd.f32 1e-05, %v132_v12 }
 0x12d   :  { %v125_v15 = vpop.xlane.xlu1 %124 }
 0x12e   :  { %702 = vrsqrt.f32 %v139_v13  ;;  %v133_v16 = vmul.f32 0.03125, %v125_v15 }
 0x12f   :  { %v693_v17 = vpop.eup %692  ;;  %704 = vrsqrt.f32 %v140_v14 }
 0x130   :  { %v141_v18 = vadd.f32 1e-05, %v133_v16  ;;  %v150_v19 = vmul.f32 %v693_v17, %v830_v20 }
 0x132   :  { %706 = vrsqrt.f32 %v141_v18  ;;  %v165_v26 = vmul.f32 %v639_v22, %v150_v19 }
 0x133   :  { %v695_v23 = vpop.eup %694 }
 0x134   :  { %v697_v24 = vpop.eup %696  ;;  %v151_v25 = vmul.f32 %v695_v23, %v838_v28  ;;  %v885_v20 = vadd.f32 %v640_v27, %v165_v26 }
 0x135   :  { %v152_v30 = vmul.f32 %v697_v24, %v832_v21 }
 0x136   :  { %v166_v31 = vmul.f32 %v639_v22, %v151_v25 }
 0x137   :  { %v699_v32 = vpop.eup %698  ;;  %v167_v36 = vmul.f32 %v639_v22, %v152_v30 }
 0x138   :  { %v701_v33 = vpop.eup %700  ;;  %v887_v34 = vadd.f32 %v640_v27, %v166_v31  ;;  %v153_v35 = vmul.f32 %v699_v32, %v840_v29  ;;  %v744_v31 = vmov -inf   ;;  %v745_v32 = vmov 0.0  }
 0x139   :  { %v154_v37 = vmul.f32 %v701_v33, %v848_v38  ;;  %v894_v21 = vadd.f32 %v640_v27, %v167_v36  ;;  %40 = vst.msk [vmem:[#allocation2] sm:$0x1] %vm39_vm1, %v744_v31  ;;  %41 = vst.msk [vmem:[#allocation3] sm:$0x1] %vm39_vm1, %v745_v32  ;;  %674 = vmatprep.subr.bf16.mxu1 %v745_v32  ;;  %v746_v33 = vmov 0   ;;  %678 = vmatprep.mubr.msk.bf16.mxu1 %vm747_vm4, %v745_v32 }
 0x13a   :  { %v188_v28 = vpack.c.bf16 %v887_v34, %v885_v20  ;;  %v168_v40 = vmul.f32 %v639_v22, %v153_v35  ;;  %687 = vset.pattern.permute.xlu1 %v746_v33  ;;  %686 = vset.pattern.permute.xlu0 %v746_v33  ;;  %43 = vst.msk [vmem:[#allocation4] sm:$0x1] %vm42_vm3, %v745_v32 }
 0x13b   :  { %v703_v41 = vpop.eup %702  ;;  %v169_v45 = vmul.f32 %v639_v22, %v154_v37 }
 0x13c   :  { %v705_v42 = vpop.eup %704  ;;  %666 = vmatprep.mubr.msk.bf16.mxu0 %vm52_vm0, %v188_v28  ;;  %v896_v43 = vadd.f32 %v640_v27, %v168_v40  ;;  %v155_v44 = vmul.f32 %v703_v41, %v850_v39 }
 0x13d   :  { %v156_v29 = vmul.f32 %v705_v42, %v858_v48  ;;  %v903_v50 = vadd.f32 %v640_v27, %v169_v45 }
 0x13e   :  { %v189_v38 = vpack.c.bf16 %v896_v43, %v894_v21  ;;  %v170_v46 = vmul.f32 %v639_v22, %v155_v44 }
 0x13f   :  { %v707_v47 = vpop.eup %706  ;;  %v171_v53 = vmul.f32 %v639_v22, %v156_v29 }
 0x140   :  { %667 = vmatmul.mubr.msk.bf16.vlgmr.msra.gmra.mxu0 %vm52_vm0, %v189_v38  ;;  %v905_v51 = vadd.f32 %v640_v27, %v170_v46  ;;  %v157_v52 = vmul.f32 %v707_v47, %v860_v49  ;;  %v14_v49 = vstv %s992_s6 }
 0x141   :  { %v911_v48 = vadd.f32 %v640_v27, %v171_v53  ;;  %15 = vst [vmem:[#allocation5] sm:$0x1] %v14_v49 }
 0x142   :  { %v190_v39 = vpack.c.bf16 %v905_v51, %v903_v50  ;;  %v172_v54 = vmul.f32 %v639_v22, %v157_v52 }
 0x144   :  { %670 = vmatprep.mubr.msk.bf16.mxu0 %vm52_vm0, %v190_v39  ;;  %v913_v55 = vadd.f32 %v640_v27, %v172_v54 }
 0x146   :  { %v191_v56 = vpack.c.bf16 %v913_v55, %v911_v48 }
 0x148   :  { %671 = vmatmul.mubr.msk.bf16.gmra.mxu0 %vm52_vm0, %v191_v56  ;;  %v649_v41 = vld [vmem:[#allocation5] ss:$0 sm:$0xff] }
 0x200   :  { %v668_v58 = vpop.f32.mrf.mxu0 }
 0x201   :  { %v270_v59 = vadd.f32 %v668_v58, %v641_v57 }
 0x202   :  { %v261_v60 = vpop.f32.mrf.mxu0 }
 0x203   :  { %708 = vtanh.f32 %v270_v59  ;;  %v262_v61 = vadd.f32 %v641_v57, %v261_v60 }
 0x204   :  { %v669_v62 = vpop.f32.mrf.mxu0 }
 0x205   :  { %710 = vtanh.f32 %v262_v61  ;;  %v273_v63 = vadd.f32 %v669_v62, %v641_v57 }
 0x206   :  { %v264_v0 = vpop.f32.mrf.mxu0 }
 0x207   :  { %712 = vtanh.f32 %v273_v63  ;;  %v265_v1 = vadd.f32 %v641_v57, %v264_v0 }
 0x208   :  { %v672_v2 = vpop.f32.mrf.mxu0 }
 0x209   :  { %714 = vtanh.f32 %v265_v1  ;;  %v286_v4 = vadd.f32 %v672_v2, %v641_v57 }
 0x20a   :  { %v277_v3 = vpop.f32.mrf.mxu0 }
 0x20b   :  { %v278_v5 = vadd.f32 %v641_v57, %v277_v3 }
 0x20c   :  { %v673_v6 = vpop.f32.mrf.mxu0 }
 0x20d   :  { %716 = vtanh.f32 %v278_v5  ;;  %v289_v9 = vadd.f32 %v673_v6, %v641_v57 }
 0x20e   :  { %v280_v7 = vpop.f32.mrf.mxu0  ;;  %718 = vtanh.f32 %v286_v4 }
 0x20f   :  { %v281_v10 = vadd.f32 %v641_v57, %v280_v7  ;;  %v409_v7 = vlaneseq }
 0x210   :  { %v709_v11 = vpop.eup %708 }
 0x211   :  { %720 = vtanh.f32 %v281_v10  ;;  %v309_v12 = vmul.f32 %v709_v11, %v648_v8  ;;  %v410_v10 = vshrl.u32 %v409_v7, 7 }
 0x212   :  { %v711_v13 = vpop.eup %710  ;;  %722 = vtanh.f32 %v289_v9 }
 0x213   :  { %319 = vadd.xlane.f32.xlu0 %v309_v12  ;;  %v307_v16 = vmul.f32 %v711_v13, %v648_v8  ;;  %v381_v13 = vld [vmem:[#allocation2] sm:$0x1] }
 0x214   :  { %v713_v14 = vpop.eup %712 }
 0x215   :  { %v310_v15 = vmul.f32 %v713_v14, %v648_v8  ;;  %v939_v14 = vsub.s32 0, %v410_v10 }
 0x216   :  { %v715_v17 = vpop.eup %714 }
 0x217   :  { %321 = vadd.xlane.f32.xlu1 %v310_v15  ;;  %315 = vadd.xlane.f32.xlu0 %v307_v16  ;;  %v308_v18 = vmul.f32 %v715_v17, %v648_v8 }
 0x21a   :  { %v717_v19 = vpop.eup %716 }
 0x21b   :  { %317 = vadd.xlane.f32.xlu1 %v308_v18  ;;  %v311_v22 = vmul.f32 %v717_v19, %v648_v8  ;;  %v719_v23 = vpop.eup %718 }
 0x21c   :  { %v313_v26 = vmul.f32 %v719_v23, %v648_v8 }
 0x21d   :  { %323 = vadd.xlane.f32.xlu0 %v311_v22 }
 0x21e   :  { %v721_v24 = vpop.eup %720 }
 0x21f   :  { %v312_v25 = vmul.f32 %v721_v24, %v648_v8  ;;  %v723_v27 = vpop.eup %722 }
 0x220   :  { %v314_v30 = vmul.f32 %v723_v27, %v648_v8 }
 0x221   :  { %325 = vadd.xlane.f32.xlu1 %v312_v25  ;;  %327 = vadd.xlane.f32.xlu0 %v313_v26 }
 0x225   :  { %329 = vadd.xlane.f32.xlu1 %v314_v30 }
 0x29c   :  { %v320_v35 = vpop.xlane.xlu0 %319 }
 0x29d   :  { %v340_v47 = vadd.f32 %v649_v41, %v320_v35 }
 0x29f   :  { %v385_v60 = vsel %vm382_vm2, %v340_v47, -inf }
 0x2a0   :  { %v322_v36 = vpop.xlane.xlu1 %321  ;;  %v316_v37 = vpop.xlane.xlu0 %315 }
 0x2a1   :  { %v341_v52 = vadd.f32 %v649_v41, %v322_v36  ;;  %v338_v53 = vadd.f32 %v649_v41, %v316_v37 }
 0x2a3   :  { %v386_v61 = vsel %vm382_vm2, %v341_v52, -inf  ;;  %v383_v62 = vsel %vm382_vm2, %v338_v53, -inf }
 0x2a4   :  { %v318_v28 = vpop.xlane.xlu1 %317 }
 0x2a5   :  { %v339_v45 = vadd.f32 %v649_v41, %v318_v28 }
 0x2a6   :  { %v324_v40 = vpop.xlane.xlu0 %323 }
 0x2a7   :  { %v342_v29 = vadd.f32 %v649_v41, %v324_v40  ;;  %v384_v56 = vsel %vm382_vm2, %v339_v45, -inf }
 0x2a9   :  { %v387_v49 = vsel %vm382_vm2, %v342_v29, -inf }
 0x2aa   :  { %v326_v42 = vpop.xlane.xlu1 %325  ;;  %v328_v44 = vpop.xlane.xlu0 %327  ;;  %v388_v0 = vmax.f32 %v383_v62, %v387_v49 }
 0x2ab   :  { %v343_v38 = vadd.f32 %v649_v41, %v326_v42  ;;  %v344_v46 = vadd.f32 %v649_v41, %v328_v44 }
 0x2ad   :  { %v389_v39 = vsel %vm382_vm2, %v343_v38, -inf  ;;  %v391_v57 = vsel %vm382_vm2, %v344_v46, -inf }
 0x2ae   :  { %v330_v54 = vpop.xlane.xlu1 %329  ;;  %v390_v59 = vmax.f32 %v384_v56, %v389_v39  ;;  %v392_v1 = vmax.f32 %v385_v60, %v391_v57 }
 0x2af   :  { %v345_v58 = vadd.f32 %v649_v41, %v330_v54 }
 0x2b0   :  { %v395_v3 = vmax.f32 %v388_v0, %v390_v59 }
 0x2b1   :  { %v393_v63 = vsel %vm382_vm2, %v345_v58, -inf }
 0x2b2   :  { %v394_v2 = vmax.f32 %v386_v61, %v393_v63 }
 0x2b4   :  { %v396_v4 = vmax.f32 %v392_v1, %v394_v2 }
 0x2b6   :  { %v397_v5 = vmax.f32 %v395_v3, %v396_v4 }
 0x2b8   :  { %v398_v6 = vrot.slane %v397_v5, 4 }
 0x2ba   :  { %v399_v8 = vmax.f32 %v397_v5, %v398_v6 }
 0x2bc   :  { %v400_v9 = vrot.slane %v399_v8, 2 }
 0x2be   :  { %v401_v11 = vmax.f32 %v399_v8, %v400_v9  ;;  %v446_v9 = vld [vmem:[#allocation3] sm:$0x1] }
 0x2c0   :  { %v402_v12 = vrot.slane %v401_v11, 1 }
 0x2c2   :  { %v403_v15 = vmax.f32 %v401_v11, %v402_v12 }
 0x2c4   :  { %v404_v16 = vmax.f32 %v381_v13, %v403_v15 }
 0x2c6   :  { %v412_v17 = vrot.slane %v404_v16, %v939_v14  ;;  %555 = vst.msk [vmem:[#allocation2] sm:$0x1] %vm39_vm1, %v404_v16 }
 0x2c8   :  { %v414_v18 = vsub.f32 %v338_v53, %v412_v17  ;;  %v415_v19 = vsub.f32 %v339_v45, %v412_v17  ;;  %v416_v22 = vsub.f32 %v340_v47, %v412_v17  ;;  %v417_v23 = vsub.f32 %v341_v52, %v412_v17 }
 0x2c9   :  { %v418_v24 = vsub.f32 %v342_v29, %v412_v17  ;;  %v419_v27 = vsub.f32 %v343_v38, %v412_v17  ;;  %v420_v33 = vsub.f32 %v344_v46, %v412_v17  ;;  %v421_v36 = vsub.f32 %v345_v58, %v412_v17 }
 0x2ca   :  { %v422_v25 = vmul.f32 1.442695, %v414_v18  ;;  %v424_v26 = vmul.f32 1.442695, %v415_v19  ;;  %v426_v30 = vmul.f32 1.442695, %v416_v22  ;;  %v405_v46 = vsub.f32 %v381_v13, %v404_v16 }
 0x2cb   :  { %v428_v31 = vmul.f32 1.442695, %v417_v23  ;;  %v430_v35 = vmul.f32 1.442695, %v418_v24  ;;  %v432_v37 = vmul.f32 1.442695, %v419_v27 }
 0x2cc   :  { %724 = vpow2.f32 %v422_v25  ;;  %v434_v28 = vmul.f32 1.442695, %v420_v33  ;;  %v436_v40 = vmul.f32 1.442695, %v421_v36  ;;  %v406_v49 = vmul.f32 1.442695, %v405_v46 }
 0x2cd   :  { %726 = vpow2.f32 %v424_v26  ;;  %v690_v16 = vld [vmem:[%s995_s7 + $0x8] sm:$0xff]   ;;  %v691_v18 = vld [vmem:[%s995_s7] sm:$0xff]  }
 0x2ce   :  { %728 = vpow2.f32 %v426_v30  ;;  %675 = vmatpush3.bf16.msra.mxu1 %v690_v16 }
 0x2cf   :  { %730 = vpow2.f32 %v428_v31  ;;  %676 = vmatprep.subr.bf16.mxu1 %v745_v32 }
 0x2d0   :  { %732 = vpow2.f32 %v430_v35 }
 0x2d1   :  { %734 = vpow2.f32 %v432_v37 }
 0x2d2   :  { %736 = vpow2.f32 %v434_v28  ;;  %677 = vmatpush3.bf16.msra.mxu1 %v691_v18 }
 0x2d3   :  { %738 = vpow2.f32 %v436_v40 }
 0x2d4   :  { %740 = vpow2.f32 %v406_v49 }
 0x2d9   :  { %v725_v41 = vpop.eup %724 }
 0x2da   :  { %v727_v42 = vpop.eup %726  ;;  %v448_v44 = vsel %vm382_vm2, %v725_v41, 0.0  ;;  %485 = vperm.xlu0 %686, %v725_v41  }
 0x2db   :  { %v729_v45 = vpop.eup %728  ;;  %v449_v29 = vsel %vm382_vm2, %v727_v42, 0.0  ;;  %490 = vperm.xlu1 %687, %v727_v42  }
 0x2dc   :  { %v731_v38 = vpop.eup %730  ;;  %v450_v47 = vadd.f32 %v449_v29, %v448_v44  ;;  %v451_v52 = vsel %vm382_vm2, %v729_v45, 0.0 }
 0x2dd   :  { %v733_v53 = vpop.eup %732  ;;  %v453_v54 = vsel %vm382_vm2, %v731_v38, 0.0 }
 0x2de   :  { %v452_v39 = vadd.f32 %v451_v52, %v450_v47  ;;  %v735_v56 = vpop.eup %734  ;;  %v455_v58 = vsel %vm382_vm2, %v733_v53, 0.0 }
 0x2df   :  { %495 = vperm.xlu1 %687, %v729_v45   ;;  %v737_v59 = vpop.eup %736  ;;  %v457_v61 = vsel %vm382_vm2, %v735_v56, 0.0 }
 0x2e0   :  { %v454_v57 = vadd.f32 %v453_v54, %v452_v39  ;;  %v739_v62 = vpop.eup %738  ;;  %v459_v0 = vsel %vm382_vm2, %v737_v59, 0.0 }
 0x2e1   :  { %v461_v2 = vsel %vm382_vm2, %v739_v62, 0.0  ;;  %v741_v8 = vpop.eup %740 }
 0x2e2   :  { %v456_v60 = vadd.f32 %v455_v58, %v454_v57  ;;  %v447_v11 = vmul.f32 %v741_v8, %v446_v9  ;;  %v472_v58 = vld [vmem:[#allocation4] sm:$0x1] }
 0x2e3   :  { %500 = vperm.xlu1 %687, %v731_v38  }
 0x2e4   :  { %v458_v63 = vadd.f32 %v457_v61, %v456_v60 }
 0x2e6   :  { %v460_v1 = vadd.f32 %v459_v0, %v458_v63 }
 0x2e7   :  { %505 = vperm.xlu1 %687, %v733_v53  }
 0x2e8   :  { %v462_v3 = vadd.f32 %v461_v2, %v460_v1  ;;  %v577_v2 = vld [vmem:[%s996_s8] sm:$0x1] }
 0x2ea   :  { %v463_v4 = vrot.slane %v462_v3, 4 }
 0x2eb   :  { %510 = vperm.xlu1 %687, %v735_v56  }
 0x2ec   :  { %v464_v5 = vadd.f32 %v463_v4, %v462_v3 }
 0x2ee   :  { %v465_v6 = vrot.slane %v464_v5, 2 }
 0x2ef   :  { %515 = vperm.xlu1 %687, %v737_v59  }
 0x2f0   :  { %v466_v7 = vadd.f32 %v465_v6, %v464_v5 }
 0x2f2   :  { %v467_v10 = vrot.slane %v466_v7, 1 }
 0x2f3   :  { %520 = vperm.xlu1 %687, %v739_v62  }
 0x2f4   :  { %v468_v12 = vadd.f32 %v467_v10, %v466_v7 }
 0x2f6   :  { %v469_v13 = vadd.f32 %v468_v12, %v447_v11 }
 0x2f7   :  { %475 = vperm.xlu1 %687, %v741_v8  }
 0x2f8   :  { %471 = vst.msk [vmem:[#allocation3] sm:$0x1] %vm39_vm1, %v469_v13 }
 0x2ff   :  { %v560_v15 = vld [vmem:[#allocation3] sm:$0x1] }
 0x300   :  { %742 = vrcp.f32 %v560_v15 }
 0x30d   :  { %v743_v17 = vpop.eup %742 }
 0x30e   :  { %564 = vperm.xlu0 %686, %v743_v17  }
 0x355   :  { %v486_v23 = vpop.permute.xlu0 %485 }
 0x356   :  { %v491_v19 = vpop.permute.xlu1 %490  ;;  %v523_v26 = vmul.f32 %v486_v23, %v885_v20 }
 0x357   :  { %v524_v25 = vmul.f32 %v491_v19, %v887_v34 }
 0x358   :  { %v531_v33 = vsel %vm52_vm0, %v523_v26, 0.0 }
 0x359   :  { %v532_v31 = vsel %vm52_vm0, %v524_v25, 0.0 }
 0x35a   :  { %v496_v22 = vpop.permute.xlu1 %495  ;;  %v533_v37 = vadd.f32 %v532_v31, %v531_v33 }
 0x35b   :  { %v525_v27 = vmul.f32 %v496_v22, %v894_v21 }
 0x35d   :  { %v534_v32 = vsel %vm52_vm0, %v525_v27, 0.0 }
 0x35e   :  { %v501_v24 = vpop.permute.xlu1 %500  ;;  %v535_v20 = vadd.f32 %v534_v32, %v533_v37 }
 0x35f   :  { %v526_v35 = vmul.f32 %v501_v24, %v896_v43 }
 0x361   :  { %v536_v40 = vsel %vm52_vm0, %v526_v35, 0.0 }
 0x362   :  { %v506_v30 = vpop.permute.xlu1 %505  ;;  %v537_v41 = vadd.f32 %v536_v40, %v535_v20 }
 0x363   :  { %v527_v36 = vmul.f32 %v506_v30, %v903_v50 }
 0x365   :  { %v538_v21 = vsel %vm52_vm0, %v527_v36, 0.0 }
 0x366   :  { %v511_v28 = vpop.permute.xlu1 %510  ;;  %v539_v43 = vadd.f32 %v538_v21, %v537_v41 }
 0x367   :  { %v528_v34 = vmul.f32 %v511_v28, %v905_v51 }
 0x369   :  { %v540_v44 = vsel %vm52_vm0, %v528_v34, 0.0 }
 0x36a   :  { %v516_v42 = vpop.permute.xlu1 %515  ;;  %v541_v38 = vadd.f32 %v540_v44, %v539_v43 }
 0x36b   :  { %v529_v45 = vmul.f32 %v516_v42, %v911_v48 }
 0x36d   :  { %v542_v29 = vsel %vm52_vm0, %v529_v45, 0.0 }
 0x36e   :  { %v521_v50 = vpop.permute.xlu1 %520  ;;  %v543_v47 = vadd.f32 %v542_v29, %v541_v38 }
 0x36f   :  { %v530_v46 = vmul.f32 %v521_v50, %v913_v55 }
 0x371   :  { %v544_v52 = vsel %vm52_vm0, %v530_v46, 0.0 }
 0x372   :  { %v545_v51 = vadd.f32 %v544_v52, %v543_v47  ;;  %v476_v54 = vpop.permute.xlu1 %475 }
 0x373   :  { %v481_v57 = vrot.slane %v476_v54, %v939_v14 }
 0x374   :  { %v546_v53 = vrot.slane %v545_v51, 4 }
 0x375   :  { %v482_v60 = vmul.f32 %v481_v57, %v472_v58 }
 0x376   :  { %v547_v39 = vadd.f32 %v546_v53, %v545_v51 }
 0x378   :  { %v548_v56 = vrot.slane %v547_v39, 2 }
 0x37a   :  { %v549_v49 = vadd.f32 %v548_v56, %v547_v39 }
 0x37c   :  { %v550_v48 = vrot.slane %v549_v49, 1 }
 0x37e   :  { %v551_v59 = vadd.f32 %v550_v48, %v549_v49 }
 0x380   :  { %v552_v61 = vadd.f32 %v551_v59, %v482_v60 }
 0x382   :  { %554 = vst.msk [vmem:[#allocation4] sm:$0x1] %vm42_vm3, %v552_v61 }
 0x389   :  { %v565_v62 = vpop.permute.xlu0 %564  ;;  %v559_v63 = vld [vmem:[#allocation4] sm:$0x1] }
 0x38a   :  { %v570_v55 = vrot.slane %v565_v62, %v939_v14 }
 0x38c   :  { %v571_v0 = vmul.f32 %v570_v55, %v559_v63 }
 0x38e   :  { %v572_v1 = vpack.c.bf16 %v571_v0, %v571_v0 }
 0x390   :  { %679 = vmatmul.mubr.msk.bf16.vlgmr.msra.gmra.mxu1 %vm52_vm0, %v572_v1 }
 0x450   :  { %v627_v3 = vpop.f32.mrf.mxu1 }
 0x451   :  { %v628_v4 = vadd.f32 %v627_v3, %v577_v2 }
 0x452   :  { %v680_v5 = vpop.f32.mrf.mxu1 }
 0x453   :  { %634 = vst.msk [vmem:[%s997_s9] sm:$0x1] %vm633_vm5, %v628_v4 }
 0x454   :  { %v630_v6 = vpop.f32.mrf.mxu1 }
 0x456   :  { %v681_v7 = vpop.f32.mrf.mxu1 }

// kernel: forward.5
= control target key start
LH: loop header
LB: loop body
LE: loop exit
PB: predicated region body
PF: predicated region fallthrough
CT: control target
= control target key end

     0   :  { %vm65_vm0 = vcmask 261120   ;;  %vm46_vm1 = vcmask 523264   ;;  %vm845_vm12 = vcmask 130048   ;;  %s2614_s0 = inlined_call_operand.vmem [shape: f32[64,32], index: 0, kind: input, shape index: {}]   ;;  %s2615_s2 = inlined_call_operand.vmem [shape: bf16[32,64], index: 2, kind: input, shape index: {}]   ;;  %s2616_s10 = inlined_call_operand.vmem [shape: f32[1,64], index: 10, kind: input, shape index: {}]   ;;  %s2617_s11 = inlined_call_operand.vmem [shape: bf16[64,32], index: 11, kind: input, shape index: {}]   ;;  %s2618_s12 = inlined_call_operand.vmem [shape: f32[64,32], index: 12, kind: output, shape index: {}]   ;;  %s2619_s3 = inlined_call_operand.vmem [shape: bf16[32,64], index: 3, kind: input, shape index: {}]   ;;  %s2620_s1 = inlined_call_operand.vmem [shape: f32[1,32], index: 1, kind: input, shape index: {}]   ;;  %s2621_s6 = inlined_call_operand.vmem [shape: bf16[64,64], index: 6, kind: input, shape index: {}]   ;;  %s2622_s8 = inlined_call_operand.vmem [shape: bf16[64,16], index: 8, kind: input, shape index: {}]   ;;  %s2623_s4 = inlined_call_operand.vmem [shape: f32[4,64], index: 4, kind: input, shape index: {}]   ;;  %s2624_s5 = inlined_call_operand.vmem [shape: f32[1,64], index: 5, kind: input, shape index: {}]   ;;  %s2625_s9 = inlined_call_operand.vmem [shape: f32[8,64], index: 9, kind: input, shape index: {}]   ;;  %s2626_s7 = inlined_call_operand.vmem [shape: f32[1,64], index: 7, kind: input, shape index: {}]  }
   0x1   :  { %v2025_v0 = vld [vmem:[%s2614_s0 + $0x10] sm:$0xff]  ;;  %v2030_v1 = vld [vmem:[%s2614_s0] sm:$0xff]  ;;  %v2035_v2 = vld [vmem:[%s2614_s0 + $0x18] sm:$0xff] }
   0x2   :  { %v59_v3 = vmul.f32 %v2025_v0, %v2025_v0  ;;  %v57_v4 = vmul.f32 %v2030_v1, %v2030_v1  ;;  %v60_v5 = vmul.f32 %v2035_v2, %v2035_v2  ;;  %v2046_v6 = vld [vmem:[%s2614_s0 + $0x8] sm:$0xff]  ;;  %v2058_v9 = vld [vmem:[%s2614_s0 + $0x20] sm:$0xff]  ;;  %v2071_v16 = vld [vmem:[%s2614_s0 + $0x38] sm:$0xff] }
   0x3   :  { %v58_v7 = vmul.f32 %v2046_v6, %v2046_v6  ;;  %v2053_v8 = vld [vmem:[%s2614_s0 + $0x28] sm:$0xff]  ;;  %v61_v15 = vmul.f32 %v2058_v9, %v2058_v9  ;;  %v2076_v17 = vld [vmem:[%s2614_s0 + $0x30] sm:$0xff]  ;;  %v64_v20 = vmul.f32 %v2071_v16, %v2071_v16  ;;  %v1806_v26 = vld [vmem:[%s2615_s2] sm:$0xff]  }
   0x4   :  { %v72_v10 = vsel %vm65_vm0, %v59_v3, 0.0  ;;  %v66_v11 = vsel %vm65_vm0, %v57_v4, 0.0  ;;  %v75_v12 = vsel %vm65_vm0, %v60_v5, 0.0  ;;  %v62_v14 = vmul.f32 %v2053_v8, %v2053_v8  ;;  %v1804_v24 = vld [vmem:[%s2615_s2 + $0x8] sm:$0xff]   ;;  %v1807_v27 = vld [vmem:[%s2619_s3] sm:$0xff]  }
   0x5   :  { %73 = vadd.xlane.f32.xlu1 %v72_v10  ;;  %67 = vadd.xlane.f32.xlu0 %v66_v11  ;;  %v69_v13 = vsel %vm65_vm0, %v58_v7, 0.0  ;;  %v78_v19 = vsel %vm65_vm0, %v61_v15, 0.0  ;;  %v63_v21 = vmul.f32 %v2076_v17, %v2076_v17  ;;  %v87_v22 = vsel %vm65_vm0, %v64_v20, 0.0  ;;  %v1805_v25 = vld [vmem:[%s2619_s3 + $0x8] sm:$0xff]   ;;  %v1568_v57 = vld [vmem:[%s2620_s1] ss:$0 sm:$0xff] }
   0x6   :  { %v81_v18 = vsel %vm65_vm0, %v62_v14, 0.0  ;;  %1715 = vmatprep.subr.bf16.mxu0 %v1804_v24  ;;  %1727 = vmatprep.subr.bf16.mxu1 %v1805_v25 }
   0x7   :  { %v84_v23 = vsel %vm65_vm0, %v63_v21, 0.0  ;;  %1716 = vmatpush3.bf16.msra.mxu0 %v1804_v24  ;;  %1728 = vmatpush3.bf16.msra.mxu1 %v1805_v25  ;;  %v1956_v25 = vmov 0.0  }
   0x8   :  { %1717 = vmatprep.subr.bf16.mxu0 %v1806_v26  ;;  %1729 = vmatprep.subr.bf16.mxu1 %v1807_v27  ;;  %47 = vst.msk [vmem:[#allocation2] sm:$0xff] %vm46_vm1, %v1956_v25  ;;  %48 = vst.msk [vmem:[#allocation3] sm:$0xff] %vm46_vm1, %v1956_v25 }
   0x9   :  { %76 = vadd.xlane.f32.xlu1 %v75_v12  ;;  %70 = vadd.xlane.f32.xlu0 %v69_v13 }
   0xb   :  { %1718 = vmatpush3.bf16.msra.mxu0 %v1806_v26  ;;  %1730 = vmatpush3.bf16.msra.mxu1 %v1807_v27  ;;  %v1808_v27 = vld [vmem:[%s2621_s6 + $0x18] sm:$0xff]  }
   0xc   :  { %1739 = vmatprep.subr.bf16.mxu0 %v1808_v27 }
   0xd   :  { %82 = vadd.xlane.f32.xlu1 %v81_v18  ;;  %79 = vadd.xlane.f32.xlu0 %v78_v19 }
   0xf   :  { %v316_v26 = vld [vmem:[#allocation3] sm:$0xff] }
  0x10   :  { %318 = vst.msk [vmem:[#allocation4] sm:$0xff] %vm46_vm1, %v316_v26 }
  0x11   :  { %88 = vadd.xlane.f32.xlu1 %v87_v22  ;;  %85 = vadd.xlane.f32.xlu0 %v84_v23 }
  0x8e   :  { %v74_v28 = vpop.xlane.xlu1 %73  ;;  %v68_v29 = vpop.xlane.xlu0 %67 }
  0x8f   :  { %v93_v30 = vmul.f32 0.03125, %v74_v28  ;;  %v91_v31 = vmul.f32 0.03125, %v68_v29  ;;  %v1809_v28 = vld [vmem:[%s2622_s8 + $0x18] sm:$0xff]   ;;  %v1810_v29 = vld [vmem:[%s2621_s6 + $0x10] sm:$0xff]  }
  0x90   :  { %1755 = vmatprep.subr.bf16.mxu1 %v1809_v28 }
  0x91   :  { %v101_v32 = vadd.f32 1e-05, %v93_v30  ;;  %v99_v33 = vadd.f32 1e-05, %v91_v31  ;;  %v1811_v30 = vld [vmem:[%s2622_s8 + $0x10] sm:$0xff]   ;;  %v1812_v31 = vld [vmem:[%s2621_s6 + $0x8] sm:$0xff]  }
  0x92   :  { %v77_v34 = vpop.xlane.xlu1 %76  ;;  %v71_v35 = vpop.xlane.xlu0 %70 }
  0x93   :  { %1816 = vrsqrt.f32 %v101_v32  ;;  %v94_v36 = vmul.f32 0.03125, %v77_v34  ;;  %v92_v37 = vmul.f32 0.03125, %v71_v35  ;;  %v1813_v32 = vld [vmem:[%s2622_s8 + $0x8] sm:$0xff]   ;;  %v1815_v34 = vld [vmem:[%s2622_s8] sm:$0xff]  }
  0x94   :  { %1818 = vrsqrt.f32 %v99_v33  ;;  %v1814_v33 = vld [vmem:[%s2621_s6] sm:$0xff]  }
  0x95   :  { %v102_v38 = vadd.f32 1e-05, %v94_v36  ;;  %v100_v39 = vadd.f32 1e-05, %v92_v37 }
  0x96   :  { %v83_v40 = vpop.xlane.xlu1 %82  ;;  %v80_v41 = vpop.xlane.xlu0 %79 }
  0x97   :  { %1820 = vrsqrt.f32 %v102_v38  ;;  %v96_v42 = vmul.f32 0.03125, %v83_v40  ;;  %v95_v43 = vmul.f32 0.03125, %v80_v41 }
  0x98   :  { %1822 = vrsqrt.f32 %v100_v39 }
  0x99   :  { %v104_v44 = vadd.f32 1e-05, %v96_v42  ;;  %v103_v45 = vadd.f32 1e-05, %v95_v43 }
  0x9a   :  { %v89_v46 = vpop.xlane.xlu1 %88  ;;  %v86_v47 = vpop.xlane.xlu0 %85 }
  0x9b   :  { %1824 = vrsqrt.f32 %v104_v44  ;;  %v98_v48 = vmul.f32 0.03125, %v89_v46  ;;  %v97_v49 = vmul.f32 0.03125, %v86_v47  ;;  %v2167_v46 = vld [vmem:[%s2623_s4 + $0x1] ss:$0 sm:$0xff] }
  0x9c   :  { %1826 = vrsqrt.f32 %v103_v45  ;;  %v2161_v45 = vld [vmem:[%s2623_s4] ss:$0 sm:$0xff] }
  0x9d   :  { %v106_v50 = vadd.f32 1e-05, %v98_v48  ;;  %v105_v51 = vadd.f32 1e-05, %v97_v49  ;;  %v2174_v49 = vld [vmem:[%s2624_s5] ss:$0 sm:$0xff] }
  0x9f   :  { %1828 = vrsqrt.f32 %v106_v50 }
  0xa0   :  { %v1817_v52 = vpop.eup %1816  ;;  %1830 = vrsqrt.f32 %v105_v51 }
  0xa1   :  { %v1819_v53 = vpop.eup %1818  ;;  %v117_v54 = vmul.f32 %v1817_v52, %v2025_v0 }
  0xa2   :  { %v115_v56 = vmul.f32 %v1819_v53, %v2030_v1 }
  0xa3   :  { %v132_v61 = vmul.f32 %v1568_v57, %v117_v54 }
  0xa4   :  { %v1821_v55 = vpop.eup %1820  ;;  %v130_v3 = vmul.f32 %v1568_v57, %v115_v56 }
  0xa5   :  { %v1823_v58 = vpop.eup %1822  ;;  %v118_v59 = vmul.f32 %v1821_v55, %v2035_v2 }
  0xa6   :  { %v116_v60 = vmul.f32 %v1823_v58, %v2046_v6 }
  0xa7   :  { %v133_v62 = vmul.f32 %v1568_v57, %v118_v59 }
  0xa8   :  { %v1825_v63 = vpop.eup %1824  ;;  %v131_v4 = vmul.f32 %v1568_v57, %v116_v60 }
  0xa9   :  { %v1827_v5 = vpop.eup %1826  ;;  %v139_v7 = vpack.c.bf16 %v133_v62, %v132_v61  ;;  %v120_v10 = vmul.f32 %v1825_v63, %v2053_v8  ;;  %v2191_v61 = vld [vmem:[%s2623_s4 + $0x3] ss:$0 sm:$0xff] }
  0xaa   :  { %v138_v11 = vpack.c.bf16 %v131_v4, %v130_v3  ;;  %v119_v12 = vmul.f32 %v1827_v5, %v2058_v9 }
  0xab   :  { %v135_v13 = vmul.f32 %v1568_v57, %v120_v10 }
  0xac   :  { %v1829_v14 = vpop.eup %1828  ;;  %1719 = vmatprep.mubr.msk.bf16.mxu0 %vm65_vm0, %v138_v11  ;;  %1731 = vmatprep.mubr.msk.bf16.mxu1 %vm65_vm0, %v138_v11  ;;  %v134_v15 = vmul.f32 %v1568_v57, %v119_v12 }
  0xad   :  { %v1831_v18 = vpop.eup %1830  ;;  %1720 = vmatmul.mubr.msk.bf16.vlgmr.msra.gmra.mxu0 %vm65_vm0, %v139_v7  ;;  %1732 = vmatmul.mubr.msk.bf16.vlgmr.msra.gmra.mxu1 %vm65_vm0, %v139_v7  ;;  %v122_v19 = vmul.f32 %v1829_v14, %v2071_v16 }
  0xae   :  { %v140_v20 = vpack.c.bf16 %v135_v13, %v134_v15  ;;  %v121_v21 = vmul.f32 %v1831_v18, %v2076_v17  ;;  %1740 = vmatpush3.bf16.msra.mxu0 %v1808_v27  ;;  %1756 = vmatpush3.bf16.msra.mxu1 %v1809_v28 }
  0xaf   :  { %v137_v22 = vmul.f32 %v1568_v57, %v122_v19  ;;  %1741 = vmatprep.subr.bf16.mxu0 %v1810_v29  ;;  %1757 = vmatprep.subr.bf16.mxu1 %v1811_v30 }
  0xb0   :  { %1723 = vmatprep.mubr.msk.bf16.mxu0 %vm65_vm0, %v140_v20  ;;  %1735 = vmatprep.mubr.msk.bf16.mxu1 %vm65_vm0, %v140_v20  ;;  %v136_v23 = vmul.f32 %v1568_v57, %v121_v21  ;;  %v2183_v57 = vld [vmem:[%s2623_s4 + $0x2] ss:$0 sm:$0xff] }
  0xb2   :  { %v141_v24 = vpack.c.bf16 %v137_v22, %v136_v23  ;;  %1742 = vmatpush3.bf16.msra.mxu0 %v1810_v29  ;;  %1758 = vmatpush3.bf16.msra.mxu1 %v1811_v30 }
  0xb3   :  { %1743 = vmatprep.subr.bf16.mxu0 %v1812_v31  ;;  %1759 = vmatprep.subr.bf16.mxu1 %v1813_v32 }
  0xb5   :  { %1724 = vmatmul.mubr.msk.bf16.gmra.mxu0 %vm65_vm0, %v141_v24  ;;  %1736 = vmatmul.mubr.msk.bf16.gmra.mxu1 %vm65_vm0, %v141_v24 }
  0xb6   :  { %1744 = vmatpush3.bf16.msra.mxu0 %v1812_v31  ;;  %1760 = vmatpush3.bf16.msra.mxu1 %v1813_v32 }
  0xb7   :  { %1745 = vmatprep.subr.bf16.mxu0 %v1814_v33  ;;  %1761 = vmatprep.subr.bf16.mxu1 %v1815_v34 }
  0xba   :  { %1746 = vmatpush3.bf16.msra.mxu0 %v1814_v33  ;;  %1762 = vmatpush3.bf16.msra.mxu1 %v1815_v34 }
 0x16d   :  { %v1721_v35 = vpop.f32.mrf.mxu0  ;;  %v2144_v36 = vpop.f32.mrf.mxu1 }
 0x16e   :  { %321 = vst.msk [vmem:[#allocation4 + $0x18] sm:$0xff] %vm46_vm1, %v1721_v35 }
 0x16f   :  { %v204_v37 = vpop.f32.mrf.mxu0  ;;  %v2147_v38 = vpop.f32.mrf.mxu1 }
 0x170   :  { %319 = vst.msk [vmem:[#allocation4 + $0x8] sm:$0xff] %vm46_vm1, %v204_v37 }
 0x171   :  { %v1722_v39 = vpop.f32.mrf.mxu0  ;;  %v2150_v40 = vpop.f32.mrf.mxu1 }
 0x172   :  { %322 = vst.msk [vmem:[#allocation4 + $0x20] sm:$0xff] %vm46_vm1, %v1722_v39 }
 0x173   :  { %v207_v41 = vpop.f32.mrf.mxu0  ;;  %v2153_v42 = vpop.f32.mrf.mxu1 }
 0x174   :  { %320 = vst.msk [vmem:[#allocation4 + $0x10] sm:$0xff] %vm46_vm1, %v207_v41 }
 0x175   :  { %v1725_v43 = vpop.f32.mrf.mxu0  ;;  %v2156_v44 = vpop.f32.mrf.mxu1  ;;  %v425_v29 = vld [vmem:[#allocation4 + $0x18] sm:$0xff] }
 0x176   :  { %325 = vst.msk [vmem:[#allocation4 + $0x38] sm:$0xff] %vm46_vm1, %v1725_v43 }
 0x177   :  { %v220_v47 = vpop.f32.mrf.mxu0  ;;  %v2169_v48 = vpop.f32.mrf.mxu1  ;;  %v330_v50 = vld [vmem:[#allocation4 + $0x5] sm:$0xff] }
 0x178   :  { %v365_v51 = vld [vmem:[#allocation4 + $0x6] sm:$0xff]  ;;  %323 = vst.msk [vmem:[#allocation4 + $0x28] sm:$0xff] %vm46_vm1, %v220_v47  ;;  %v343_v52 = vmul.f32 %v2161_v45, %v330_v50 }
 0x179   :  { %v333_v53 = vld [vmem:[#allocation4 + $0x1d] sm:$0xff]  ;;  %v1726_v54 = vpop.f32.mrf.mxu0  ;;  %v2178_v55 = vpop.f32.mrf.mxu1  ;;  %v394_v56 = vld [vmem:[#allocation4 + $0x7] sm:$0xff]  ;;  %v378_v59 = vmul.f32 %v2167_v46, %v365_v51 }
 0x17a   :  { %326 = vst.msk [vmem:[#allocation4 + $0x40] sm:$0xff] %vm46_vm1, %v1726_v54  ;;  %v357_v58 = vadd.f32 %v2174_v49, %v343_v52  ;;  %v423_v60 = vld [vmem:[#allocation4 + $0x8] sm:$0xff]  ;;  %v346_v62 = vmul.f32 %v2161_v45, %v333_v53  ;;  %v368_v63 = vld [vmem:[#allocation4 + $0x1e] sm:$0xff]  ;;  %v407_v14 = vmul.f32 %v2183_v57, %v394_v56  ;;  %v438_v54 = vmul.f32 %v2191_v61, %v425_v29 }
 0x17b   :  { %v332_v3 = vld [vmem:[#allocation4 + $0x15] sm:$0xff]  ;;  %v223_v4 = vpop.f32.mrf.mxu0  ;;  %v2194_v5 = vpop.f32.mrf.mxu1  ;;  %v331_v7 = vld [vmem:[#allocation4 + $0xd] sm:$0xff]  ;;  %v397_v19 = vld [vmem:[#allocation4 + $0x1f] sm:$0xff]  ;;  %v436_v21 = vmul.f32 %v2191_v61, %v423_v60  ;;  %v381_v23 = vmul.f32 %v2167_v46, %v368_v63 }
 0x17c   :  { %v366_v10 = vld [vmem:[#allocation4 + $0xe] sm:$0xff]  ;;  %324 = vst.msk [vmem:[#allocation4 + $0x30] sm:$0xff] %vm46_vm1, %v223_v4  ;;  %v344_v11 = vmul.f32 %v2161_v45, %v331_v7  ;;  %v386_v12 = vadd.f32 %v378_v59, %v357_v58  ;;  %v345_v15 = vmul.f32 %v2161_v45, %v332_v3  ;;  %v367_v18 = vld [vmem:[#allocation4 + $0x16] sm:$0xff]  ;;  %v360_v22 = vadd.f32 %v2174_v49, %v346_v62  ;;  %v426_v30 = vld [vmem:[#allocation4 + $0x20] sm:$0xff] }
 0x17d   :  { %v395_v13 = vld [vmem:[#allocation4 + $0xf] sm:$0xff]  ;;  %v379_v20 = vmul.f32 %v2167_v46, %v366_v10  ;;  %v396_v24 = vld [vmem:[#allocation4 + $0x17] sm:$0xff]  ;;  %v380_v28 = vmul.f32 %v2167_v46, %v367_v18  ;;  %v410_v35 = vmul.f32 %v2183_v57, %v397_v19  ;;  %v439_v56 = vmul.f32 %v2191_v61, %v426_v30 }
 0x17e   :  { %v358_v25 = vadd.f32 %v2174_v49, %v344_v11  ;;  %v415_v26 = vadd.f32 %v407_v14, %v386_v12  ;;  %v359_v27 = vadd.f32 %v2174_v49, %v345_v15  ;;  %v408_v31 = vmul.f32 %v2183_v57, %v395_v13  ;;  %v424_v32 = vld [vmem:[#allocation4 + $0x10] sm:$0xff] }
 0x17f   :  { %v389_v33 = vadd.f32 %v381_v23, %v360_v22  ;;  %v409_v34 = vmul.f32 %v2183_v57, %v396_v24  ;;  %v334_v37 = vld [vmem:[#allocation4 + $0x25] sm:$0xff]  ;;  %v437_v59 = vmul.f32 %v2191_v61, %v424_v32 }
 0x180   :  { %v387_v39 = vadd.f32 %v379_v20, %v358_v25  ;;  %v2210_v41 = vadd.f32 %v436_v21, %v415_v26  ;;  %v388_v43 = vadd.f32 %v380_v28, %v359_v27  ;;  %v347_v47 = vmul.f32 %v2161_v45, %v334_v37  ;;  %v369_v50 = vld [vmem:[#allocation4 + $0x26] sm:$0xff] }
 0x181   :  { %v398_v51 = vld [vmem:[#allocation4 + $0x27] sm:$0xff]  ;;  %v418_v53 = vadd.f32 %v410_v35, %v389_v33  ;;  %v337_v3 = vld [vmem:[#allocation4 + $0x3d] sm:$0xff]  ;;  %v382_v12 = vmul.f32 %v2167_v46, %v369_v50 }
 0x182   :  { %v2213_v52 = vld [vmem:[#allocation4 + $0x40] sm:$0xff]  ;;  %v416_v58 = vadd.f32 %v408_v31, %v387_v39  ;;  %v452_v60 = vand.u32 2147483647, %v2210_v41  ;;  %v417_v62 = vadd.f32 %v409_v34, %v388_v43  ;;  %v427_v63 = vld [vmem:[#allocation4 + $0x28] sm:$0xff]  ;;  %v361_v10 = vadd.f32 %v2174_v49, %v347_v47 }
 0x183   :  { %328 = vst.msk [vmem:[#allocation3] sm:$0xff] %vm46_vm1, %v2213_v52  ;;  %v2221_v4 = vadd.f32 %v439_v56, %v418_v53  ;;  %v335_v7 = vld [vmem:[#allocation4 + $0x2d] sm:$0xff]  ;;  %v411_v13 = vmul.f32 %v2183_v57, %v398_v51  ;;  %v372_v14 = vld [vmem:[#allocation4 + $0x3e] sm:$0xff]  ;;  %v440_v25 = vmul.f32 %v2191_v61, %v427_v63  ;;  %v350_v26 = vmul.f32 %v2161_v45, %v337_v3  ;;  %v336_v30 = vld [vmem:[#allocation4 + $0x35] sm:$0xff] }
 0x184   :  { %v370_v11 = vld [vmem:[#allocation4 + $0x2e] sm:$0xff]  ;;  %v2226_v15 = vadd.f32 %v437_v59, %v416_v58  ;;  %v460_v18 = vsub.f32 0.0, %v452_v60  ;;  %v2228_v19 = vadd.f32 %v438_v54, %v417_v62  ;;  %v348_v20 = vmul.f32 %v2161_v45, %v335_v7  ;;  %v371_v37 = vld [vmem:[#allocation4 + $0x36] sm:$0xff] }
 0x185   :  { %v399_v21 = vld [vmem:[#allocation4 + $0x2f] sm:$0xff]  ;;  %v455_v22 = vand.u32 2147483647, %v2221_v4  ;;  %v390_v23 = vadd.f32 %v382_v12, %v361_v10  ;;  %v383_v29 = vmul.f32 %v2167_v46, %v370_v11  ;;  %v385_v31 = vmul.f32 %v2167_v46, %v372_v14  ;;  %v400_v62 = vld [vmem:[#allocation4 + $0x37] sm:$0xff]  ;;  %v401_v10 = vld [vmem:[#allocation4 + $0x3f] sm:$0xff] }
 0x186   :  { %v428_v24 = vld [vmem:[#allocation4 + $0x30] sm:$0xff]  ;;  %v453_v27 = vand.u32 2147483647, %v2226_v15  ;;  %v468_v28 = vmul.f32 1.442695, %v460_v18  ;;  %v362_v34 = vadd.f32 %v2174_v49, %v348_v20  ;;  %v412_v35 = vmul.f32 %v2183_v57, %v399_v21 }
 0x187   :  { %v454_v32 = vand.u32 2147483647, %v2228_v19  ;;  %v463_v33 = vsub.f32 0.0, %v455_v22  ;;  %v419_v43 = vadd.f32 %v411_v13, %v390_v23  ;;  %v441_v47 = vmul.f32 %v2191_v61, %v428_v24  ;;  %v429_v13 = vld [vmem:[#allocation4 + $0x38] sm:$0xff] }
 0x188   :  { %v461_v39 = vsub.f32 0.0, %v453_v27  ;;  %1832 = vpow2.f32 %v468_v28  ;;  %v391_v53 = vadd.f32 %v383_v29, %v362_v34  ;;  %v349_v54 = vmul.f32 %v2161_v45, %v336_v30 }
 0x189   :  { %v462_v50 = vsub.f32 0.0, %v454_v32  ;;  %v474_v51 = vmul.f32 1.442695, %v463_v33  ;;  %v2242_v58 = vadd.f32 %v440_v25, %v419_v43  ;;  %v364_v59 = vadd.f32 %v2174_v49, %v350_v26 }
 0x18a   :  { %v470_v56 = vmul.f32 1.442695, %v461_v39  ;;  %v384_v60 = vmul.f32 %v2167_v46, %v371_v37  ;;  %v420_v3 = vadd.f32 %v412_v35, %v391_v53  ;;  %v363_v7 = vadd.f32 %v2174_v49, %v349_v54 }
 0x18b   :  { %v472_v63 = vmul.f32 1.442695, %v462_v50  ;;  %1834 = vpow2.f32 %v474_v51  ;;  %v456_v11 = vand.u32 2147483647, %v2242_v58  ;;  %v393_v12 = vadd.f32 %v385_v31, %v364_v59 }
 0x18c   :  { %1836 = vpow2.f32 %v470_v56  ;;  %v2248_v45 = vadd.f32 %v441_v47, %v420_v3  ;;  %v392_v14 = vadd.f32 %v384_v60, %v363_v7  ;;  %v413_v18 = vmul.f32 %v2183_v57, %v400_v62 }
 0x18d   :  { %1838 = vpow2.f32 %v472_v63  ;;  %v464_v20 = vsub.f32 0.0, %v456_v11  ;;  %v414_v46 = vmul.f32 %v2183_v57, %v401_v10  ;;  %v442_v49 = vmul.f32 %v2191_v61, %v429_v13 }
 0x18e   :  { %v457_v21 = vand.u32 2147483647, %v2248_v45  ;;  %v421_v22 = vadd.f32 %v413_v18, %v392_v14  ;;  %v443_v25 = vmul.f32 %v2191_v61, %v2213_v52  ;;  %vm500_vm2 = vcmp.ge.f32.partialorder %v2210_v41, 0.0 }
 0x18f   :  { %v476_v23 = vmul.f32 1.442695, %v464_v20  ;;  %v422_v24 = vadd.f32 %v414_v46, %v393_v12  ;;  %vm503_vm3 = vcmp.ge.f32.partialorder %v2221_v4, 0.0  ;;  %vm501_vm4 = vcmp.ge.f32.partialorder %v2226_v15, 0.0 }
 0x190   :  { %v465_v26 = vsub.f32 0.0, %v457_v21  ;;  %v2256_v27 = vadd.f32 %v442_v49, %v421_v22  ;;  %vm502_vm5 = vcmp.ge.f32.partialorder %v2228_v19, 0.0  ;;  %vm504_vm6 = vcmp.ge.f32.partialorder %v2242_v58, 0.0 }
 0x191   :  { %1840 = vpow2.f32 %v476_v23  ;;  %v2258_v28 = vadd.f32 %v443_v25, %v422_v24  ;;  %vm505_vm7 = vcmp.ge.f32.partialorder %v2248_v45, 0.0 }
 0x192   :  { %v478_v29 = vmul.f32 1.442695, %v465_v26  ;;  %v458_v30 = vand.u32 2147483647, %v2256_v27  ;;  %vm506_vm8 = vcmp.ge.f32.partialorder %v2256_v27, 0.0 }
 0x193   :  { %v459_v57 = vand.u32 2147483647, %v2258_v28  ;;  %vm507_vm9 = vcmp.ge.f32.partialorder %v2258_v28, 0.0 }
 0x194   :  { %1842 = vpow2.f32 %v478_v29  ;;  %v466_v32 = vsub.f32 0.0, %v458_v30 }
 0x195   :  { %v1833_v31 = vpop.eup %1832  ;;  %v467_v34 = vsub.f32 0.0, %v459_v57 }
 0x196   :  { %v484_v33 = vadd.f32 1.0, %v1833_v31  ;;  %v480_v35 = vmul.f32 1.442695, %v466_v32 }
 0x197   :  { %v482_v61 = vmul.f32 1.442695, %v467_v34 }
 0x198   :  { %v1835_v37 = vpop.eup %1834  ;;  %1844 = vrcp.f32 %v484_v33 }
 0x199   :  { %v1837_v52 = vpop.eup %1836  ;;  %v487_v39 = vadd.f32 1.0, %v1835_v37  ;;  %1846 = vpow2.f32 %v480_v35 }
 0x19a   :  { %v1839_v43 = vpop.eup %1838  ;;  %v485_v47 = vadd.f32 1.0, %v1837_v52  ;;  %1848 = vpow2.f32 %v482_v61 }
 0x19b   :  { %v486_v50 = vadd.f32 1.0, %v1839_v43  ;;  %1850 = vrcp.f32 %v487_v39 }
 0x19c   :  { %1852 = vrcp.f32 %v485_v47  ;;  %v855_v47 = vlaneseq }
 0x19d   :  { %1854 = vrcp.f32 %v486_v50  ;;  %v2313_v50 = vld [vmem:[%s2625_s9] sm:$0xff] }
 0x19e   :  { %v1841_v51 = vpop.eup %1840 }
 0x19f   :  { %v488_v53 = vadd.f32 1.0, %v1841_v51  ;;  %v2315_v51 = vshrl.u32 %v855_v47, 7 }
 0x1a1   :  { %v1843_v54 = vpop.eup %1842  ;;  %1856 = vrcp.f32 %v488_v53  ;;  %v857_v53 = vadd.s32 8, %v2315_v51 }
 0x1a2   :  { %v489_v56 = vadd.f32 1.0, %v1843_v54 }
 0x1a4   :  { %1858 = vrcp.f32 %v489_v56  ;;  %v1586_v56 = vld [vmem:[%s2626_s7] ss:$0 sm:$0xff]  ;;  %s2394_s7 = smov 0  }
 0x1a5   :  { %v1845_v59 = vpop.eup %1844 }
 0x1a6   :  { %v1847_v60 = vpop.eup %1846  ;;  %v508_v62 = vsub.f32 1.0, %v1845_v59 }
 0x1a7   :  { %v1849_v63 = vpop.eup %1848  ;;  %v490_v3 = vadd.f32 1.0, %v1847_v60 }
 0x1a8   :  { %v1851_v7 = vpop.eup %1850  ;;  %v491_v10 = vadd.f32 1.0, %v1849_v63  ;;  %v516_v18 = vsel %vm500_vm2, %v1845_v59, %v508_v62 }
 0x1a9   :  { %v1853_v11 = vpop.eup %1852  ;;  %v511_v12 = vsub.f32 1.0, %v1851_v7  ;;  %1860 = vrcp.f32 %v490_v3  ;;  %v2267_v22 = vmul.f32 %v516_v18, %v2210_v41 }
 0x1aa   :  { %v1855_v13 = vpop.eup %1854  ;;  %v509_v14 = vsub.f32 1.0, %v1853_v11  ;;  %1862 = vrcp.f32 %v491_v10 }
 0x1ab   :  { %v510_v20 = vsub.f32 1.0, %v1855_v13  ;;  %v519_v46 = vsel %vm503_vm3, %v1851_v7, %v511_v12 }
 0x1ac   :  { %v517_v21 = vsel %vm501_vm4, %v1853_v11, %v509_v14  ;;  %v2276_v25 = vmul.f32 %v519_v46, %v2221_v4 }
 0x1ad   :  { %v2270_v49 = vmul.f32 %v517_v21, %v2226_v15  ;;  %v518_v23 = vsel %vm502_vm5, %v1855_v13, %v510_v20 }
 0x1ae   :  { %v2273_v24 = vmul.f32 %v518_v23, %v2228_v19  ;;  %v1857_v26 = vpop.eup %1856 }
 0x1af   :  { %v532_v29 = vpack.c.bf16 %v2270_v49, %v2267_v22  ;;  %v512_v57 = vsub.f32 1.0, %v1857_v26 }
 0x1b0   :  { %v533_v30 = vpack.c.bf16 %v2276_v25, %v2273_v24 }
 0x1b1   :  { %1747 = vmatprep.mubr.msk.bf16.mxu0 %vm46_vm1, %v532_v29  ;;  %1763 = vmatprep.mubr.msk.bf16.mxu1 %vm46_vm1, %v532_v29  ;;  %v1859_v41 = vpop.eup %1858  ;;  %v520_v15 = vsel %vm504_vm6, %v1857_v26, %v512_v57 }
 0x1b2   :  { %1748 = vmatmul.mubr.msk.bf16.vlgmr.msra.gmra.mxu0 %vm46_vm1, %v533_v30  ;;  %1764 = vmatmul.mubr.msk.bf16.vlgmr.msra.gmra.mxu1 %vm46_vm1, %v533_v30  ;;  %v513_v4 = vsub.f32 1.0, %v1859_v41  ;;  %v2289_v32 = vmul.f32 %v520_v15, %v2242_v58 }
 0x1b4   :  { %v521_v19 = vsel %vm505_vm7, %v1859_v41, %v513_v4 }
 0x1b5   :  { %v2292_v33 = vmul.f32 %v521_v19, %v2248_v45 }
 0x1b6   :  { %v1861_v31 = vpop.eup %1860 }
 0x1b7   :  { %v1863_v34 = vpop.eup %1862  ;;  %v514_v35 = vsub.f32 1.0, %v1861_v31  ;;  %v534_v37 = vpack.c.bf16 %v2292_v33, %v2289_v32 }
 0x1b8   :  { %v515_v61 = vsub.f32 1.0, %v1863_v34 }
 0x1b9   :  { %v522_v52 = vsel %vm506_vm8, %v1861_v31, %v514_v35  ;;  %1751 = vmatprep.mubr.msk.bf16.mxu0 %vm46_vm1, %v534_v37  ;;  %1767 = vmatprep.mubr.msk.bf16.mxu1 %vm46_vm1, %v534_v37 }
 0x1ba   :  { %v523_v58 = vsel %vm507_vm9, %v1863_v34, %v515_v61  ;;  %v2301_v39 = vmul.f32 %v522_v52, %v2256_v27  ;;  %v859_v27 = vand.u32 127, %v855_v47 }
 0x1bb   :  { %v2304_v45 = vmul.f32 %v523_v58, %v2258_v28 }
 0x1bc   :  { %vm2319_vm10 = vcmp.eq.s32.totalorder %v2315_v51, %v859_v27  ;;  %vm2323_vm11 = vcmp.eq.s32.totalorder %v857_v53, %v859_v27 }
 0x1bd   :  { %v535_v43 = vpack.c.bf16 %v2304_v45, %v2301_v39 }
 0x1bf   :  { %1752 = vmatmul.mubr.msk.bf16.gmra.mxu0 %vm46_vm1, %v535_v43  ;;  %1768 = vmatmul.mubr.msk.bf16.gmra.mxu1 %vm46_vm1, %v535_v43 }
 0x272   :  { %v1749_v59 = vpop.f32.mrf.mxu0  ;;  %v1765_v60 = vpop.f32.mrf.mxu1 }
 0x273   :  { %v2330_v62 = vadd.f32 %v1749_v59, %v1586_v56  ;;  %848 = vst.msk [vmem:[#allocation7 + $0x10] sm:$0xff] %vm845_vm12, %v1765_v60 }
 0x274   :  { %v621_v63 = vpop.f32.mrf.mxu0  ;;  %v814_v3 = vpop.f32.mrf.mxu1 }
 0x275   :  { %v662_v7 = vand.u32 2147483647, %v2330_v62  ;;  %v2334_v10 = vadd.f32 %v1586_v56, %v621_v63  ;;  %846 = vst.msk [vmem:[#allocation7] sm:$0xff] %vm845_vm12, %v814_v3 }
 0x276   :  { %v1750_v11 = vpop.f32.mrf.mxu0  ;;  %v1766_v12 = vpop.f32.mrf.mxu1 }
 0x277   :  { %v670_v13 = vsub.f32 0.0, %v662_v7  ;;  %v660_v14 = vand.u32 2147483647, %v2334_v10  ;;  %v2338_v18 = vadd.f32 %v1750_v11, %v1586_v56  ;;  %849 = vst.msk [vmem:[#allocation7 + $0x18] sm:$0xff] %vm845_vm12, %v1766_v12 }
 0x278   :  { %v624_v20 = vpop.f32.mrf.mxu0  ;;  %v817_v46 = vpop.f32.mrf.mxu1 }
 0x279   :  { %v680_v21 = vmul.f32 1.442695, %v670_v13  ;;  %v668_v23 = vsub.f32 0.0, %v660_v14  ;;  %v663_v26 = vand.u32 2147483647, %v2338_v18  ;;  %847 = vst.msk [vmem:[#allocation7 + $0x8] sm:$0xff] %vm845_vm12, %v817_v46  ;;  %v2343_v29 = vadd.f32 %v1586_v56, %v624_v20 }
 0x27b   :  { %1864 = vpow2.f32 %v680_v21  ;;  %v676_v30 = vmul.f32 1.442695, %v668_v23  ;;  %v671_v57 = vsub.f32 0.0, %v663_v26  ;;  %v661_v41 = vand.u32 2147483647, %v2343_v29 }
 0x27d   :  { %1866 = vpow2.f32 %v676_v30  ;;  %v682_v4 = vmul.f32 1.442695, %v671_v57  ;;  %v669_v15 = vsub.f32 0.0, %v661_v41 }
 0x27f   :  { %1868 = vpow2.f32 %v682_v4  ;;  %v1753_v19 = vpop.f32.mrf.mxu0  ;;  %v1769_v31 = vpop.f32.mrf.mxu1  ;;  %v678_v34 = vmul.f32 1.442695, %v669_v15 }
 0x280   :  { %v2346_v35 = vadd.f32 %v1753_v19, %v1586_v56  ;;  %852 = vst.msk [vmem:[#allocation7 + $0x30] sm:$0xff] %vm845_vm12, %v1769_v31 }
 0x281   :  { %v637_v37 = vpop.f32.mrf.mxu0  ;;  %v830_v61 = vpop.f32.mrf.mxu1  ;;  %1870 = vpow2.f32 %v678_v34 }
 0x282   :  { %v666_v52 = vand.u32 2147483647, %v2346_v35  ;;  %v2350_v58 = vadd.f32 %v1586_v56, %v637_v37  ;;  %850 = vst.msk [vmem:[#allocation7 + $0x20] sm:$0xff] %vm845_vm12, %v830_v61 }
 0x283   :  { %v1754_v43 = vpop.f32.mrf.mxu0  ;;  %v1770_v47 = vpop.f32.mrf.mxu1 }
 0x284   :  { %v674_v27 = vsub.f32 0.0, %v666_v52  ;;  %v664_v53 = vand.u32 2147483647, %v2350_v58  ;;  %v2354_v59 = vadd.f32 %v1754_v43, %v1586_v56  ;;  %853 = vst.msk [vmem:[#allocation7 + $0x38] sm:$0xff] %vm845_vm12, %v1770_v47  ;;  %v654_v47 = vmax.f32 %v2330_v62, 0.0 }
 0x285   :  { %v640_v60 = vpop.f32.mrf.mxu0  ;;  %v833_v63 = vpop.f32.mrf.mxu1 }
 0x286   :  { %v688_v3 = vmul.f32 1.442695, %v674_v27  ;;  %v672_v7 = vsub.f32 0.0, %v664_v53  ;;  %v667_v11 = vand.u32 2147483647, %v2354_v59  ;;  %851 = vst.msk [vmem:[#allocation7 + $0x28] sm:$0xff] %vm845_vm12, %v833_v63  ;;  %v2359_v12 = vadd.f32 %v1586_v56, %v640_v60 }
 0x288   :  { %v1865_v13 = vpop.eup %1864  ;;  %1872 = vpow2.f32 %v688_v3  ;;  %v684_v14 = vmul.f32 1.442695, %v672_v7  ;;  %v675_v20 = vsub.f32 0.0, %v667_v11  ;;  %v665_v21 = vand.u32 2147483647, %v2359_v12 }
 0x289   :  { %v694_v46 = vadd.f32 1.0, %v1865_v13  ;;  %v652_v3 = vmax.f32 %v2334_v10, 0.0 }
 0x28a   :  { %v1867_v23 = vpop.eup %1866  ;;  %1874 = vpow2.f32 %v684_v14  ;;  %v690_v26 = vmul.f32 1.442695, %v675_v20  ;;  %v673_v57 = vsub.f32 0.0, %v665_v21 }
 0x28b   :  { %1876 = vlog2.f32 %v694_v46  ;;  %v692_v30 = vadd.f32 1.0, %v1867_v23  ;;  %v655_v46 = vmax.f32 %v2338_v18, 0.0 }
 0x28c   :  { %v1869_v41 = vpop.eup %1868  ;;  %1878 = vpow2.f32 %v690_v26  ;;  %v686_v15 = vmul.f32 1.442695, %v673_v57 }
 0x28d   :  { %1880 = vlog2.f32 %v692_v30  ;;  %v695_v4 = vadd.f32 1.0, %v1869_v41  ;;  %v653_v30 = vmax.f32 %v2343_v29, 0.0  ;;  %v658_v29 = vmax.f32 %v2346_v35, 0.0 }
 0x28e   :  { %v1871_v56 = vpop.eup %1870 }
 0x28f   :  { %1882 = vlog2.f32 %v695_v4  ;;  %v693_v19 = vadd.f32 1.0, %v1871_v56 }
 0x290   :  { %1884 = vpow2.f32 %v686_v15 }
 0x291   :  { %1886 = vlog2.f32 %v693_v19 }
 0x295   :  { %v1873_v31 = vpop.eup %1872 }
 0x296   :  { %v698_v34 = vadd.f32 1.0, %v1873_v31 }
 0x297   :  { %v1875_v37 = vpop.eup %1874 }
 0x298   :  { %v1877_v61 = vpop.eup %1876  ;;  %1888 = vlog2.f32 %v698_v34  ;;  %v696_v52 = vadd.f32 1.0, %v1875_v37  ;;  %v656_v34 = vmax.f32 %v2350_v58, 0.0 }
 0x299   :  { %v1879_v43 = vpop.eup %1878  ;;  %v705_v27 = vmul.f32 0.6931472, %v1877_v61 }
 0x29a   :  { %v1881_v53 = vpop.eup %1880  ;;  %1890 = vlog2.f32 %v696_v52  ;;  %v699_v60 = vadd.f32 1.0, %v1879_v43 }
 0x29b   :  { %v718_v63 = vadd.f32 %v705_v27, %v654_v47  ;;  %v701_v7 = vmul.f32 0.6931472, %v1881_v53  ;;  %v659_v47 = vmax.f32 %v2354_v59, 0.0 }
 0x29c   :  { %v1883_v11 = vpop.eup %1882  ;;  %1892 = vlog2.f32 %v699_v60 }
 0x29d   :  { %v1885_v13 = vpop.eup %1884  ;;  %726 = vst.msk [vmem:[#allocation5 + $0x10] sm:$0xff] %vm46_vm1, %v718_v63  ;;  %v734_v14 = vmul.f32 %v718_v63, %v2273_v24  ;;  %v716_v20 = vadd.f32 %v701_v7, %v652_v3  ;;  %v707_v21 = vmul.f32 0.6931472, %v1883_v11  ;;  %v657_v63 = vmax.f32 %v2359_v12, 0.0 }
 0x29e   :  { %v697_v62 = vadd.f32 1.0, %v1885_v13  ;;  %v1887_v23 = vpop.eup %1886 }
 0x29f   :  { %742 = vst.msk [vmem:[#allocation6 + $0x10] sm:$0xff] %vm46_vm1, %v734_v14  ;;  %724 = vst.msk [vmem:[#allocation5] sm:$0xff] %vm46_vm1, %v716_v20  ;;  %v732_v10 = vmul.f32 %v716_v20, %v2267_v22  ;;  %v719_v26 = vadd.f32 %v707_v21, %v655_v46  ;;  %v703_v57 = vmul.f32 0.6931472, %v1887_v23 }
 0x2a0   :  { %1894 = vlog2.f32 %v697_v62 }
 0x2a1   :  { %740 = vst.msk [vmem:[#allocation6] sm:$0xff] %vm46_vm1, %v732_v10  ;;  %727 = vst.msk [vmem:[#allocation5 + $0x18] sm:$0xff] %vm46_vm1, %v719_v26  ;;  %v735_v18 = vmul.f32 %v719_v26, %v2276_v25  ;;  %v717_v41 = vadd.f32 %v703_v57, %v653_v30 }
 0x2a3   :  { %743 = vst.msk [vmem:[#allocation6 + $0x18] sm:$0xff] %vm46_vm1, %v735_v18  ;;  %725 = vst.msk [vmem:[#allocation5 + $0x8] sm:$0xff] %vm46_vm1, %v717_v41  ;;  %v733_v4 = vmul.f32 %v717_v41, %v2270_v49 }
 0x2a5   :  { %v1889_v15 = vpop.eup %1888  ;;  %741 = vst.msk [vmem:[#allocation6 + $0x8] sm:$0xff] %vm46_vm1, %v733_v4 }
 0x2a6   :  { %v713_v56 = vmul.f32 0.6931472, %v1889_v15 }
 0x2a7   :  { %v1891_v19 = vpop.eup %1890 }
 0x2a8   :  { %v722_v31 = vadd.f32 %v713_v56, %v658_v29  ;;  %v709_v37 = vmul.f32 0.6931472, %v1891_v19 }
 0x2a9   :  { %v1893_v61 = vpop.eup %1892 }
 0x2aa   :  { %730 = vst.msk [vmem:[#allocation5 + $0x30] sm:$0xff] %vm46_vm1, %v722_v31  ;;  %v738_v52 = vmul.f32 %v722_v31, %v2301_v39  ;;  %v720_v43 = vadd.f32 %v709_v37, %v656_v34  ;;  %v715_v27 = vmul.f32 0.6931472, %v1893_v61 }
 0x2ac   :  { %746 = vst.msk [vmem:[#allocation6 + $0x30] sm:$0xff] %vm46_vm1, %v738_v52  ;;  %728 = vst.msk [vmem:[#allocation5 + $0x20] sm:$0xff] %vm46_vm1, %v720_v43  ;;  %v736_v35 = vmul.f32 %v720_v43, %v2289_v32  ;;  %v723_v53 = vadd.f32 %v715_v27, %v659_v47 }
 0x2ad   :  { %v1895_v60 = vpop.eup %1894 }
 0x2ae   :  { %744 = vst.msk [vmem:[#allocation6 + $0x20] sm:$0xff] %vm46_vm1, %v736_v35  ;;  %731 = vst.msk [vmem:[#allocation5 + $0x38] sm:$0xff] %vm46_vm1, %v723_v53  ;;  %v739_v58 = vmul.f32 %v723_v53, %v2304_v45  ;;  %v711_v3 = vmul.f32 0.6931472, %v1895_v60 }
 0x2b0   :  { %747 = vst.msk [vmem:[#allocation6 + $0x38] sm:$0xff] %vm46_vm1, %v739_v58  ;;  %v721_v59 = vadd.f32 %v711_v3, %v657_v63 }
 0x2b2   :  { %729 = vst.msk [vmem:[#allocation5 + $0x28] sm:$0xff] %vm46_vm1, %v721_v59  ;;  %v737_v7 = vmul.f32 %v721_v59, %v2292_v33 }
 0x2b4   :  { %745 = vst.msk [vmem:[#allocation6 + $0x28] sm:$0xff] %vm46_vm1, %v737_v7 }
 0x2b5 LB: > { %s2400_s9 = sshll.u32 %s1954_s7, 3  ;;  %vm956_vm13 = vcmp.eq.s32.totalorder %v2315_v51, 1  ;;  %vm910_vm14 = vcmp.eq.s32.totalorder %v2315_v51, 0  ;;  %vm1002_vm15 = vcmp.eq.s32.totalorder %v2315_v51, 2  ;;  %vm1048_vm2 = vcmp.eq.s32.totalorder %v2315_v51, 3  ;;  %s867_s7 = sadd.s32 1, %s1954_s7   ;;  %s1954_s7 = sphi %s2394_s7, %s867_s7  }
 0x2b6   : > { %s2403_s29 = scalar_lea.vmem [#allocation7], %s2400_s9  ;;  %s2462_s30 = scalar_lea.vmem [#allocation5], %s2400_s9  ;;  %vm1094_vm3 = vcmp.eq.s32.totalorder %v2315_v51, 4  ;;  %vm1140_vm4 = vcmp.eq.s32.totalorder %v2315_v51, 5  ;;  %vm1186_vm5 = vcmp.eq.s32.totalorder %v2315_v51, 6  ;;  %vm1232_vm6 = vcmp.eq.s32.totalorder %v2315_v51, 7 }
 0x2b7   : > { %v1622_v12 = vld [vmem:[%s2403_s29 + $0x2] ss:$0 sm:$0xff]  ;;  %v1604_v11 = vld [vmem:[%s2403_s29] ss:$0 sm:$0xff]  ;;  %v1631_v13 = vld [vmem:[%s2403_s29 + $0x3] ss:$0 sm:$0xff] }
 0x2b8   : > { %v972_v14 = vsel %vm2319_vm10, %v1622_v12, 0.0  ;;  %v880_v20 = vsel %vm2319_vm10, %v1604_v11, 0.0  ;;  %v1018_v46 = vsel %vm2319_vm10, %v1631_v13, 0.0  ;;  %v1613_v21 = vld [vmem:[%s2403_s29 + $0x1] ss:$0 sm:$0xff]  ;;  %v881_v18 = vsel %vm2323_vm11, %v1604_v11, 0.0 }
 0x2b9   : > { %v974_v62 = vsel %vm845_vm12, %v972_v14, 0.0  ;;  %v882_v23 = vsel %vm845_vm12, %v880_v20, 0.0  ;;  %v926_v10 = vsel %vm2319_vm10, %v1613_v21, 0.0  ;;  %v1640_v26 = vld [vmem:[%s2403_s29 + $0x4] ss:$0 sm:$0xff]  ;;  %v1020_v30 = vsel %vm845_vm12, %v1018_v46, 0.0 }
 0x2ba   : > { %975 = vadd.xlane.f32.xlu1 %v974_v62  ;;  %883 = vadd.xlane.f32.xlu0 %v882_v23  ;;  %v928_v57 = vsel %vm845_vm12, %v926_v10, 0.0  ;;  %v1064_v41 = vsel %vm2319_vm10, %v1640_v26, 0.0  ;;  %v1649_v4 = vld [vmem:[%s2403_s29 + $0x5] ss:$0 sm:$0xff]  ;;  %v885_v15 = vsel %vm845_vm12, %v881_v18, 0.0  ;;  %v927_v19 = vsel %vm2323_vm11, %v1613_v21, 0.0 }
 0x2bb   : > { %v1066_v29 = vsel %vm845_vm12, %v1064_v41, 0.0  ;;  %v1110_v56 = vsel %vm2319_vm10, %v1649_v4, 0.0  ;;  %v931_v34 = vsel %vm845_vm12, %v927_v19, 0.0  ;;  %v1019_v37 = vsel %vm2323_vm11, %v1631_v13, 0.0  ;;  %v1658_v52 = vld [vmem:[%s2403_s29 + $0x6] ss:$0 sm:$0xff] }
 0x2bc   : > { %v1112_v31 = vsel %vm845_vm12, %v1110_v56, 0.0  ;;  %v973_v61 = vsel %vm2323_vm11, %v1622_v12, 0.0  ;;  %v1023_v43 = vsel %vm845_vm12, %v1019_v37, 0.0  ;;  %v1065_v27 = vsel %vm2323_vm11, %v1640_v26, 0.0  ;;  %v1667_v53 = vld [vmem:[%s2403_s29 + $0x7] ss:$0 sm:$0xff] }
 0x2bd   : > { %v977_v47 = vsel %vm845_vm12, %v973_v61, 0.0  ;;  %v1156_v35 = vsel %vm2319_vm10, %v1658_v52, 0.0  ;;  %v1069_v60 = vsel %vm845_vm12, %v1065_v27, 0.0  ;;  %v1111_v63 = vsel %vm2323_vm11, %v1649_v4, 0.0  ;;  %v1605_v20 = vld [vmem:[%s2462_s30] ss:$0 sm:$0xff] }
 0x2be   : > { %1021 = vadd.xlane.f32.xlu1 %v1020_v30  ;;  %929 = vadd.xlane.f32.xlu0 %v928_v57  ;;  %v1158_v58 = vsel %vm845_vm12, %v1156_v35, 0.0  ;;  %v1202_v3 = vsel %vm2319_vm10, %v1667_v53, 0.0  ;;  %v1115_v59 = vsel %vm845_vm12, %v1111_v63, 0.0  ;;  %v1157_v12 = vsel %vm2323_vm11, %v1658_v52, 0.0  ;;  %v1614_v21 = vld [vmem:[%s2462_s30 + $0x1] ss:$0 sm:$0xff] }
 0x2bf   : > { %v1204_v7 = vsel %vm845_vm12, %v1202_v3, 0.0  ;;  %v1203_v11 = vsel %vm2323_vm11, %v1667_v53, 0.0  ;;  %v1161_v13 = vsel %vm845_vm12, %v1157_v12, 0.0  ;;  %v892_v46 = vmul.f32 %v1605_v20, %v2313_v50  ;;  %v1623_v10 = vld [vmem:[%s2462_s30 + $0x2] ss:$0 sm:$0xff]  ;;  %s2478_s13 = scalar_lea.vmem [#allocation6], %s2400_s9 }
 0x2c0   : > { %v1207_v14 = vsel %vm845_vm12, %v1203_v11, 0.0  ;;  %v938_v23 = vmul.f32 %v1614_v21, %v2313_v50  ;;  %v984_v30 = vmul.f32 %v1623_v10, %v2313_v50  ;;  %v1632_v57 = vld [vmem:[%s2462_s30 + $0x3] ss:$0 sm:$0xff]  ;;  %v1641_v4 = vld [vmem:[%s2462_s30 + $0x4] ss:$0 sm:$0xff]  ;;  %s1238_s14 = scalar_lea.vmem [#allocation8], %s2400_s9 }
 0x2c1   : > { %v893_v62 = vmul.f32 1.442695, %v892_v46  ;;  %v1030_v41 = vmul.f32 %v1632_v57, %v2313_v50  ;;  %v1650_v56 = vld [vmem:[%s2462_s30 + $0x5] ss:$0 sm:$0xff]  ;;  %v1659_v61 = vld [vmem:[%s2462_s30 + $0x6] ss:$0 sm:$0xff] }
 0x2c2   : > { %886 = vadd.xlane.f32.xlu1 %v885_v15  ;;  %1067 = vadd.xlane.f32.xlu0 %v1066_v29  ;;  %v939_v26 = vmul.f32 1.442695, %v938_v23  ;;  %v985_v18 = vmul.f32 1.442695, %v984_v30  ;;  %v1076_v29 = vmul.f32 %v1641_v4, %v2313_v50  ;;  %v1122_v37 = vmul.f32 %v1650_v56, %v2313_v50  ;;  %v1606_v52 = vld [vmem:[%s2478_s13] ss:$0 sm:$0xff] }
 0x2c3   : > { %1896 = vpow2.f32 %v893_v62  ;;  %v1031_v15 = vmul.f32 1.442695, %v1030_v41  ;;  %v1168_v35 = vmul.f32 %v1659_v61, %v2313_v50  ;;  %v1615_v63 = vld [vmem:[%s2478_s13 + $0x1] ss:$0 sm:$0xff]  ;;  %v1668_v3 = vld [vmem:[%s2462_s30 + $0x7] ss:$0 sm:$0xff] }
 0x2c4   : > { %1898 = vpow2.f32 %v939_v26  ;;  %v1214_v20 = vmul.f32 %v1668_v3, %v2313_v50  ;;  %v1624_v21 = vld [vmem:[%s2478_s13 + $0x2] ss:$0 sm:$0xff]  ;;  %v1633_v4 = vld [vmem:[%s2478_s13 + $0x3] ss:$0 sm:$0xff]  ;;  %p864_p0 = scmp.ge.s32.totalorder %s867_s7, 8  }
 0x2c5   : > { %1900 = vpow2.f32 %v985_v18  ;;  %v1169_v11 = vmul.f32 1.442695, %v1168_v35  ;;  %v1272_v50 = vand.u32 (%p864_p0), 2147483647, %v2153_v42  ;;  %v1275_v28 = vand.u32 (%p864_p0), 2147483647, %v2169_v48 }
 0x2c6   : > { %1113 = vadd.xlane.f32.xlu1 %v1112_v31  ;;  %932 = vadd.xlane.f32.xlu0 %v931_v34  ;;  %v869_v31 = vld [vmem:[#allocation2] sm:$0xff]  ;;  %1902 = vpow2.f32 %v1031_v15  ;;  %v1077_v34 = vmul.f32 1.442695, %v1076_v29  ;;  %v1215_v18 = vmul.f32 1.442695, %v1214_v20  ;;  %vm1319_vm7 = vcmp.ge.f32.partialorder (%p864_p0), %v2147_v38, 0.0 }
 0x2c7   :  { %v1276_v54 = vand.u32 (%p864_p0), 2147483647, %v2194_v5  ;;  %vm1320_vm8 = vcmp.ge.f32.partialorder (%p864_p0), %v2153_v42, 0.0  ;;  %vm1323_vm9 = vcmp.ge.f32.partialorder (%p864_p0), %v2169_v48, 0.0  ;;  %vm1324_vm10 = vcmp.ge.f32.partialorder (%p864_p0), %v2194_v5, 0.0 }
 0x2c8   : > { %1904 = vpow2.f32 %v1077_v34  ;;  %vm1321_vm11 = vcmp.ge.f32.partialorder (%p864_p0), %v2144_v36, 0.0  ;;  %vm1322_vm12 = vcmp.ge.f32.partialorder (%p864_p0), %v2150_v40, 0.0 }
 0x2ca   : > { %1024 = vadd.xlane.f32.xlu1 %v1023_v43  ;;  %978 = vadd.xlane.f32.xlu0 %v977_v47 }
 0x2ce   : > { %1070 = vadd.xlane.f32.xlu1 %v1069_v60  ;;  %1159 = vadd.xlane.f32.xlu0 %v1158_v58  ;;  %v1123_v60 = vmul.f32 1.442695, %v1122_v37 }
 0x2d0   : > { %v1897_v19 = vpop.eup %1896  ;;  %1906 = vpow2.f32 %v1123_v60 }
 0x2d1   : > { %v895_v43 = vmul.f32 %v1897_v19, %v869_v31  ;;  %v1899_v58 = vpop.eup %1898  ;;  %1908 = vpow2.f32 %v1169_v11 }
 0x2d2   : > { %1116 = vadd.xlane.f32.xlu0 %v1115_v59  ;;  %1205 = vadd.xlane.f32.xlu1 %v1204_v7  ;;  %v1901_v46 = vpop.eup %1900  ;;  %1910 = vpow2.f32 %v1215_v18 }
 0x2d3   : > { %v1903_v41 = vpop.eup %1902 }
 0x2d6   : > { %1162 = vadd.xlane.f32.xlu0 %v1161_v13  ;;  %1208 = vadd.xlane.f32.xlu1 %v1207_v14 }
 0x343   : > { %v976_v47 = vpop.xlane.xlu1 %975  ;;  %v884_v27 = vpop.xlane.xlu0 %883 }
 0x344   : > { %v900_v53 = vmul.f32 %v1606_v52, %v884_v27  ;;  %v992_v26 = vmul.f32 %v1624_v21, %v976_v47  ;;  %v1905_v52 = vpop.eup %1904  ;;  %v1642_v47 = vld [vmem:[%s2478_s13 + $0x4] ss:$0 sm:$0xff] }
 0x346   : > { %v901_v59 = vadd.f32 %v900_v53, %v895_v43 }
 0x347   : > { %v1022_v7 = vpop.xlane.xlu1 %1021  ;;  %v930_v12 = vpop.xlane.xlu0 %929 }
 0x348   : > { %v946_v13 = vmul.f32 %v1615_v63, %v930_v12  ;;  %v941_v14 = vmul.f32 %v1899_v58, %v901_v59  ;;  %v1038_v34 = vmul.f32 %v1633_v4, %v1022_v7  ;;  %v1651_v7 = vld [vmem:[%s2478_s13 + $0x5] ss:$0 sm:$0xff] }
 0x34a   : > { %v947_v62 = vadd.f32 %v946_v13, %v941_v14  ;;  %v1907_v13 = vpop.eup %1906 }
 0x34b   : > { %v887_v23 = vpop.xlane.xlu1 %886  ;;  %v1068_v10 = vpop.xlane.xlu0 %1067 }
 0x34c   : > { %v902_v30 = vmul.f32 %v901_v59, %v887_v23  ;;  %v987_v57 = vmul.f32 %v1901_v46, %v947_v62  ;;  %v1084_v3 = vmul.f32 %v1642_v47, %v1068_v10 }
 0x34e   : > { %v903_v15 = vsel %vm46_vm1, %v902_v30, 0.0  ;;  %v993_v29 = vadd.f32 %v992_v26, %v987_v57 }
 0x34f   : > { %v904_v56 = vrot.slane %v903_v15, 4  ;;  %v1114_v19 = vpop.xlane.xlu1 %1113  ;;  %v933_v31 = vpop.xlane.xlu0 %932 }
 0x350   : > { %v948_v37 = vmul.f32 %v947_v62, %v933_v31  ;;  %v1033_v61 = vmul.f32 %v1903_v41, %v993_v29  ;;  %v1909_v41 = vpop.eup %1908  ;;  %v1130_v10 = vmul.f32 %v1651_v7, %v1114_v19 }
 0x351   : > { %v905_v43 = vadd.f32 %v904_v56, %v903_v15 }
 0x352   : > { %v949_v27 = vsel %vm46_vm1, %v948_v37, 0.0  ;;  %v1039_v35 = vadd.f32 %v1038_v34, %v1033_v61  ;;  %v1660_v34 = vld [vmem:[%s2478_s13 + $0x6] ss:$0 sm:$0xff] }
 0x353   : > { %v906_v53 = vrot.slane %v905_v43, 2  ;;  %v950_v60 = vrot.slane %v949_v27, 4  ;;  %v1025_v58 = vpop.xlane.xlu1 %1024  ;;  %v979_v63 = vpop.xlane.xlu0 %978 }
 0x354   : > { %v1040_v59 = vmul.f32 %v1039_v35, %v1025_v58  ;;  %v994_v12 = vmul.f32 %v993_v29, %v979_v63  ;;  %v1079_v11 = vmul.f32 %v1905_v52, %v1039_v35 }
 0x355   : > { %v951_v14 = vadd.f32 %v950_v60, %v949_v27  ;;  %v907_v62 = vadd.f32 %v906_v53, %v905_v43  ;;  %v1669_v60 = vld [vmem:[%s2478_s13 + $0x7] ss:$0 sm:$0xff] }
 0x356   : > { %v1041_v20 = vsel %vm46_vm1, %v1040_v59, 0.0  ;;  %v995_v46 = vsel %vm46_vm1, %v994_v12, 0.0  ;;  %v1085_v21 = vadd.f32 %v1084_v3, %v1079_v11  ;;  %v1911_v59 = vpop.eup %1910 }
 0x357   : > { %v952_v23 = vrot.slane %v951_v14, 2  ;;  %v1042_v26 = vrot.slane %v1041_v20, 4  ;;  %v996_v30 = vrot.slane %v995_v46, 4  ;;  %v1071_v57 = vpop.xlane.xlu1 %1070  ;;  %v1160_v18 = vpop.xlane.xlu0 %1159  ;;  %v908_v52 = vrot.slane %v907_v62, 1 }
 0x358   : > { %v1086_v4 = vmul.f32 %v1085_v21, %v1071_v57  ;;  %v1125_v15 = vmul.f32 %v1907_v13, %v1085_v21  ;;  %v1176_v63 = vmul.f32 %v1660_v34, %v1160_v18 }
 0x359   : > { %v953_v29 = vadd.f32 %v952_v23, %v951_v14  ;;  %v1043_v56 = vadd.f32 %v1042_v26, %v1041_v20  ;;  %v997_v31 = vadd.f32 %v996_v30, %v995_v46  ;;  %v909_v21 = vadd.f32 %v908_v52, %v907_v62 }
 0x35a   : > { %v1087_v37 = vsel %vm46_vm1, %v1086_v4, 0.0  ;;  %v1131_v61 = vadd.f32 %v1130_v10, %v1125_v15 }
 0x35b   : > { %v954_v47 = vrot.slane %v953_v29, 1  ;;  %v1044_v43 = vrot.slane %v1043_v56, 2  ;;  %v998_v27 = vrot.slane %v997_v31, 2  ;;  %v1117_v35 = vpop.xlane.xlu0 %1116  ;;  %v1206_v53 = vpop.xlane.xlu1 %1205  ;;  %v1088_v58 = vrot.slane %v1087_v37, 4 }
 0x35c   : > { %v1132_v3 = vmul.f32 %v1131_v61, %v1117_v35  ;;  %v1171_v19 = vmul.f32 %v1909_v41, %v1131_v61  ;;  %v1222_v20 = vmul.f32 %v1669_v60, %v1206_v53  ;;  %v913_v62 = vsel %vm910_vm14, %v909_v21, 0.0 }
 0x35d   : > { %v955_v12 = vadd.f32 %v954_v47, %v953_v29  ;;  %v1045_v11 = vadd.f32 %v1044_v43, %v1043_v56  ;;  %v999_v13 = vadd.f32 %v998_v27, %v997_v31  ;;  %v1089_v7 = vadd.f32 %v1088_v58, %v1087_v37 }
 0x35e   : > { %v1133_v14 = vsel %vm46_vm1, %v1132_v3, 0.0  ;;  %v1177_v46 = vadd.f32 %v1176_v63, %v1171_v19  ;;  %vm1326_vm14 = vcmp.ge.f32.partialorder (%p864_p0), %v2178_v55, 0.0 }
 0x35f   : > { %v1000_v23 = vrot.slane %v999_v13, 1  ;;  %v1134_v26 = vrot.slane %v1133_v14, 4  ;;  %v1163_v30 = vpop.xlane.xlu0 %1162  ;;  %v1090_v57 = vrot.slane %v1089_v7, 2  ;;  %v959_v10 = vsel %vm956_vm13, %v955_v12, 0.0  ;;  %v1209_v56 = vpop.xlane.xlu1 %1208 }
 0x360   : > { %v1178_v18 = vmul.f32 %v1177_v46, %v1163_v30  ;;  %v1217_v41 = vmul.f32 %v1911_v59, %v1177_v46  ;;  %v1046_v4 = vrot.slane %v1045_v11, 1  ;;  %v960_v43 = vadd.f32 %v959_v10, %v913_v62  ;;  %v1913_v62 = vld [vmem:[%s2617_s11 + $0x10] sm:$0xff] (%p864_p0)  }
 0x361   : > { %v1001_v15 = vadd.f32 %v1000_v23, %v999_v13  ;;  %v1135_v29 = vadd.f32 %v1134_v26, %v1133_v14  ;;  %v1091_v31 = vadd.f32 %v1090_v57, %v1089_v7  ;;  %vm1325_vm13 = vcmp.ge.f32.partialorder (%p864_p0), %v2156_v44, 0.0 }
 0x362   : > { %v1179_v34 = vsel %vm46_vm1, %v1178_v18, 0.0  ;;  %v1223_v37 = vadd.f32 %v1222_v20, %v1217_v41  ;;  %v1047_v53 = vadd.f32 %v1046_v4, %v1045_v11 }
 0x363   : > { %v1005_v61 = vsel %vm1002_vm15, %v1001_v15, 0.0  ;;  %v1136_v52 = vrot.slane %v1135_v29, 2  ;;  %v1180_v47 = vrot.slane %v1179_v34, 4  ;;  %v1092_v27 = vrot.slane %v1091_v31, 1 }
 0x364   : > { %v1224_v35 = vmul.f32 %v1223_v37, %v1209_v56  ;;  %1237 = vst.msk [vmem:[#allocation2] sm:$0xff] %vm46_vm1, %v1223_v37  ;;  %v1006_v63 = vadd.f32 %v1005_v61, %v960_v43  ;;  %v1051_v7 = vsel %vm1048_vm2, %v1047_v53, 0.0  ;;  %v1912_v37 = vld [vmem:[%s2617_s11 + $0x18] sm:$0xff] (%p864_p0)   ;;  %v1914_v61 = vld [vmem:[%s2617_s11 + $0x8] sm:$0xff] (%p864_p0)   ;;  %v1915_v43 = vld [vmem:[%s2617_s11] sm:$0xff] (%p864_p0)   ;;  %v1284_v53 = vsub.f32 (%p864_p0), 0.0, %v1276_v54 }
 0x365   : > { %v1137_v60 = vadd.f32 %v1136_v52, %v1135_v29  ;;  %v1181_v58 = vadd.f32 %v1180_v47, %v1179_v34  ;;  %v1093_v19 = vadd.f32 %v1092_v27, %v1091_v31  ;;  %1771 = vmatprep.subr.bf16.mxu0 (%p864_p0), %v1912_v37  ;;  %1787 = vmatprep.subr.bf16.mxu1 (%p864_p0), %v1912_v37  ;;  %v1271_v52 = vand.u32 (%p864_p0), 2147483647, %v2147_v38 }
 0x366   : > { %v1225_v3 = vsel %vm46_vm1, %v1224_v35, 0.0  ;;  %v1052_v21 = vadd.f32 %v1051_v7, %v1006_v63  ;;  %1772 = vmatpush3.bf16.msra.mxu0 (%p864_p0), %v1912_v37  ;;  %1791 = vmatpush3.bf16.msra.mxu1 (%p864_p0), %v1912_v37  ;;  %v1280_v47 = vsub.f32 (%p864_p0), 0.0, %v1272_v50  ;;  %v1283_v35 = vsub.f32 (%p864_p0), 0.0, %v1275_v28 }
 0x367   : > { %v1138_v59 = vrot.slane %v1137_v60, 1  ;;  %v1182_v12 = vrot.slane %v1181_v58, 2  ;;  %v1226_v13 = vrot.slane %v1225_v3, 4  ;;  %v1097_v11 = vsel %vm1094_vm3, %v1093_v19, 0.0  ;;  %1773 = vmatprep.subr.bf16.mxu0 (%p864_p0), %v1913_v62  ;;  %1788 = vmatprep.subr.bf16.mxu1 (%p864_p0), %v1913_v62 }
 0x368   : > { %v1098_v41 = vadd.f32 %v1097_v11, %v1052_v21  ;;  %v1279_v51 = vsub.f32 (%p864_p0), 0.0, %v1271_v52  ;;  %v1295_v63 = vmul.f32 (%p864_p0), 1.442695, %v1283_v35  ;;  %v1274_v19 = vand.u32 (%p864_p0), 2147483647, %v2150_v40 }
 0x369   : > { %v1139_v14 = vadd.f32 %v1138_v59, %v1137_v60  ;;  %v1183_v20 = vadd.f32 %v1182_v12, %v1181_v58  ;;  %v1227_v46 = vadd.f32 %v1226_v13, %v1225_v3  ;;  %v1289_v60 = vmul.f32 (%p864_p0), 1.442695, %v1280_v47 }
 0x36a   :  { %1774 = vmatpush3.bf16.msra.mxu0 (%p864_p0), %v1913_v62  ;;  %1792 = vmatpush3.bf16.msra.mxu1 (%p864_p0), %v1913_v62  ;;  %v1287_v27 = vmul.f32 (%p864_p0), 1.442695, %v1279_v51  ;;  %v1273_v58 = vand.u32 (%p864_p0), 2147483647, %v2144_v36  ;;  %v1297_v3 = vmul.f32 (%p864_p0), 1.442695, %v1284_v53 }
 0x36b   : > { %v1184_v23 = vrot.slane %v1183_v20, 1  ;;  %v1228_v26 = vrot.slane %v1227_v46, 2  ;;  %v1143_v30 = vsel %vm1140_vm4, %v1139_v14, 0.0  ;;  %1775 = vmatprep.subr.bf16.mxu0 (%p864_p0), %v1914_v61  ;;  %1789 = vmatprep.subr.bf16.mxu1 (%p864_p0), %v1914_v61  ;;  %v1282_v12 = vsub.f32 (%p864_p0), 0.0, %v1274_v19 }
 0x36c   : > { %v1144_v15 = vadd.f32 %v1143_v30, %v1098_v41  ;;  %1916 = vpow2.f32 (%p864_p0), %v1287_v27  ;;  %v1281_v59 = vsub.f32 (%p864_p0), 0.0, %v1273_v58  ;;  %v1277_v14 = vand.u32 (%p864_p0), 2147483647, %v2156_v44 }
 0x36d   : > { %v1185_v57 = vadd.f32 %v1184_v23, %v1183_v20  ;;  %v1229_v18 = vadd.f32 %v1228_v26, %v1227_v46  ;;  %1918 = vpow2.f32 (%p864_p0), %v1289_v60  ;;  %v1293_v7 = vmul.f32 (%p864_p0), 1.442695, %v1282_v12 }
 0x36e   :  { %1776 = vmatpush3.bf16.msra.mxu0 (%p864_p0), %v1914_v61  ;;  %1793 = vmatpush3.bf16.msra.mxu1 (%p864_p0), %v1914_v61  ;;  %1920 = vpow2.f32 (%p864_p0), %v1295_v63  ;;  %v1291_v13 = vmul.f32 (%p864_p0), 1.442695, %v1281_v59  ;;  %v1278_v20 = vand.u32 (%p864_p0), 2147483647, %v2178_v55  ;;  %v1285_v46 = vsub.f32 (%p864_p0), 0.0, %v1277_v14 }
 0x36f   : > { %v1189_v10 = vsel %vm1186_vm5, %v1185_v57, 0.0  ;;  %v1230_v4 = vrot.slane %v1229_v18, 1  ;;  %1777 = vmatprep.subr.bf16.mxu0 (%p864_p0), %v1915_v43  ;;  %1790 = vmatprep.subr.bf16.mxu1 (%p864_p0), %v1915_v43  ;;  %1922 = vpow2.f32 (%p864_p0), %v1297_v3  ;;  %v1670_v61 = vld [vmem:[%s2616_s10] ss:$0 sm:$0xff] (%p864_p0) }
 0x370   : > { %v1190_v56 = vadd.f32 %v1189_v10, %v1144_v15  ;;  %1924 = vpow2.f32 (%p864_p0), %v1291_v13  ;;  %v1286_v21 = vsub.f32 (%p864_p0), 0.0, %v1278_v20  ;;  %v1299_v11 = vmul.f32 (%p864_p0), 1.442695, %v1285_v46 }
 0x371   : > { %v1231_v29 = vadd.f32 %v1230_v4, %v1229_v18  ;;  %1926 = vpow2.f32 (%p864_p0), %v1293_v7  ;;  %v1255_v51 = vmul.f32 (%p864_p0), %v1670_v61, %v2267_v22  ;;  %v1256_v28 = vmul.f32 (%p864_p0), %v1670_v61, %v2270_v49 }
 0x372   :  { %866 = sbr.rel (!%p864_p0) target bundleno = 693 (0x2b5), region = 104  ;;  %1778 = vmatpush3.bf16.msra.mxu0 (%p864_p0), %v1915_v43  ;;  %1794 = vmatpush3.bf16.msra.mxu1 (%p864_p0), %v1915_v43  ;;  %v1301_v23 = vmul.f32 (%p864_p0), 1.442695, %v1286_v21  ;;  %1928 = vpow2.f32 (%p864_p0), %v1299_v11  ;;  %v1259_v54 = vmul.f32 (%p864_p0), %v1670_v61, %v2289_v32  ;;  %v1260_v35 = vmul.f32 (%p864_p0), %v1670_v61, %v2292_v33 }
 0x373   : > { %v1235_v31 = vsel %vm1232_vm6, %v1231_v29, 0.0  ;;  %v1257_v58 = vmul.f32 (%p864_p0), %v1670_v61, %v2273_v24  ;;  %v1258_v24 = vmul.f32 (%p864_p0), %v1670_v61, %v2276_v25 }
 0x374   : > { %v1236_v34 = vadd.f32 %v1235_v31, %v1190_v56  ;;  %1930 = vpow2.f32 (%p864_p0), %v1301_v23 }
 0x376   : > { %1239 = vst.msk [vmem:[%s1238_s14] sm:$0xff] %vm46_vm1, %v1236_v34 }
 0x379   :  { %v1917_v26 = vpop.eup %1916 }
 0x37a   :  { %v1919_v30 = vpop.eup %1918  ;;  %v1303_v57 = vadd.f32 1.0, %v1917_v26 }
 0x37b   :  { %v1921_v18 = vpop.eup %1920  ;;  %v1304_v41 = vadd.f32 1.0, %v1919_v30 }
 0x37c   :  { %v1923_v10 = vpop.eup %1922  ;;  %1932 = vrcp.f32 %v1303_v57  ;;  %v1307_v4 = vadd.f32 1.0, %v1921_v18 }
 0x37d   :  { %1934 = vrcp.f32 %v1304_v41  ;;  %v1308_v15 = vadd.f32 1.0, %v1923_v10  ;;  %v1925_v29 = vpop.eup %1924  ;;  %v1240_v47 = vld [vmem:[#allocation8] sm:$0xff]  ;;  %v1241_v43 = vld [vmem:[#allocation8 + $0x8] sm:$0xff]  ;;  %v1242_v49 = vld [vmem:[#allocation8 + $0x10] sm:$0xff] }
 0x37e   :  { %1936 = vrcp.f32 %v1307_v4  ;;  %v1927_v56 = vpop.eup %1926  ;;  %v1305_v31 = vadd.f32 1.0, %v1925_v29  ;;  %v1244_v27 = vld [vmem:[#allocation8 + $0x20] sm:$0xff]  ;;  %v1245_v60 = vld [vmem:[#allocation8 + $0x28] sm:$0xff]  ;;  %v1263_v3 = vadd.f32 %v1255_v51, %v1240_v47  ;;  %v1264_v19 = vadd.f32 %v1256_v28, %v1241_v43  ;;  %v1243_v11 = vld [vmem:[#allocation8 + $0x18] sm:$0xff] }
 0x37f   :  { %1938 = vrcp.f32 %v1308_v15  ;;  %v1306_v34 = vadd.f32 1.0, %v1927_v56  ;;  %v1929_v37 = vpop.eup %1928  ;;  %v1267_v33 = vadd.f32 %v1259_v54, %v1244_v27  ;;  %v1268_v7 = vadd.f32 %v1260_v35, %v1245_v60 }
 0x380   :  { %1940 = vrcp.f32 %v1305_v31  ;;  %v1309_v52 = vadd.f32 1.0, %v1929_v37  ;;  %v1265_v23 = vadd.f32 %v1257_v58, %v1242_v49  ;;  %v1266_v29 = vadd.f32 %v1258_v24, %v1243_v11 }
 0x381   :  { %1942 = vrcp.f32 %v1306_v34  ;;  %v1931_v62 = vpop.eup %1930  ;;  %v1261_v34 = vmul.f32 %v1670_v61, %v2301_v39  ;;  %v1262_v37 = vmul.f32 %v1670_v61, %v2304_v45 }
 0x382   :  { %v1310_v50 = vadd.f32 1.0, %v1931_v62  ;;  %1944 = vrcp.f32 %v1309_v52 }
 0x384   :  { %1946 = vrcp.f32 %v1310_v50 }
 0x389   :  { %v1933_v53 = vpop.eup %1932 }
 0x38a   :  { %v1935_v63 = vpop.eup %1934  ;;  %v1327_v22 = vsub.f32 1.0, %v1933_v53 }
 0x38b   :  { %v1937_v32 = vpop.eup %1936  ;;  %v1328_v59 = vsub.f32 1.0, %v1935_v63 }
 0x38c   :  { %v1939_v12 = vpop.eup %1938  ;;  %v1335_v13 = vsel %vm1319_vm7, %v1933_v53, %v1327_v22  ;;  %v1331_v14 = vsub.f32 1.0, %v1937_v32 }
 0x38d   :  { %v1336_v20 = vsel %vm1320_vm8, %v1935_v63, %v1328_v59  ;;  %v1343_v46 = vmul.f32 %v1335_v13, %v2147_v38  ;;  %v1332_v21 = vsub.f32 1.0, %v1939_v12  ;;  %v1941_v26 = vpop.eup %1940 }
 0x38e   :  { %v1344_v30 = vmul.f32 %v1336_v20, %v2153_v42  ;;  %v1339_v57 = vsel %vm1323_vm9, %v1937_v32, %v1331_v14  ;;  %v1943_v18 = vpop.eup %1942  ;;  %v1329_v10 = vsub.f32 1.0, %v1941_v26 }
 0x38f   :  { %v1351_v41 = vmul.f32 %v1343_v46, %v1263_v3  ;;  %v1340_v25 = vsel %vm1324_vm10, %v1939_v12, %v1332_v21  ;;  %v1347_v38 = vmul.f32 %v1339_v57, %v2169_v48  ;;  %v1330_v42 = vsub.f32 1.0, %v1943_v18  ;;  %v1246_v48 = vld [vmem:[#allocation8 + $0x30] sm:$0xff]  ;;  %v1945_v28 = vpop.eup %1944 }
 0x390   :  { %v1352_v4 = vmul.f32 %v1344_v30, %v1264_v19  ;;  %v1348_v15 = vmul.f32 %v1340_v25, %v2194_v5  ;;  %v1337_v31 = vsel %vm1321_vm11, %v1941_v26, %v1329_v10  ;;  %v1247_v5 = vld [vmem:[#allocation8 + $0x38] sm:$0xff]  ;;  %v1333_v45 = vsub.f32 1.0, %v1945_v28 }
 0x391   :  { %v1355_v56 = vmul.f32 %v1347_v38, %v1267_v33  ;;  %v1338_v50 = vsel %vm1322_vm12, %v1943_v18, %v1330_v42  ;;  %v1345_v51 = vmul.f32 %v2144_v36, %v1337_v31  ;;  %v1947_v47 = vpop.eup %1946  ;;  %v1269_v27 = vadd.f32 %v1261_v34, %v1246_v48 }
 0x392   :  { %v1359_v62 = vpack.c.bf16 %v1352_v4, %v1351_v41  ;;  %v1356_v52 = vmul.f32 %v1348_v15, %v1268_v7  ;;  %v1346_v54 = vmul.f32 %v2150_v40, %v1338_v50  ;;  %v1334_v35 = vsub.f32 1.0, %v1947_v47 }
 0x393   :  { %v1353_v43 = vmul.f32 %v1345_v51, %v1265_v23  ;;  %v1270_v36 = vadd.f32 %v1262_v37, %v1247_v5  ;;  %v1341_v53 = vsel %vm1325_vm13, %v1945_v28, %v1333_v45 }
 0x394   :  { %1779 = vmatprep.mubr.msk.bf16.mxu0 %vm46_vm1, %v1359_v62  ;;  %v1361_v39 = vpack.c.bf16 %v1356_v52, %v1355_v56  ;;  %v1354_v61 = vmul.f32 %v1346_v54, %v1266_v29  ;;  %v1342_v40 = vsel %vm1326_vm14, %v1947_v47, %v1334_v35  ;;  %v1349_v58 = vmul.f32 %v2156_v44, %v1341_v53 }
 0x395   :  { %v1350_v63 = vmul.f32 %v2178_v55, %v1342_v40 }
 0x396   :  { %1783 = vmatprep.mubr.msk.bf16.mxu1 %vm46_vm1, %v1361_v39  ;;  %v1360_v60 = vpack.c.bf16 %v1354_v61, %v1353_v43  ;;  %v1357_v22 = vmul.f32 %v1349_v58, %v1269_v27 }
 0x397   :  { %v1358_v49 = vmul.f32 %v1350_v63, %v1270_v36 }
 0x398   :  { %1780 = vmatmul.mubr.msk.bf16.vlgmr.msra.gmra.mxu0 %vm46_vm1, %v1360_v60 }
 0x399   :  { %v1362_v32 = vpack.c.bf16 %v1358_v49, %v1357_v22 }
 0x39b   :  { %1784 = vmatmul.mubr.msk.bf16.vlgmr.msra.gmra.mxu1 %vm46_vm1, %v1362_v32 }
 0x458   :  { %v1781_v3 = vpop.f32.mrf.mxu0 }
 0x459   :  { %v1474_v19 = vadd.f32 %v1781_v3, %v2025_v0 }
 0x45a   :  { %v1441_v59 = vpop.f32.mrf.mxu0 }
 0x45b   :  { %1482 = vst.msk [vmem:[%s2618_s12 + $0x10] sm:$0xff] %vm65_vm0, %v1474_v19  ;;  %v1472_v44 = vadd.f32 %v1441_v59, %v2030_v1  ;;  %v1785_v55 = vpop.f32.mrf.mxu1 }
 0x45c   :  { %v1782_v33 = vpop.f32.mrf.mxu0  ;;  %v1478_v13 = vadd.f32 %v1785_v55, %v2076_v17 }
 0x45d   :  { %1480 = vst.msk [vmem:[%s2618_s12] sm:$0xff] %vm65_vm0, %v1472_v44  ;;  %v1475_v12 = vadd.f32 %v1782_v33, %v2035_v2  ;;  %v1457_v7 = vpop.f32.mrf.mxu1 }
 0x45e   :  { %v1444_v0 = vpop.f32.mrf.mxu0  ;;  %1486 = vst.msk [vmem:[%s2618_s12 + $0x30] sm:$0xff] %vm65_vm0, %v1478_v13  ;;  %v1476_v14 = vadd.f32 %v1457_v7, %v2058_v9 }
 0x45f   :  { %1483 = vst.msk [vmem:[%s2618_s12 + $0x18] sm:$0xff] %vm65_vm0, %v1475_v12  ;;  %v1473_v1 = vadd.f32 %v1444_v0, %v2046_v6  ;;  %v1786_v24 = vpop.f32.mrf.mxu1 }
 0x460   :  { %1484 = vst.msk [vmem:[%s2618_s12 + $0x20] sm:$0xff] %vm65_vm0, %v1476_v14  ;;  %v1479_v2 = vadd.f32 %v1786_v24, %v2071_v16 }
 0x461   :  { %1481 = vst.msk [vmem:[%s2618_s12 + $0x8] sm:$0xff] %vm65_vm0, %v1473_v1  ;;  %v1460_v6 = vpop.f32.mrf.mxu1 }
 0x462   :  { %1487 = vst.msk [vmem:[%s2618_s12 + $0x38] sm:$0xff] %vm65_vm0, %v1479_v2  ;;  %v1477_v9 = vadd.f32 %v1460_v6, %v2053_v8 }
 0x464   :  { %1485 = vst.msk [vmem:[%s2618_s12 + $0x28] sm:$0xff] %vm65_vm0, %v1477_v9 }

</bundles_post_ra>
